<compile_context>
chip_gen: v5e
topology: v5e:2x2
jax: 0.10.0
libtpu: 0.0.40
codegen_flags: <defaults>
</compile_context>

<pallas_src>
import functools

import jax
import jax.numpy as jnp
from jax import lax
from jax.experimental import pallas as pl
from jax.experimental.pallas import tpu as pltpu

# ----------------------------- config (small) ------------------------------
B = 2            # batch
S = 8            # sequence length
H = 128          # hidden size ("codebert.config.hidden_size")
N_HEADS = 2
D_HEAD = H // N_HEADS
FFN = 256        # intermediate size
N_LAYERS = 2
VOCAB = 100
VOCAB_PAD = 128  # one-hot / table rows padded to a full lane tile
MAX_POS = 32
POS_PAD = 128
PROJ_HIDDEN = 512
PROJ_DIM = 64
PROJ_PAD = 128   # lane-dense padded projection width (sliced back to PROJ_DIM)
LN_EPS = 1e-5
PAD_ID = 1
BS = B * S

VMEM_SPEC = pl.BlockSpec(memory_space=pltpu.MemorySpace.VMEM)


# ------------------------------ kernel helpers ------------------------------
def _layernorm(x, g, b, eps=LN_EPS):
    mu = jnp.mean(x, axis=-1, keepdims=True)
    var = jnp.mean((x - mu) ** 2, axis=-1, keepdims=True)
    return (x - mu) * lax.rsqrt(var + eps) * g + b


def _erf_approx(x):
    # Abramowitz & Stegun 7.1.26 rational approximation, |err| <= 1.5e-7.
    a1, a2, a3, a4, a5 = (0.254829592, -0.284496736, 1.421413741,
                          -1.453152027, 1.061405429)
    pp = 0.3275911
    sgn = jnp.where(x >= 0.0, 1.0, -1.0)
    z = jnp.abs(x)
    # EUP reciprocal: error far below the polynomial's 1.5e-7 budget.
    t = pl.reciprocal(1.0 + pp * z, approx=True)
    poly = ((((a5 * t + a4) * t + a3) * t + a2) * t + a1) * t
    return sgn * (1.0 - poly * jnp.exp(-z * z))


def _gelu_exact(x):
    # erf-based GELU (matches HF RoBERTa "gelu").
    return 0.5 * x * (1.0 + _erf_approx(x * 0.7071067811865476))


# ------------------------------- fused kernel -------------------------------
def fused_model_kernel(ids_ref, pos_ref, maskc_ref, maskb_ref,
                       wemb_ref, pemb_ref, temb_ref, eln_g_ref, eln_b_ref,
                       wq_ref, bq_ref, wk_ref, bk_ref, wv_ref, bv_ref,
                       wo_ref, bo_ref, aln_g_ref, aln_b_ref,
                       w1_ref, b1_ref, w2_ref, b2_ref, fln_g_ref, fln_b_ref,
                       pw1_ref, pb1_ref, pw2_ref, pb2_ref,
                       out_ref):
    mask_col = maskc_ref[...]                       # (B*S, 1) f32
    mask_b1s = maskb_ref[...]                       # (B, 1, S) f32

    # ---------------- embeddings (one-hot MXU "gathers") ----------------
    ids = ids_ref[...]                              # (B*S, 1) int32
    pos = pos_ref[...]                              # (B*S, 1) int32
    oh_w = (ids == lax.broadcasted_iota(jnp.int32, (BS, VOCAB_PAD), 1)
            ).astype(jnp.float32)                   # (B*S, VOCAB_PAD)
    oh_p = (pos == lax.broadcasted_iota(jnp.int32, (BS, POS_PAD), 1)
            ).astype(jnp.float32)                   # (B*S, POS_PAD)
    emb = (jnp.dot(oh_w, wemb_ref[...], preferred_element_type=jnp.float32)
           + jnp.dot(oh_p, pemb_ref[...], preferred_element_type=jnp.float32)
           + temb_ref[...])                         # (B*S, H) f32
    x = _layernorm(emb, eln_g_ref[...], eln_b_ref[...])

    # additive attention-mask bias, broadcast over heads and query positions
    bias = (1.0 - mask_b1s) * (-1e9)                # (B, 1, S)

    for l in range(N_LAYERS):
        # ---------------- self-attention (no lane slices, no concats) ------
        xb = x.astype(jnp.bfloat16)
        attn = None
        for h in range(N_HEADS):
            i = l * N_HEADS + h
            q = (jnp.dot(xb, wq_ref[i], preferred_element_type=jnp.float32)
                 + bq_ref[i]).reshape(B, S, D_HEAD)       # scale pre-folded
            k = (jnp.dot(xb, wk_ref[i], preferred_element_type=jnp.float32)
                 + bk_ref[i]).reshape(B, S, D_HEAD)
            v = (jnp.dot(xb, wv_ref[i], preferred_element_type=jnp.float32)
                 + bv_ref[i]).reshape(B, S, D_HEAD)

            s = jnp.einsum('bqd,bkd->bqk', q, k,
                           preferred_element_type=jnp.float32) + bias  # (B,S,S)
            s = s - jnp.max(s, axis=-1, keepdims=True)
            p = jnp.exp(s)
            p = p * pl.reciprocal(jnp.sum(p, axis=-1, keepdims=True), approx=True)
            ctx = jnp.einsum('bqk,bkd->bqd', p, v,
                             preferred_element_type=jnp.float32)       # (B,S,Dh)

            part = jnp.dot(ctx.reshape(BS, D_HEAD).astype(jnp.bfloat16),
                           wo_ref[i], preferred_element_type=jnp.float32)
            attn = part if attn is None else attn + part
        attn = attn + bo_ref[l]                                        # (B*S, H)
        x = _layernorm(x + attn, aln_g_ref[l], aln_b_ref[l])

        # ---------------- feed-forward ----------------
        hft = (jnp.dot(x.astype(jnp.bfloat16), w1_ref[l],
                       preferred_element_type=jnp.float32) + b1_ref[l])
        hft = _gelu_exact(hft)
        y = (jnp.dot(hft.astype(jnp.bfloat16), w2_ref[l],
                     preferred_element_type=jnp.float32) + b2_ref[l])
        x = _layernorm(x + y, fln_g_ref[l], fln_b_ref[l])

    # -------- masked mean pool + projector + L2 normalize --------
    wsum = jnp.sum((x * mask_col).reshape(B, S, H), axis=1)            # (B, H)
    denom = jnp.maximum(jnp.sum(mask_b1s, axis=2), 1e-9)               # (B, 1)
    mean = wsum / denom                                                # exact

    z = (jnp.dot(mean.astype(jnp.bfloat16), pw1_ref[...],
                 preferred_element_type=jnp.float32) + pb1_ref[...])
    z = jnp.maximum(z, 0.0)
    proj = (jnp.dot(z.astype(jnp.bfloat16), pw2_ref[...],
                    preferred_element_type=jnp.float32) + pb2_ref[...])  # (B, PROJ_PAD)

    # F.normalize(p=2, dim=1, eps=1e-12); padded lanes are exactly zero so the
    # sum over PROJ_PAD lanes equals the sum over the real PROJ_DIM lanes.
    sumsq = jnp.sum(proj * proj, axis=1, keepdims=True)
    out_ref[...] = proj * lax.rsqrt(jnp.maximum(sumsq, 1e-24))


# ------------------------------ parameter init ------------------------------
def init_params(key):
    def normal(k, shape, std=0.02):
        return std * jax.random.normal(k, shape, dtype=jnp.float32)

    keys = iter(jax.random.split(key, 8 + N_LAYERS * 8 + 4))
    params = {
        'word_emb': normal(next(keys), (VOCAB, H)),
        'pos_emb': normal(next(keys), (MAX_POS, H)),
        'type_emb': normal(next(keys), (1, H)),
        'emb_ln_g': jnp.ones((1, H), jnp.float32),
        'emb_ln_b': jnp.zeros((1, H), jnp.float32),
        'layers': [],
    }
    for _ in range(N_LAYERS):
        layer = dict(
            wq=normal(next(keys), (H, H)), bq=jnp.zeros((1, H), jnp.float32),
            wk=normal(next(keys), (H, H)), bk=jnp.zeros((1, H), jnp.float32),
            wv=normal(next(keys), (H, H)), bv=jnp.zeros((1, H), jnp.float32),
            wo=normal(next(keys), (H, H)), bo=jnp.zeros((1, H), jnp.float32),
            attn_ln_g=jnp.ones((1, H), jnp.float32),
            attn_ln_b=jnp.zeros((1, H), jnp.float32),
            w1=normal(next(keys), (H, FFN)), b1=jnp.zeros((1, FFN), jnp.float32),
            w2=normal(next(keys), (FFN, H)), b2=jnp.zeros((1, H), jnp.float32),
            ffn_ln_g=jnp.ones((1, H), jnp.float32),
            ffn_ln_b=jnp.zeros((1, H), jnp.float32),
        )
        params['layers'].append(layer)
    params['proj_w1'] = normal(next(keys), (H, PROJ_HIDDEN))
    params['proj_b1'] = jnp.zeros((1, PROJ_HIDDEN), jnp.float32)
    params['proj_w2'] = normal(next(keys), (PROJ_HIDDEN, PROJ_DIM))
    params['proj_b2'] = jnp.zeros((1, PROJ_DIM), jnp.float32)
    return params


def prepare_params(params):
    """Pre-split per-head Q/K/V/O weights into a stacked (L*N_HEADS, ...) axis
    (so the kernel never lane-slices or concatenates), fold 1/sqrt(d_head) into
    the Q weights/bias, pad embedding tables / projector output to lane-dense
    widths, and cast matmul weights to bf16."""
    scale = 1.0 / (D_HEAD ** 0.5)
    layers = params['layers']
    bf16 = jnp.bfloat16

    def cols(a, h):
        return a[:, h * D_HEAD:(h + 1) * D_HEAD]

    wq_s = jnp.stack([cols(l['wq'], h) * scale for l in layers for h in range(N_HEADS)])
    bq_s = jnp.stack([cols(l['bq'], h) * scale for l in layers for h in range(N_HEADS)])
    wk_s = jnp.stack([cols(l['wk'], h) for l in layers for h in range(N_HEADS)])
    bk_s = jnp.stack([cols(l['bk'], h) for l in layers for h in range(N_HEADS)])
    wv_s = jnp.stack([cols(l['wv'], h) for l in layers for h in range(N_HEADS)])
    bv_s = jnp.stack([cols(l['bv'], h) for l in layers for h in range(N_HEADS)])
    wo_s = jnp.stack([l['wo'][h * D_HEAD:(h + 1) * D_HEAD, :]
                      for l in layers for h in range(N_HEADS)])   # (L*Nh, Dh, H)

    def stack(key):
        return jnp.stack([l[key] for l in layers])

    pad = PROJ_PAD - PROJ_DIM
    return dict(
        word_emb=jnp.pad(params['word_emb'], ((0, VOCAB_PAD - VOCAB), (0, 0))),
        pos_emb=jnp.pad(params['pos_emb'], ((0, POS_PAD - MAX_POS), (0, 0))),
        type_emb=params['type_emb'],
        emb_ln_g=params['emb_ln_g'], emb_ln_b=params['emb_ln_b'],
        wq=wq_s.astype(bf16), bq=bq_s, wk=wk_s.astype(bf16), bk=bk_s,
        wv=wv_s.astype(bf16), bv=bv_s,
        wo=wo_s.astype(bf16), bo=stack('bo'),
        aln_g=stack('attn_ln_g'), aln_b=stack('attn_ln_b'),
        w1=stack('w1').astype(bf16), b1=stack('b1'),
        w2=stack('w2').astype(bf16), b2=stack('b2'),
        fln_g=stack('ffn_ln_g'), fln_b=stack('ffn_ln_b'),
        pw1=params['proj_w1'].astype(bf16), pb1=params['proj_b1'],
        pw2=jnp.pad(params['proj_w2'], ((0, 0), (0, pad))).astype(bf16),
        pb2=jnp.pad(params['proj_b2'], ((0, 0), (0, pad))),
    )


# ------------------------------ forward (glue) -------------------------------
def contrastive_code_forward(prepared, input_ids, attention_mask):
    # Only tiny (<=16-element) index math remains outside the kernel; the
    # embedding row lookups themselves happen in-kernel via one-hot matmuls.
    mask_i = attention_mask.astype(jnp.int32)
    mask_f = attention_mask.astype(jnp.float32)
    pos_ids = jnp.cumsum(mask_i, axis=1) * mask_i + PAD_ID      # RoBERTa offsets

    ids_col = input_ids.astype(jnp.int32).reshape(BS, 1)
    pos_col = pos_ids.reshape(BS, 1)
    mask_col = mask_f.reshape(BS, 1)
    mask_b1s = mask_f.reshape(B, 1, S)

    args = (ids_col, pos_col, mask_col, mask_b1s,
            prepared['word_emb'], prepared['pos_emb'], prepared['type_emb'],
            prepared['emb_ln_g'], prepared['emb_ln_b'],
            prepared['wq'], prepared['bq'], prepared['wk'], prepared['bk'],
            prepared['wv'], prepared['bv'], prepared['wo'], prepared['bo'],
            prepared['aln_g'], prepared['aln_b'],
            prepared['w1'], prepared['b1'], prepared['w2'], prepared['b2'],
            prepared['fln_g'], prepared['fln_b'],
            prepared['pw1'], prepared['pb1'], prepared['pw2'], prepared['pb2'])

    # Advisory cost hint so XLA schedules the tiny surrounding glue sensibly.
    flops = (2 * BS * VOCAB_PAD * H + 2 * BS * POS_PAD * H
             + N_LAYERS * (3 * 2 * BS * H * H
                           + 2 * 2 * B * N_HEADS * S * S * D_HEAD
                           + 2 * BS * H * H
                           + 2 * 2 * BS * H * FFN)
             + 2 * B * H * PROJ_HIDDEN + 2 * B * PROJ_HIDDEN * PROJ_PAD)
    transcendentals = N_LAYERS * (N_HEADS * B * S * S + BS * FFN) + BS * H
    bytes_accessed = (sum(int(a.size) * a.dtype.itemsize for a in args)
                      + B * PROJ_PAD * 4)

    proj = pl.pallas_call(
        fused_model_kernel,
        out_shape=jax.ShapeDtypeStruct((B, PROJ_PAD), jnp.float32),
        in_specs=[VMEM_SPEC] * len(args),
        out_specs=VMEM_SPEC,
        cost_estimate=pl.CostEstimate(flops=flops,
                                      transcendentals=transcendentals,
                                      bytes_accessed=bytes_accessed),
    )(*args)
    return proj[:, :PROJ_DIM]


# ----------------------------------- main ------------------------------------
if __name__ == "__main__":
    key = jax.random.PRNGKey(0)
    k_param, k_ids = jax.random.split(key)

    params = init_params(k_param)
    prepared = prepare_params(params)

    input_ids = jax.random.randint(k_ids, (B, S), 0, VOCAB, dtype=jnp.int32)
    attention_mask = jnp.array([[1] * S, [1] * 5 + [0] * (S - 5)], dtype=jnp.int32)

    fwd = jax.jit(functools.partial(contrastive_code_forward, prepared))
    out = fwd(input_ids, attention_mask)
    out = jax.block_until_ready(out)

    assert out.shape == (B, PROJ_DIM)
    assert bool(jnp.all(jnp.isfinite(out)))
    # embeddings are L2-normalized along dim=1
    norms = jnp.linalg.norm(out, axis=1)
    assert bool(jnp.all(jnp.abs(norms - 1.0) < 1e-3))
    print("KERNEL_OK")
</pallas_src>

<mosaic_0001>
module attributes {stable_mosaic.version = 11 : i64} {
  func.func @fused_model_kernel(%arg0: memref<16x1xi32, #tpu.memory_space<vmem>>, %arg1: memref<16x1xi32, #tpu.memory_space<vmem>>, %arg2: memref<16x1xf32, #tpu.memory_space<vmem>>, %arg3: memref<2x1x8xf32, #tpu.memory_space<vmem>>, %arg4: memref<128x128xf32, #tpu.memory_space<vmem>>, %arg5: memref<128x128xf32, #tpu.memory_space<vmem>>, %arg6: memref<1x128xf32, #tpu.memory_space<vmem>>, %arg7: memref<1x128xf32, #tpu.memory_space<vmem>>, %arg8: memref<1x128xf32, #tpu.memory_space<vmem>>, %arg9: memref<4x128x64xbf16, #tpu.memory_space<vmem>>, %arg10: memref<4x1x64xf32, #tpu.memory_space<vmem>>, %arg11: memref<4x128x64xbf16, #tpu.memory_space<vmem>>, %arg12: memref<4x1x64xf32, #tpu.memory_space<vmem>>, %arg13: memref<4x128x64xbf16, #tpu.memory_space<vmem>>, %arg14: memref<4x1x64xf32, #tpu.memory_space<vmem>>, %arg15: memref<4x64x128xbf16, #tpu.memory_space<vmem>>, %arg16: memref<2x1x128xf32, #tpu.memory_space<vmem>>, %arg17: memref<2x1x128xf32, #tpu.memory_space<vmem>>, %arg18: memref<2x1x128xf32, #tpu.memory_space<vmem>>, %arg19: memref<2x128x256xbf16, #tpu.memory_space<vmem>>, %arg20: memref<2x1x256xf32, #tpu.memory_space<vmem>>, %arg21: memref<2x256x128xbf16, #tpu.memory_space<vmem>>, %arg22: memref<2x1x128xf32, #tpu.memory_space<vmem>>, %arg23: memref<2x1x128xf32, #tpu.memory_space<vmem>>, %arg24: memref<2x1x128xf32, #tpu.memory_space<vmem>>, %arg25: memref<128x512xbf16, #tpu.memory_space<vmem>>, %arg26: memref<1x512xf32, #tpu.memory_space<vmem>>, %arg27: memref<512x128xbf16, #tpu.memory_space<vmem>>, %arg28: memref<1x128xf32, #tpu.memory_space<vmem>>, %arg29: memref<2x128xf32, #tpu.memory_space<vmem>>) attributes {dimension_semantics = [], scalar_prefetch = 0 : i64, scratch_operands = 0 : i64, tpu.core_type = #tpu.core_type<tc>} {
    %c0 = arith.constant 0 : index
    %c0_0 = arith.constant 0 : index
    %0 = vector.load %arg2[%c0, %c0_0] : memref<16x1xf32, #tpu.memory_space<vmem>>, vector<16x1xf32>
    %c0_1 = arith.constant 0 : index
    %c0_2 = arith.constant 0 : index
    %c0_3 = arith.constant 0 : index
    %1 = vector.load %arg3[%c0_1, %c0_2, %c0_3] : memref<2x1x8xf32, #tpu.memory_space<vmem>>, vector<2x1x8xf32>
    %c0_4 = arith.constant 0 : index
    %c0_5 = arith.constant 0 : index
    %2 = vector.load %arg0[%c0_4, %c0_5] : memref<16x1xi32, #tpu.memory_space<vmem>>, vector<16x1xi32>
    %c0_6 = arith.constant 0 : index
    %c0_7 = arith.constant 0 : index
    %3 = vector.load %arg1[%c0_6, %c0_7] : memref<16x1xi32, #tpu.memory_space<vmem>>, vector<16x1xi32>
    %4 = tpu.iota {dimensions = array<i32: 1>} : vector<16x128xi32>
    %5 = vector.broadcast %2 : vector<16x1xi32> to vector<16x128xi32>
    %6 = arith.cmpi eq, %5, %4 : vector<16x128xi32>
    %7 = arith.extui %6 : vector<16x128xi1> to vector<16x128xi32>
    %8 = arith.sitofp %7 : vector<16x128xi32> to vector<16x128xf32>
    %9 = tpu.iota {dimensions = array<i32: 1>} : vector<16x128xi32>
    %10 = vector.broadcast %3 : vector<16x1xi32> to vector<16x128xi32>
    %11 = arith.cmpi eq, %10, %9 : vector<16x128xi32>
    %12 = arith.extui %11 : vector<16x128xi1> to vector<16x128xi32>
    %13 = arith.sitofp %12 : vector<16x128xi32> to vector<16x128xf32>
    %c0_8 = arith.constant 0 : index
    %c0_9 = arith.constant 0 : index
    %14 = vector.load %arg4[%c0_8, %c0_9] : memref<128x128xf32, #tpu.memory_space<vmem>>, vector<128x128xf32>
    %cst = arith.constant dense<0.000000e+00> : vector<16x128xf32>
    %15 = tpu.matmul %8, %14, %cst {dimension_numbers = #tpu.dot_dimension_numbers<[1], [0], [0], [1], [0, 0, 1, 1], [], []>} : vector<16x128xf32>, vector<128x128xf32>, vector<16x128xf32> -> vector<16x128xf32>
    %c0_10 = arith.constant 0 : index
    %c0_11 = arith.constant 0 : index
    %16 = vector.load %arg5[%c0_10, %c0_11] : memref<128x128xf32, #tpu.memory_space<vmem>>, vector<128x128xf32>
    %cst_12 = arith.constant dense<0.000000e+00> : vector<16x128xf32>
    %17 = tpu.matmul %13, %16, %cst_12 {dimension_numbers = #tpu.dot_dimension_numbers<[1], [0], [0], [1], [0, 0, 1, 1], [], []>} : vector<16x128xf32>, vector<128x128xf32>, vector<16x128xf32> -> vector<16x128xf32>
    %18 = arith.addf %15, %17 : vector<16x128xf32>
    %c0_13 = arith.constant 0 : index
    %c0_14 = arith.constant 0 : index
    %19 = vector.load %arg6[%c0_13, %c0_14] : memref<1x128xf32, #tpu.memory_space<vmem>>, vector<1x128xf32>
    %20 = vector.broadcast %19 : vector<1x128xf32> to vector<16x128xf32>
    %21 = arith.addf %18, %20 : vector<16x128xf32>
    %c0_15 = arith.constant 0 : index
    %c0_16 = arith.constant 0 : index
    %22 = vector.load %arg7[%c0_15, %c0_16] : memref<1x128xf32, #tpu.memory_space<vmem>>, vector<1x128xf32>
    %c0_17 = arith.constant 0 : index
    %c0_18 = arith.constant 0 : index
    %23 = vector.load %arg8[%c0_17, %c0_18] : memref<1x128xf32, #tpu.memory_space<vmem>>, vector<1x128xf32>
    %cst_19 = arith.constant dense<0.000000e+00> : vector<16xf32>
    %24 = vector.multi_reduction <add>, %21, %cst_19 [1] : vector<16x128xf32> to vector<16xf32>
    %25 = vector.shape_cast %24 : vector<16xf32> to vector<16x1xf32>
    %cst_20 = arith.constant 1.280000e+02 : f32
    %26 = vector.broadcast %cst_20 : f32 to vector<16x1xf32>
    %27 = arith.divf %25, %26 : vector<16x1xf32>
    %28 = vector.broadcast %27 : vector<16x1xf32> to vector<16x128xf32>
    %29 = arith.subf %21, %28 : vector<16x128xf32>
    %30 = arith.mulf %29, %29 : vector<16x128xf32>
    %cst_21 = arith.constant dense<0.000000e+00> : vector<16xf32>
    %31 = vector.multi_reduction <add>, %30, %cst_21 [1] : vector<16x128xf32> to vector<16xf32>
    %32 = vector.shape_cast %31 : vector<16xf32> to vector<16x1xf32>
    %cst_22 = arith.constant 1.280000e+02 : f32
    %33 = vector.broadcast %cst_22 : f32 to vector<16x1xf32>
    %34 = arith.divf %32, %33 : vector<16x1xf32>
    %35 = vector.broadcast %27 : vector<16x1xf32> to vector<16x128xf32>
    %36 = arith.subf %21, %35 : vector<16x128xf32>
    %cst_23 = arith.constant 9.99999974E-6 : f32
    %37 = vector.broadcast %cst_23 : f32 to vector<16x1xf32>
    %38 = arith.addf %34, %37 : vector<16x1xf32>
    %39 = math.rsqrt %38 : vector<16x1xf32>
    %40 = vector.broadcast %39 : vector<16x1xf32> to vector<16x128xf32>
    %41 = arith.mulf %36, %40 : vector<16x128xf32>
    %42 = vector.broadcast %22 : vector<1x128xf32> to vector<16x128xf32>
    %43 = arith.mulf %41, %42 : vector<16x128xf32>
    %44 = vector.broadcast %23 : vector<1x128xf32> to vector<16x128xf32>
    %45 = arith.addf %43, %44 : vector<16x128xf32>
    %cst_24 = arith.constant 1.000000e+00 : f32
    %46 = vector.broadcast %cst_24 : f32 to vector<2x1x8xf32>
    %47 = arith.subf %46, %1 : vector<2x1x8xf32>
    %cst_25 = arith.constant -1.000000e+09 : f32
    %48 = vector.broadcast %cst_25 : f32 to vector<2x1x8xf32>
    %49 = arith.mulf %47, %48 : vector<2x1x8xf32>
    %50 = arith.truncf %45 : vector<16x128xf32> to vector<16x128xbf16>
    %c0_26 = arith.constant 0 : index
    %c0_27 = arith.constant 0 : index
    %c0_28 = arith.constant 0 : index
    %51 = vector.load %arg9[%c0_26, %c0_27, %c0_28] : memref<4x128x64xbf16, #tpu.memory_space<vmem>>, vector<1x128x64xbf16>
    %52 = vector.shape_cast %51 : vector<1x128x64xbf16> to vector<128x64xbf16>
    %cst_29 = arith.constant dense<0.000000e+00> : vector<16x64xf32>
    %53 = tpu.matmul %50, %52, %cst_29 {dimension_numbers = #tpu.dot_dimension_numbers<[1], [0], [0], [1], [0, 0, 1, 1], [], []>} : vector<16x128xbf16>, vector<128x64xbf16>, vector<16x64xf32> -> vector<16x64xf32>
    %c0_30 = arith.constant 0 : index
    %c0_31 = arith.constant 0 : index
    %c0_32 = arith.constant 0 : index
    %54 = vector.load %arg10[%c0_30, %c0_31, %c0_32] : memref<4x1x64xf32, #tpu.memory_space<vmem>>, vector<1x1x64xf32>
    %55 = vector.shape_cast %54 : vector<1x1x64xf32> to vector<1x64xf32>
    %56 = vector.broadcast %55 : vector<1x64xf32> to vector<16x64xf32>
    %57 = arith.addf %53, %56 : vector<16x64xf32>
    %58 = vector.shape_cast %57 : vector<16x64xf32> to vector<2x8x64xf32>
    %c0_33 = arith.constant 0 : index
    %c0_34 = arith.constant 0 : index
    %c0_35 = arith.constant 0 : index
    %59 = vector.load %arg11[%c0_33, %c0_34, %c0_35] : memref<4x128x64xbf16, #tpu.memory_space<vmem>>, vector<1x128x64xbf16>
    %60 = vector.shape_cast %59 : vector<1x128x64xbf16> to vector<128x64xbf16>
    %cst_36 = arith.constant dense<0.000000e+00> : vector<16x64xf32>
    %61 = tpu.matmul %50, %60, %cst_36 {dimension_numbers = #tpu.dot_dimension_numbers<[1], [0], [0], [1], [0, 0, 1, 1], [], []>} : vector<16x128xbf16>, vector<128x64xbf16>, vector<16x64xf32> -> vector<16x64xf32>
    %c0_37 = arith.constant 0 : index
    %c0_38 = arith.constant 0 : index
    %c0_39 = arith.constant 0 : index
    %62 = vector.load %arg12[%c0_37, %c0_38, %c0_39] : memref<4x1x64xf32, #tpu.memory_space<vmem>>, vector<1x1x64xf32>
    %63 = vector.shape_cast %62 : vector<1x1x64xf32> to vector<1x64xf32>
    %64 = vector.broadcast %63 : vector<1x64xf32> to vector<16x64xf32>
    %65 = arith.addf %61, %64 : vector<16x64xf32>
    %66 = vector.shape_cast %65 : vector<16x64xf32> to vector<2x8x64xf32>
    %c0_40 = arith.constant 0 : index
    %c0_41 = arith.constant 0 : index
    %c0_42 = arith.constant 0 : index
    %67 = vector.load %arg13[%c0_40, %c0_41, %c0_42] : memref<4x128x64xbf16, #tpu.memory_space<vmem>>, vector<1x128x64xbf16>
    %68 = vector.shape_cast %67 : vector<1x128x64xbf16> to vector<128x64xbf16>
    %cst_43 = arith.constant dense<0.000000e+00> : vector<16x64xf32>
    %69 = tpu.matmul %50, %68, %cst_43 {dimension_numbers = #tpu.dot_dimension_numbers<[1], [0], [0], [1], [0, 0, 1, 1], [], []>} : vector<16x128xbf16>, vector<128x64xbf16>, vector<16x64xf32> -> vector<16x64xf32>
    %c0_44 = arith.constant 0 : index
    %c0_45 = arith.constant 0 : index
    %c0_46 = arith.constant 0 : index
    %70 = vector.load %arg14[%c0_44, %c0_45, %c0_46] : memref<4x1x64xf32, #tpu.memory_space<vmem>>, vector<1x1x64xf32>
    %71 = vector.shape_cast %70 : vector<1x1x64xf32> to vector<1x64xf32>
    %72 = vector.broadcast %71 : vector<1x64xf32> to vector<16x64xf32>
    %73 = arith.addf %69, %72 : vector<16x64xf32>
    %74 = vector.shape_cast %73 : vector<16x64xf32> to vector<2x8x64xf32>
    "tpu.trace_start"() <{level = 10 : i32, message = "bqd,bkd->bqk"}> : () -> ()
    %cst_47 = arith.constant dense<0.000000e+00> : vector<2x8x8xf32>
    %75 = tpu.matmul %58, %66, %cst_47 {dimension_numbers = #tpu.dot_dimension_numbers<[2], [2], [1], [1], [0, 0, 0, 1, 1, 1], [0], [0]>} : vector<2x8x64xf32>, vector<2x8x64xf32>, vector<2x8x8xf32> -> vector<2x8x8xf32>
    "tpu.trace_stop"() : () -> ()
    %76 = vector.broadcast %49 : vector<2x1x8xf32> to vector<2x8x8xf32>
    %77 = arith.addf %75, %76 : vector<2x8x8xf32>
    %cst_48 = arith.constant dense<0xFF800000> : vector<2x8xf32>
    %78 = vector.multi_reduction <maximumf>, %77, %cst_48 [2] : vector<2x8x8xf32> to vector<2x8xf32>
    %79 = vector.shape_cast %78 : vector<2x8xf32> to vector<2x8x1xf32>
    %80 = vector.broadcast %79 : vector<2x8x1xf32> to vector<2x8x8xf32>
    %81 = arith.subf %77, %80 : vector<2x8x8xf32>
    %82 = math.exp %81 : vector<2x8x8xf32>
    %cst_49 = arith.constant dense<0.000000e+00> : vector<2x8xf32>
    %83 = vector.multi_reduction <add>, %82, %cst_49 [2] : vector<2x8x8xf32> to vector<2x8xf32>
    %84 = vector.shape_cast %83 : vector<2x8xf32> to vector<2x8x1xf32>
    %85 = tpu.reciprocal %84 {approx = true} : vector<2x8x1xf32> -> vector<2x8x1xf32>
    %86 = vector.broadcast %85 : vector<2x8x1xf32> to vector<2x8x8xf32>
    %87 = arith.mulf %82, %86 : vector<2x8x8xf32>
    "tpu.trace_start"() <{level = 10 : i32, message = "bqk,bkd->bqd"}> : () -> ()
    %cst_50 = arith.constant dense<0.000000e+00> : vector<2x8x64xf32>
    %88 = tpu.matmul %87, %74, %cst_50 {dimension_numbers = #tpu.dot_dimension_numbers<[2], [1], [1], [2], [0, 0, 0, 1, 1, 2], [0], [0]>} : vector<2x8x8xf32>, vector<2x8x64xf32>, vector<2x8x64xf32> -> vector<2x8x64xf32>
    "tpu.trace_stop"() : () -> ()
    %89 = vector.shape_cast %88 : vector<2x8x64xf32> to vector<16x64xf32>
    %90 = arith.truncf %89 : vector<16x64xf32> to vector<16x64xbf16>
    %c0_51 = arith.constant 0 : index
    %c0_52 = arith.constant 0 : index
    %c0_53 = arith.constant 0 : index
    %91 = vector.load %arg15[%c0_51, %c0_52, %c0_53] : memref<4x64x128xbf16, #tpu.memory_space<vmem>>, vector<1x64x128xbf16>
    %92 = vector.shape_cast %91 : vector<1x64x128xbf16> to vector<64x128xbf16>
    %cst_54 = arith.constant dense<0.000000e+00> : vector<16x128xf32>
    %93 = tpu.matmul %90, %92, %cst_54 {dimension_numbers = #tpu.dot_dimension_numbers<[1], [0], [0], [1], [0, 0, 1, 1], [], []>} : vector<16x64xbf16>, vector<64x128xbf16>, vector<16x128xf32> -> vector<16x128xf32>
    %c1 = arith.constant 1 : index
    %c0_55 = arith.constant 0 : index
    %c0_56 = arith.constant 0 : index
    %94 = vector.load %arg9[%c1, %c0_55, %c0_56] : memref<4x128x64xbf16, #tpu.memory_space<vmem>>, vector<1x128x64xbf16>
    %95 = vector.shape_cast %94 : vector<1x128x64xbf16> to vector<128x64xbf16>
    %cst_57 = arith.constant dense<0.000000e+00> : vector<16x64xf32>
    %96 = tpu.matmul %50, %95, %cst_57 {dimension_numbers = #tpu.dot_dimension_numbers<[1], [0], [0], [1], [0, 0, 1, 1], [], []>} : vector<16x128xbf16>, vector<128x64xbf16>, vector<16x64xf32> -> vector<16x64xf32>
    %c1_58 = arith.constant 1 : index
    %c0_59 = arith.constant 0 : index
    %c0_60 = arith.constant 0 : index
    %97 = vector.load %arg10[%c1_58, %c0_59, %c0_60] : memref<4x1x64xf32, #tpu.memory_space<vmem>>, vector<1x1x64xf32>
    %98 = vector.shape_cast %97 : vector<1x1x64xf32> to vector<1x64xf32>
    %99 = vector.broadcast %98 : vector<1x64xf32> to vector<16x64xf32>
    %100 = arith.addf %96, %99 : vector<16x64xf32>
    %101 = vector.shape_cast %100 : vector<16x64xf32> to vector<2x8x64xf32>
    %c1_61 = arith.constant 1 : index
    %c0_62 = arith.constant 0 : index
    %c0_63 = arith.constant 0 : index
    %102 = vector.load %arg11[%c1_61, %c0_62, %c0_63] : memref<4x128x64xbf16, #tpu.memory_space<vmem>>, vector<1x128x64xbf16>
    %103 = vector.shape_cast %102 : vector<1x128x64xbf16> to vector<128x64xbf16>
    %cst_64 = arith.constant dense<0.000000e+00> : vector<16x64xf32>
    %104 = tpu.matmul %50, %103, %cst_64 {dimension_numbers = #tpu.dot_dimension_numbers<[1], [0], [0], [1], [0, 0, 1, 1], [], []>} : vector<16x128xbf16>, vector<128x64xbf16>, vector<16x64xf32> -> vector<16x64xf32>
    %c1_65 = arith.constant 1 : index
    %c0_66 = arith.constant 0 : index
    %c0_67 = arith.constant 0 : index
    %105 = vector.load %arg12[%c1_65, %c0_66, %c0_67] : memref<4x1x64xf32, #tpu.memory_space<vmem>>, vector<1x1x64xf32>
    %106 = vector.shape_cast %105 : vector<1x1x64xf32> to vector<1x64xf32>
    %107 = vector.broadcast %106 : vector<1x64xf32> to vector<16x64xf32>
    %108 = arith.addf %104, %107 : vector<16x64xf32>
    %109 = vector.shape_cast %108 : vector<16x64xf32> to vector<2x8x64xf32>
    %c1_68 = arith.constant 1 : index
    %c0_69 = arith.constant 0 : index
    %c0_70 = arith.constant 0 : index
    %110 = vector.load %arg13[%c1_68, %c0_69, %c0_70] : memref<4x128x64xbf16, #tpu.memory_space<vmem>>, vector<1x128x64xbf16>
    %111 = vector.shape_cast %110 : vector<1x128x64xbf16> to vector<128x64xbf16>
    %cst_71 = arith.constant dense<0.000000e+00> : vector<16x64xf32>
    %112 = tpu.matmul %50, %111, %cst_71 {dimension_numbers = #tpu.dot_dimension_numbers<[1], [0], [0], [1], [0, 0, 1, 1], [], []>} : vector<16x128xbf16>, vector<128x64xbf16>, vector<16x64xf32> -> vector<16x64xf32>
    %c1_72 = arith.constant 1 : index
    %c0_73 = arith.constant 0 : index
    %c0_74 = arith.constant 0 : index
    %113 = vector.load %arg14[%c1_72, %c0_73, %c0_74] : memref<4x1x64xf32, #tpu.memory_space<vmem>>, vector<1x1x64xf32>
    %114 = vector.shape_cast %113 : vector<1x1x64xf32> to vector<1x64xf32>
    %115 = vector.broadcast %114 : vector<1x64xf32> to vector<16x64xf32>
    %116 = arith.addf %112, %115 : vector<16x64xf32>
    %117 = vector.shape_cast %116 : vector<16x64xf32> to vector<2x8x64xf32>
    "tpu.trace_start"() <{level = 10 : i32, message = "bqd,bkd->bqk"}> : () -> ()
    %cst_75 = arith.constant dense<0.000000e+00> : vector<2x8x8xf32>
    %118 = tpu.matmul %101, %109, %cst_75 {dimension_numbers = #tpu.dot_dimension_numbers<[2], [2], [1], [1], [0, 0, 0, 1, 1, 1], [0], [0]>} : vector<2x8x64xf32>, vector<2x8x64xf32>, vector<2x8x8xf32> -> vector<2x8x8xf32>
    "tpu.trace_stop"() : () -> ()
    %119 = vector.broadcast %49 : vector<2x1x8xf32> to vector<2x8x8xf32>
    %120 = arith.addf %118, %119 : vector<2x8x8xf32>
    %cst_76 = arith.constant dense<0xFF800000> : vector<2x8xf32>
    %121 = vector.multi_reduction <maximumf>, %120, %cst_76 [2] : vector<2x8x8xf32> to vector<2x8xf32>
    %122 = vector.shape_cast %121 : vector<2x8xf32> to vector<2x8x1xf32>
    %123 = vector.broadcast %122 : vector<2x8x1xf32> to vector<2x8x8xf32>
    %124 = arith.subf %120, %123 : vector<2x8x8xf32>
    %125 = math.exp %124 : vector<2x8x8xf32>
    %cst_77 = arith.constant dense<0.000000e+00> : vector<2x8xf32>
    %126 = vector.multi_reduction <add>, %125, %cst_77 [2] : vector<2x8x8xf32> to vector<2x8xf32>
    %127 = vector.shape_cast %126 : vector<2x8xf32> to vector<2x8x1xf32>
    %128 = tpu.reciprocal %127 {approx = true} : vector<2x8x1xf32> -> vector<2x8x1xf32>
    %129 = vector.broadcast %128 : vector<2x8x1xf32> to vector<2x8x8xf32>
    %130 = arith.mulf %125, %129 : vector<2x8x8xf32>
    "tpu.trace_start"() <{level = 10 : i32, message = "bqk,bkd->bqd"}> : () -> ()
    %cst_78 = arith.constant dense<0.000000e+00> : vector<2x8x64xf32>
    %131 = tpu.matmul %130, %117, %cst_78 {dimension_numbers = #tpu.dot_dimension_numbers<[2], [1], [1], [2], [0, 0, 0, 1, 1, 2], [0], [0]>} : vector<2x8x8xf32>, vector<2x8x64xf32>, vector<2x8x64xf32> -> vector<2x8x64xf32>
    "tpu.trace_stop"() : () -> ()
    %132 = vector.shape_cast %131 : vector<2x8x64xf32> to vector<16x64xf32>
    %133 = arith.truncf %132 : vector<16x64xf32> to vector<16x64xbf16>
    %c1_79 = arith.constant 1 : index
    %c0_80 = arith.constant 0 : index
    %c0_81 = arith.constant 0 : index
    %134 = vector.load %arg15[%c1_79, %c0_80, %c0_81] : memref<4x64x128xbf16, #tpu.memory_space<vmem>>, vector<1x64x128xbf16>
    %135 = vector.shape_cast %134 : vector<1x64x128xbf16> to vector<64x128xbf16>
    %cst_82 = arith.constant dense<0.000000e+00> : vector<16x128xf32>
    %136 = tpu.matmul %133, %135, %cst_82 {dimension_numbers = #tpu.dot_dimension_numbers<[1], [0], [0], [1], [0, 0, 1, 1], [], []>} : vector<16x64xbf16>, vector<64x128xbf16>, vector<16x128xf32> -> vector<16x128xf32>
    %137 = arith.addf %93, %136 : vector<16x128xf32>
    %c0_83 = arith.constant 0 : index
    %c0_84 = arith.constant 0 : index
    %c0_85 = arith.constant 0 : index
    %138 = vector.load %arg16[%c0_83, %c0_84, %c0_85] : memref<2x1x128xf32, #tpu.memory_space<vmem>>, vector<1x1x128xf32>
    %139 = vector.shape_cast %138 : vector<1x1x128xf32> to vector<1x128xf32>
    %140 = vector.broadcast %139 : vector<1x128xf32> to vector<16x128xf32>
    %141 = arith.addf %137, %140 : vector<16x128xf32>
    %142 = arith.addf %45, %141 : vector<16x128xf32>
    %c0_86 = arith.constant 0 : index
    %c0_87 = arith.constant 0 : index
    %c0_88 = arith.constant 0 : index
    %143 = vector.load %arg17[%c0_86, %c0_87, %c0_88] : memref<2x1x128xf32, #tpu.memory_space<vmem>>, vector<1x1x128xf32>
    %144 = vector.shape_cast %143 : vector<1x1x128xf32> to vector<1x128xf32>
    %c0_89 = arith.constant 0 : index
    %c0_90 = arith.constant 0 : index
    %c0_91 = arith.constant 0 : index
    %145 = vector.load %arg18[%c0_89, %c0_90, %c0_91] : memref<2x1x128xf32, #tpu.memory_space<vmem>>, vector<1x1x128xf32>
    %146 = vector.shape_cast %145 : vector<1x1x128xf32> to vector<1x128xf32>
    %cst_92 = arith.constant dense<0.000000e+00> : vector<16xf32>
    %147 = vector.multi_reduction <add>, %142, %cst_92 [1] : vector<16x128xf32> to vector<16xf32>
    %148 = vector.shape_cast %147 : vector<16xf32> to vector<16x1xf32>
    %cst_93 = arith.constant 1.280000e+02 : f32
    %149 = vector.broadcast %cst_93 : f32 to vector<16x1xf32>
    %150 = arith.divf %148, %149 : vector<16x1xf32>
    %151 = vector.broadcast %150 : vector<16x1xf32> to vector<16x128xf32>
    %152 = arith.subf %142, %151 : vector<16x128xf32>
    %153 = arith.mulf %152, %152 : vector<16x128xf32>
    %cst_94 = arith.constant dense<0.000000e+00> : vector<16xf32>
    %154 = vector.multi_reduction <add>, %153, %cst_94 [1] : vector<16x128xf32> to vector<16xf32>
    %155 = vector.shape_cast %154 : vector<16xf32> to vector<16x1xf32>
    %cst_95 = arith.constant 1.280000e+02 : f32
    %156 = vector.broadcast %cst_95 : f32 to vector<16x1xf32>
    %157 = arith.divf %155, %156 : vector<16x1xf32>
    %158 = vector.broadcast %150 : vector<16x1xf32> to vector<16x128xf32>
    %159 = arith.subf %142, %158 : vector<16x128xf32>
    %cst_96 = arith.constant 9.99999974E-6 : f32
    %160 = vector.broadcast %cst_96 : f32 to vector<16x1xf32>
    %161 = arith.addf %157, %160 : vector<16x1xf32>
    %162 = math.rsqrt %161 : vector<16x1xf32>
    %163 = vector.broadcast %162 : vector<16x1xf32> to vector<16x128xf32>
    %164 = arith.mulf %159, %163 : vector<16x128xf32>
    %165 = vector.broadcast %144 : vector<1x128xf32> to vector<16x128xf32>
    %166 = arith.mulf %164, %165 : vector<16x128xf32>
    %167 = vector.broadcast %146 : vector<1x128xf32> to vector<16x128xf32>
    %168 = arith.addf %166, %167 : vector<16x128xf32>
    %169 = arith.truncf %168 : vector<16x128xf32> to vector<16x128xbf16>
    %c0_97 = arith.constant 0 : index
    %c0_98 = arith.constant 0 : index
    %c0_99 = arith.constant 0 : index
    %170 = vector.load %arg19[%c0_97, %c0_98, %c0_99] : memref<2x128x256xbf16, #tpu.memory_space<vmem>>, vector<1x128x256xbf16>
    %171 = vector.shape_cast %170 : vector<1x128x256xbf16> to vector<128x256xbf16>
    %cst_100 = arith.constant dense<0.000000e+00> : vector<16x256xf32>
    %172 = tpu.matmul %169, %171, %cst_100 {dimension_numbers = #tpu.dot_dimension_numbers<[1], [0], [0], [1], [0, 0, 1, 1], [], []>} : vector<16x128xbf16>, vector<128x256xbf16>, vector<16x256xf32> -> vector<16x256xf32>
    %c0_101 = arith.constant 0 : index
    %c0_102 = arith.constant 0 : index
    %c0_103 = arith.constant 0 : index
    %173 = vector.load %arg20[%c0_101, %c0_102, %c0_103] : memref<2x1x256xf32, #tpu.memory_space<vmem>>, vector<1x1x256xf32>
    %174 = vector.shape_cast %173 : vector<1x1x256xf32> to vector<1x256xf32>
    %175 = vector.broadcast %174 : vector<1x256xf32> to vector<16x256xf32>
    %176 = arith.addf %172, %175 : vector<16x256xf32>
    %cst_104 = arith.constant 5.000000e-01 : f32
    %177 = vector.broadcast %cst_104 : f32 to vector<16x256xf32>
    %178 = arith.mulf %177, %176 : vector<16x256xf32>
    %cst_105 = arith.constant 0.707106769 : f32
    %179 = vector.broadcast %cst_105 : f32 to vector<16x256xf32>
    %180 = arith.mulf %176, %179 : vector<16x256xf32>
    %cst_106 = arith.constant 0.000000e+00 : f32
    %181 = vector.broadcast %cst_106 : f32 to vector<16x256xf32>
    %182 = arith.cmpf oge, %180, %181 : vector<16x256xf32>
    %cst_107 = arith.constant 1.000000e+00 : f32
    %cst_108 = arith.constant -1.000000e+00 : f32
    %183 = vector.broadcast %cst_107 : f32 to vector<16x256xf32>
    %184 = vector.broadcast %cst_108 : f32 to vector<16x256xf32>
    %185 = arith.select %182, %183, %184 : vector<16x256xi1>, vector<16x256xf32>
    %186 = math.absf %180 : vector<16x256xf32>
    %cst_109 = arith.constant 0.327591091 : f32
    %187 = vector.broadcast %cst_109 : f32 to vector<16x256xf32>
    %188 = arith.mulf %187, %186 : vector<16x256xf32>
    %cst_110 = arith.constant 1.000000e+00 : f32
    %189 = vector.broadcast %cst_110 : f32 to vector<16x256xf32>
    %190 = arith.addf %189, %188 : vector<16x256xf32>
    %191 = tpu.reciprocal %190 {approx = true} : vector<16x256xf32> -> vector<16x256xf32>
    %cst_111 = arith.constant 1.06140542 : f32
    %192 = vector.broadcast %cst_111 : f32 to vector<16x256xf32>
    %193 = arith.mulf %192, %191 : vector<16x256xf32>
    %cst_112 = arith.constant -1.45315206 : f32
    %194 = vector.broadcast %cst_112 : f32 to vector<16x256xf32>
    %195 = arith.addf %193, %194 : vector<16x256xf32>
    %196 = arith.mulf %195, %191 : vector<16x256xf32>
    %cst_113 = arith.constant 1.42141378 : f32
    %197 = vector.broadcast %cst_113 : f32 to vector<16x256xf32>
    %198 = arith.addf %196, %197 : vector<16x256xf32>
    %199 = arith.mulf %198, %191 : vector<16x256xf32>
    %cst_114 = arith.constant -0.284496725 : f32
    %200 = vector.broadcast %cst_114 : f32 to vector<16x256xf32>
    %201 = arith.addf %199, %200 : vector<16x256xf32>
    %202 = arith.mulf %201, %191 : vector<16x256xf32>
    %cst_115 = arith.constant 0.254829586 : f32
    %203 = vector.broadcast %cst_115 : f32 to vector<16x256xf32>
    %204 = arith.addf %202, %203 : vector<16x256xf32>
    %205 = arith.mulf %204, %191 : vector<16x256xf32>
    %cst_116 = arith.constant 0.000000e+00 : f32
    %206 = vector.broadcast %cst_116 : f32 to vector<16x256xf32>
    %207 = arith.subf %206, %186 : vector<16x256xf32>
    %208 = arith.mulf %207, %186 : vector<16x256xf32>
    %209 = math.exp %208 : vector<16x256xf32>
    %210 = arith.mulf %205, %209 : vector<16x256xf32>
    %cst_117 = arith.constant 1.000000e+00 : f32
    %211 = vector.broadcast %cst_117 : f32 to vector<16x256xf32>
    %212 = arith.subf %211, %210 : vector<16x256xf32>
    %213 = arith.mulf %185, %212 : vector<16x256xf32>
    %cst_118 = arith.constant 1.000000e+00 : f32
    %214 = vector.broadcast %cst_118 : f32 to vector<16x256xf32>
    %215 = arith.addf %214, %213 : vector<16x256xf32>
    %216 = arith.mulf %178, %215 : vector<16x256xf32>
    %217 = arith.truncf %216 : vector<16x256xf32> to vector<16x256xbf16>
    %c0_119 = arith.constant 0 : index
    %c0_120 = arith.constant 0 : index
    %c0_121 = arith.constant 0 : index
    %218 = vector.load %arg21[%c0_119, %c0_120, %c0_121] : memref<2x256x128xbf16, #tpu.memory_space<vmem>>, vector<1x256x128xbf16>
    %219 = vector.shape_cast %218 : vector<1x256x128xbf16> to vector<256x128xbf16>
    %cst_122 = arith.constant dense<0.000000e+00> : vector<16x128xf32>
    %220 = tpu.matmul %217, %219, %cst_122 {dimension_numbers = #tpu.dot_dimension_numbers<[1], [0], [0], [1], [0, 0, 1, 1], [], []>} : vector<16x256xbf16>, vector<256x128xbf16>, vector<16x128xf32> -> vector<16x128xf32>
    %c0_123 = arith.constant 0 : index
    %c0_124 = arith.constant 0 : index
    %c0_125 = arith.constant 0 : index
    %221 = vector.load %arg22[%c0_123, %c0_124, %c0_125] : memref<2x1x128xf32, #tpu.memory_space<vmem>>, vector<1x1x128xf32>
    %222 = vector.shape_cast %221 : vector<1x1x128xf32> to vector<1x128xf32>
    %223 = vector.broadcast %222 : vector<1x128xf32> to vector<16x128xf32>
    %224 = arith.addf %220, %223 : vector<16x128xf32>
    %225 = arith.addf %168, %224 : vector<16x128xf32>
    %c0_126 = arith.constant 0 : index
    %c0_127 = arith.constant 0 : index
    %c0_128 = arith.constant 0 : index
    %226 = vector.load %arg23[%c0_126, %c0_127, %c0_128] : memref<2x1x128xf32, #tpu.memory_space<vmem>>, vector<1x1x128xf32>
    %227 = vector.shape_cast %226 : vector<1x1x128xf32> to vector<1x128xf32>
    %c0_129 = arith.constant 0 : index
    %c0_130 = arith.constant 0 : index
    %c0_131 = arith.constant 0 : index
    %228 = vector.load %arg24[%c0_129, %c0_130, %c0_131] : memref<2x1x128xf32, #tpu.memory_space<vmem>>, vector<1x1x128xf32>
    %229 = vector.shape_cast %228 : vector<1x1x128xf32> to vector<1x128xf32>
    %cst_132 = arith.constant dense<0.000000e+00> : vector<16xf32>
    %230 = vector.multi_reduction <add>, %225, %cst_132 [1] : vector<16x128xf32> to vector<16xf32>
    %231 = vector.shape_cast %230 : vector<16xf32> to vector<16x1xf32>
    %cst_133 = arith.constant 1.280000e+02 : f32
    %232 = vector.broadcast %cst_133 : f32 to vector<16x1xf32>
    %233 = arith.divf %231, %232 : vector<16x1xf32>
    %234 = vector.broadcast %233 : vector<16x1xf32> to vector<16x128xf32>
    %235 = arith.subf %225, %234 : vector<16x128xf32>
    %236 = arith.mulf %235, %235 : vector<16x128xf32>
    %cst_134 = arith.constant dense<0.000000e+00> : vector<16xf32>
    %237 = vector.multi_reduction <add>, %236, %cst_134 [1] : vector<16x128xf32> to vector<16xf32>
    %238 = vector.shape_cast %237 : vector<16xf32> to vector<16x1xf32>
    %cst_135 = arith.constant 1.280000e+02 : f32
    %239 = vector.broadcast %cst_135 : f32 to vector<16x1xf32>
    %240 = arith.divf %238, %239 : vector<16x1xf32>
    %241 = vector.broadcast %233 : vector<16x1xf32> to vector<16x128xf32>
    %242 = arith.subf %225, %241 : vector<16x128xf32>
    %cst_136 = arith.constant 9.99999974E-6 : f32
    %243 = vector.broadcast %cst_136 : f32 to vector<16x1xf32>
    %244 = arith.addf %240, %243 : vector<16x1xf32>
    %245 = math.rsqrt %244 : vector<16x1xf32>
    %246 = vector.broadcast %245 : vector<16x1xf32> to vector<16x128xf32>
    %247 = arith.mulf %242, %246 : vector<16x128xf32>
    %248 = vector.broadcast %227 : vector<1x128xf32> to vector<16x128xf32>
    %249 = arith.mulf %247, %248 : vector<16x128xf32>
    %250 = vector.broadcast %229 : vector<1x128xf32> to vector<16x128xf32>
    %251 = arith.addf %249, %250 : vector<16x128xf32>
    %252 = arith.truncf %251 : vector<16x128xf32> to vector<16x128xbf16>
    %c2 = arith.constant 2 : index
    %c0_137 = arith.constant 0 : index
    %c0_138 = arith.constant 0 : index
    %253 = vector.load %arg9[%c2, %c0_137, %c0_138] : memref<4x128x64xbf16, #tpu.memory_space<vmem>>, vector<1x128x64xbf16>
    %254 = vector.shape_cast %253 : vector<1x128x64xbf16> to vector<128x64xbf16>
    %cst_139 = arith.constant dense<0.000000e+00> : vector<16x64xf32>
    %255 = tpu.matmul %252, %254, %cst_139 {dimension_numbers = #tpu.dot_dimension_numbers<[1], [0], [0], [1], [0, 0, 1, 1], [], []>} : vector<16x128xbf16>, vector<128x64xbf16>, vector<16x64xf32> -> vector<16x64xf32>
    %c2_140 = arith.constant 2 : index
    %c0_141 = arith.constant 0 : index
    %c0_142 = arith.constant 0 : index
    %256 = vector.load %arg10[%c2_140, %c0_141, %c0_142] : memref<4x1x64xf32, #tpu.memory_space<vmem>>, vector<1x1x64xf32>
    %257 = vector.shape_cast %256 : vector<1x1x64xf32> to vector<1x64xf32>
    %258 = vector.broadcast %257 : vector<1x64xf32> to vector<16x64xf32>
    %259 = arith.addf %255, %258 : vector<16x64xf32>
    %260 = vector.shape_cast %259 : vector<16x64xf32> to vector<2x8x64xf32>
    %c2_143 = arith.constant 2 : index
    %c0_144 = arith.constant 0 : index
    %c0_145 = arith.constant 0 : index
    %261 = vector.load %arg11[%c2_143, %c0_144, %c0_145] : memref<4x128x64xbf16, #tpu.memory_space<vmem>>, vector<1x128x64xbf16>
    %262 = vector.shape_cast %261 : vector<1x128x64xbf16> to vector<128x64xbf16>
    %cst_146 = arith.constant dense<0.000000e+00> : vector<16x64xf32>
    %263 = tpu.matmul %252, %262, %cst_146 {dimension_numbers = #tpu.dot_dimension_numbers<[1], [0], [0], [1], [0, 0, 1, 1], [], []>} : vector<16x128xbf16>, vector<128x64xbf16>, vector<16x64xf32> -> vector<16x64xf32>
    %c2_147 = arith.constant 2 : index
    %c0_148 = arith.constant 0 : index
    %c0_149 = arith.constant 0 : index
    %264 = vector.load %arg12[%c2_147, %c0_148, %c0_149] : memref<4x1x64xf32, #tpu.memory_space<vmem>>, vector<1x1x64xf32>
    %265 = vector.shape_cast %264 : vector<1x1x64xf32> to vector<1x64xf32>
    %266 = vector.broadcast %265 : vector<1x64xf32> to vector<16x64xf32>
    %267 = arith.addf %263, %266 : vector<16x64xf32>
    %268 = vector.shape_cast %267 : vector<16x64xf32> to vector<2x8x64xf32>
    %c2_150 = arith.constant 2 : index
    %c0_151 = arith.constant 0 : index
    %c0_152 = arith.constant 0 : index
    %269 = vector.load %arg13[%c2_150, %c0_151, %c0_152] : memref<4x128x64xbf16, #tpu.memory_space<vmem>>, vector<1x128x64xbf16>
    %270 = vector.shape_cast %269 : vector<1x128x64xbf16> to vector<128x64xbf16>
    %cst_153 = arith.constant dense<0.000000e+00> : vector<16x64xf32>
    %271 = tpu.matmul %252, %270, %cst_153 {dimension_numbers = #tpu.dot_dimension_numbers<[1], [0], [0], [1], [0, 0, 1, 1], [], []>} : vector<16x128xbf16>, vector<128x64xbf16>, vector<16x64xf32> -> vector<16x64xf32>
    %c2_154 = arith.constant 2 : index
    %c0_155 = arith.constant 0 : index
    %c0_156 = arith.constant 0 : index
    %272 = vector.load %arg14[%c2_154, %c0_155, %c0_156] : memref<4x1x64xf32, #tpu.memory_space<vmem>>, vector<1x1x64xf32>
    %273 = vector.shape_cast %272 : vector<1x1x64xf32> to vector<1x64xf32>
    %274 = vector.broadcast %273 : vector<1x64xf32> to vector<16x64xf32>
    %275 = arith.addf %271, %274 : vector<16x64xf32>
    %276 = vector.shape_cast %275 : vector<16x64xf32> to vector<2x8x64xf32>
    "tpu.trace_start"() <{level = 10 : i32, message = "bqd,bkd->bqk"}> : () -> ()
    %cst_157 = arith.constant dense<0.000000e+00> : vector<2x8x8xf32>
    %277 = tpu.matmul %260, %268, %cst_157 {dimension_numbers = #tpu.dot_dimension_numbers<[2], [2], [1], [1], [0, 0, 0, 1, 1, 1], [0], [0]>} : vector<2x8x64xf32>, vector<2x8x64xf32>, vector<2x8x8xf32> -> vector<2x8x8xf32>
    "tpu.trace_stop"() : () -> ()
    %278 = vector.broadcast %49 : vector<2x1x8xf32> to vector<2x8x8xf32>
    %279 = arith.addf %277, %278 : vector<2x8x8xf32>
    %cst_158 = arith.constant dense<0xFF800000> : vector<2x8xf32>
    %280 = vector.multi_reduction <maximumf>, %279, %cst_158 [2] : vector<2x8x8xf32> to vector<2x8xf32>
    %281 = vector.shape_cast %280 : vector<2x8xf32> to vector<2x8x1xf32>
    %282 = vector.broadcast %281 : vector<2x8x1xf32> to vector<2x8x8xf32>
    %283 = arith.subf %279, %282 : vector<2x8x8xf32>
    %284 = math.exp %283 : vector<2x8x8xf32>
    %cst_159 = arith.constant dense<0.000000e+00> : vector<2x8xf32>
    %285 = vector.multi_reduction <add>, %284, %cst_159 [2] : vector<2x8x8xf32> to vector<2x8xf32>
    %286 = vector.shape_cast %285 : vector<2x8xf32> to vector<2x8x1xf32>
    %287 = tpu.reciprocal %286 {approx = true} : vector<2x8x1xf32> -> vector<2x8x1xf32>
    %288 = vector.broadcast %287 : vector<2x8x1xf32> to vector<2x8x8xf32>
    %289 = arith.mulf %284, %288 : vector<2x8x8xf32>
    "tpu.trace_start"() <{level = 10 : i32, message = "bqk,bkd->bqd"}> : () -> ()
    %cst_160 = arith.constant dense<0.000000e+00> : vector<2x8x64xf32>
    %290 = tpu.matmul %289, %276, %cst_160 {dimension_numbers = #tpu.dot_dimension_numbers<[2], [1], [1], [2], [0, 0, 0, 1, 1, 2], [0], [0]>} : vector<2x8x8xf32>, vector<2x8x64xf32>, vector<2x8x64xf32> -> vector<2x8x64xf32>
    "tpu.trace_stop"() : () -> ()
    %291 = vector.shape_cast %290 : vector<2x8x64xf32> to vector<16x64xf32>
    %292 = arith.truncf %291 : vector<16x64xf32> to vector<16x64xbf16>
    %c2_161 = arith.constant 2 : index
    %c0_162 = arith.constant 0 : index
    %c0_163 = arith.constant 0 : index
    %293 = vector.load %arg15[%c2_161, %c0_162, %c0_163] : memref<4x64x128xbf16, #tpu.memory_space<vmem>>, vector<1x64x128xbf16>
    %294 = vector.shape_cast %293 : vector<1x64x128xbf16> to vector<64x128xbf16>
    %cst_164 = arith.constant dense<0.000000e+00> : vector<16x128xf32>
    %295 = tpu.matmul %292, %294, %cst_164 {dimension_numbers = #tpu.dot_dimension_numbers<[1], [0], [0], [1], [0, 0, 1, 1], [], []>} : vector<16x64xbf16>, vector<64x128xbf16>, vector<16x128xf32> -> vector<16x128xf32>
    %c3 = arith.constant 3 : index
    %c0_165 = arith.constant 0 : index
    %c0_166 = arith.constant 0 : index
    %296 = vector.load %arg9[%c3, %c0_165, %c0_166] : memref<4x128x64xbf16, #tpu.memory_space<vmem>>, vector<1x128x64xbf16>
    %297 = vector.shape_cast %296 : vector<1x128x64xbf16> to vector<128x64xbf16>
    %cst_167 = arith.constant dense<0.000000e+00> : vector<16x64xf32>
    %298 = tpu.matmul %252, %297, %cst_167 {dimension_numbers = #tpu.dot_dimension_numbers<[1], [0], [0], [1], [0, 0, 1, 1], [], []>} : vector<16x128xbf16>, vector<128x64xbf16>, vector<16x64xf32> -> vector<16x64xf32>
    %c3_168 = arith.constant 3 : index
    %c0_169 = arith.constant 0 : index
    %c0_170 = arith.constant 0 : index
    %299 = vector.load %arg10[%c3_168, %c0_169, %c0_170] : memref<4x1x64xf32, #tpu.memory_space<vmem>>, vector<1x1x64xf32>
    %300 = vector.shape_cast %299 : vector<1x1x64xf32> to vector<1x64xf32>
    %301 = vector.broadcast %300 : vector<1x64xf32> to vector<16x64xf32>
    %302 = arith.addf %298, %301 : vector<16x64xf32>
    %303 = vector.shape_cast %302 : vector<16x64xf32> to vector<2x8x64xf32>
    %c3_171 = arith.constant 3 : index
    %c0_172 = arith.constant 0 : index
    %c0_173 = arith.constant 0 : index
    %304 = vector.load %arg11[%c3_171, %c0_172, %c0_173] : memref<4x128x64xbf16, #tpu.memory_space<vmem>>, vector<1x128x64xbf16>
    %305 = vector.shape_cast %304 : vector<1x128x64xbf16> to vector<128x64xbf16>
    %cst_174 = arith.constant dense<0.000000e+00> : vector<16x64xf32>
    %306 = tpu.matmul %252, %305, %cst_174 {dimension_numbers = #tpu.dot_dimension_numbers<[1], [0], [0], [1], [0, 0, 1, 1], [], []>} : vector<16x128xbf16>, vector<128x64xbf16>, vector<16x64xf32> -> vector<16x64xf32>
    %c3_175 = arith.constant 3 : index
    %c0_176 = arith.constant 0 : index
    %c0_177 = arith.constant 0 : index
    %307 = vector.load %arg12[%c3_175, %c0_176, %c0_177] : memref<4x1x64xf32, #tpu.memory_space<vmem>>, vector<1x1x64xf32>
    %308 = vector.shape_cast %307 : vector<1x1x64xf32> to vector<1x64xf32>
    %309 = vector.broadcast %308 : vector<1x64xf32> to vector<16x64xf32>
    %310 = arith.addf %306, %309 : vector<16x64xf32>
    %311 = vector.shape_cast %310 : vector<16x64xf32> to vector<2x8x64xf32>
    %c3_178 = arith.constant 3 : index
    %c0_179 = arith.constant 0 : index
    %c0_180 = arith.constant 0 : index
    %312 = vector.load %arg13[%c3_178, %c0_179, %c0_180] : memref<4x128x64xbf16, #tpu.memory_space<vmem>>, vector<1x128x64xbf16>
    %313 = vector.shape_cast %312 : vector<1x128x64xbf16> to vector<128x64xbf16>
    %cst_181 = arith.constant dense<0.000000e+00> : vector<16x64xf32>
    %314 = tpu.matmul %252, %313, %cst_181 {dimension_numbers = #tpu.dot_dimension_numbers<[1], [0], [0], [1], [0, 0, 1, 1], [], []>} : vector<16x128xbf16>, vector<128x64xbf16>, vector<16x64xf32> -> vector<16x64xf32>
    %c3_182 = arith.constant 3 : index
    %c0_183 = arith.constant 0 : index
    %c0_184 = arith.constant 0 : index
    %315 = vector.load %arg14[%c3_182, %c0_183, %c0_184] : memref<4x1x64xf32, #tpu.memory_space<vmem>>, vector<1x1x64xf32>
    %316 = vector.shape_cast %315 : vector<1x1x64xf32> to vector<1x64xf32>
    %317 = vector.broadcast %316 : vector<1x64xf32> to vector<16x64xf32>
    %318 = arith.addf %314, %317 : vector<16x64xf32>
    %319 = vector.shape_cast %318 : vector<16x64xf32> to vector<2x8x64xf32>
    "tpu.trace_start"() <{level = 10 : i32, message = "bqd,bkd->bqk"}> : () -> ()
    %cst_185 = arith.constant dense<0.000000e+00> : vector<2x8x8xf32>
    %320 = tpu.matmul %303, %311, %cst_185 {dimension_numbers = #tpu.dot_dimension_numbers<[2], [2], [1], [1], [0, 0, 0, 1, 1, 1], [0], [0]>} : vector<2x8x64xf32>, vector<2x8x64xf32>, vector<2x8x8xf32> -> vector<2x8x8xf32>
    "tpu.trace_stop"() : () -> ()
    %321 = vector.broadcast %49 : vector<2x1x8xf32> to vector<2x8x8xf32>
    %322 = arith.addf %320, %321 : vector<2x8x8xf32>
    %cst_186 = arith.constant dense<0xFF800000> : vector<2x8xf32>
    %323 = vector.multi_reduction <maximumf>, %322, %cst_186 [2] : vector<2x8x8xf32> to vector<2x8xf32>
    %324 = vector.shape_cast %323 : vector<2x8xf32> to vector<2x8x1xf32>
    %325 = vector.broadcast %324 : vector<2x8x1xf32> to vector<2x8x8xf32>
    %326 = arith.subf %322, %325 : vector<2x8x8xf32>
    %327 = math.exp %326 : vector<2x8x8xf32>
    %cst_187 = arith.constant dense<0.000000e+00> : vector<2x8xf32>
    %328 = vector.multi_reduction <add>, %327, %cst_187 [2] : vector<2x8x8xf32> to vector<2x8xf32>
    %329 = vector.shape_cast %328 : vector<2x8xf32> to vector<2x8x1xf32>
    %330 = tpu.reciprocal %329 {approx = true} : vector<2x8x1xf32> -> vector<2x8x1xf32>
    %331 = vector.broadcast %330 : vector<2x8x1xf32> to vector<2x8x8xf32>
    %332 = arith.mulf %327, %331 : vector<2x8x8xf32>
    "tpu.trace_start"() <{level = 10 : i32, message = "bqk,bkd->bqd"}> : () -> ()
    %cst_188 = arith.constant dense<0.000000e+00> : vector<2x8x64xf32>
    %333 = tpu.matmul %332, %319, %cst_188 {dimension_numbers = #tpu.dot_dimension_numbers<[2], [1], [1], [2], [0, 0, 0, 1, 1, 2], [0], [0]>} : vector<2x8x8xf32>, vector<2x8x64xf32>, vector<2x8x64xf32> -> vector<2x8x64xf32>
    "tpu.trace_stop"() : () -> ()
    %334 = vector.shape_cast %333 : vector<2x8x64xf32> to vector<16x64xf32>
    %335 = arith.truncf %334 : vector<16x64xf32> to vector<16x64xbf16>
    %c3_189 = arith.constant 3 : index
    %c0_190 = arith.constant 0 : index
    %c0_191 = arith.constant 0 : index
    %336 = vector.load %arg15[%c3_189, %c0_190, %c0_191] : memref<4x64x128xbf16, #tpu.memory_space<vmem>>, vector<1x64x128xbf16>
    %337 = vector.shape_cast %336 : vector<1x64x128xbf16> to vector<64x128xbf16>
    %cst_192 = arith.constant dense<0.000000e+00> : vector<16x128xf32>
    %338 = tpu.matmul %335, %337, %cst_192 {dimension_numbers = #tpu.dot_dimension_numbers<[1], [0], [0], [1], [0, 0, 1, 1], [], []>} : vector<16x64xbf16>, vector<64x128xbf16>, vector<16x128xf32> -> vector<16x128xf32>
    %339 = arith.addf %295, %338 : vector<16x128xf32>
    %c1_193 = arith.constant 1 : index
    %c0_194 = arith.constant 0 : index
    %c0_195 = arith.constant 0 : index
    %340 = vector.load %arg16[%c1_193, %c0_194, %c0_195] : memref<2x1x128xf32, #tpu.memory_space<vmem>>, vector<1x1x128xf32>
    %341 = vector.shape_cast %340 : vector<1x1x128xf32> to vector<1x128xf32>
    %342 = vector.broadcast %341 : vector<1x128xf32> to vector<16x128xf32>
    %343 = arith.addf %339, %342 : vector<16x128xf32>
    %344 = arith.addf %251, %343 : vector<16x128xf32>
    %c1_196 = arith.constant 1 : index
    %c0_197 = arith.constant 0 : index
    %c0_198 = arith.constant 0 : index
    %345 = vector.load %arg17[%c1_196, %c0_197, %c0_198] : memref<2x1x128xf32, #tpu.memory_space<vmem>>, vector<1x1x128xf32>
    %346 = vector.shape_cast %345 : vector<1x1x128xf32> to vector<1x128xf32>
    %c1_199 = arith.constant 1 : index
    %c0_200 = arith.constant 0 : index
    %c0_201 = arith.constant 0 : index
    %347 = vector.load %arg18[%c1_199, %c0_200, %c0_201] : memref<2x1x128xf32, #tpu.memory_space<vmem>>, vector<1x1x128xf32>
    %348 = vector.shape_cast %347 : vector<1x1x128xf32> to vector<1x128xf32>
    %cst_202 = arith.constant dense<0.000000e+00> : vector<16xf32>
    %349 = vector.multi_reduction <add>, %344, %cst_202 [1] : vector<16x128xf32> to vector<16xf32>
    %350 = vector.shape_cast %349 : vector<16xf32> to vector<16x1xf32>
    %cst_203 = arith.constant 1.280000e+02 : f32
    %351 = vector.broadcast %cst_203 : f32 to vector<16x1xf32>
    %352 = arith.divf %350, %351 : vector<16x1xf32>
    %353 = vector.broadcast %352 : vector<16x1xf32> to vector<16x128xf32>
    %354 = arith.subf %344, %353 : vector<16x128xf32>
    %355 = arith.mulf %354, %354 : vector<16x128xf32>
    %cst_204 = arith.constant dense<0.000000e+00> : vector<16xf32>
    %356 = vector.multi_reduction <add>, %355, %cst_204 [1] : vector<16x128xf32> to vector<16xf32>
    %357 = vector.shape_cast %356 : vector<16xf32> to vector<16x1xf32>
    %cst_205 = arith.constant 1.280000e+02 : f32
    %358 = vector.broadcast %cst_205 : f32 to vector<16x1xf32>
    %359 = arith.divf %357, %358 : vector<16x1xf32>
    %360 = vector.broadcast %352 : vector<16x1xf32> to vector<16x128xf32>
    %361 = arith.subf %344, %360 : vector<16x128xf32>
    %cst_206 = arith.constant 9.99999974E-6 : f32
    %362 = vector.broadcast %cst_206 : f32 to vector<16x1xf32>
    %363 = arith.addf %359, %362 : vector<16x1xf32>
    %364 = math.rsqrt %363 : vector<16x1xf32>
    %365 = vector.broadcast %364 : vector<16x1xf32> to vector<16x128xf32>
    %366 = arith.mulf %361, %365 : vector<16x128xf32>
    %367 = vector.broadcast %346 : vector<1x128xf32> to vector<16x128xf32>
    %368 = arith.mulf %366, %367 : vector<16x128xf32>
    %369 = vector.broadcast %348 : vector<1x128xf32> to vector<16x128xf32>
    %370 = arith.addf %368, %369 : vector<16x128xf32>
    %371 = arith.truncf %370 : vector<16x128xf32> to vector<16x128xbf16>
    %c1_207 = arith.constant 1 : index
    %c0_208 = arith.constant 0 : index
    %c0_209 = arith.constant 0 : index
    %372 = vector.load %arg19[%c1_207, %c0_208, %c0_209] : memref<2x128x256xbf16, #tpu.memory_space<vmem>>, vector<1x128x256xbf16>
    %373 = vector.shape_cast %372 : vector<1x128x256xbf16> to vector<128x256xbf16>
    %cst_210 = arith.constant dense<0.000000e+00> : vector<16x256xf32>
    %374 = tpu.matmul %371, %373, %cst_210 {dimension_numbers = #tpu.dot_dimension_numbers<[1], [0], [0], [1], [0, 0, 1, 1], [], []>} : vector<16x128xbf16>, vector<128x256xbf16>, vector<16x256xf32> -> vector<16x256xf32>
    %c1_211 = arith.constant 1 : index
    %c0_212 = arith.constant 0 : index
    %c0_213 = arith.constant 0 : index
    %375 = vector.load %arg20[%c1_211, %c0_212, %c0_213] : memref<2x1x256xf32, #tpu.memory_space<vmem>>, vector<1x1x256xf32>
    %376 = vector.shape_cast %375 : vector<1x1x256xf32> to vector<1x256xf32>
    %377 = vector.broadcast %376 : vector<1x256xf32> to vector<16x256xf32>
    %378 = arith.addf %374, %377 : vector<16x256xf32>
    %cst_214 = arith.constant 5.000000e-01 : f32
    %379 = vector.broadcast %cst_214 : f32 to vector<16x256xf32>
    %380 = arith.mulf %379, %378 : vector<16x256xf32>
    %cst_215 = arith.constant 0.707106769 : f32
    %381 = vector.broadcast %cst_215 : f32 to vector<16x256xf32>
    %382 = arith.mulf %378, %381 : vector<16x256xf32>
    %cst_216 = arith.constant 0.000000e+00 : f32
    %383 = vector.broadcast %cst_216 : f32 to vector<16x256xf32>
    %384 = arith.cmpf oge, %382, %383 : vector<16x256xf32>
    %cst_217 = arith.constant 1.000000e+00 : f32
    %cst_218 = arith.constant -1.000000e+00 : f32
    %385 = vector.broadcast %cst_217 : f32 to vector<16x256xf32>
    %386 = vector.broadcast %cst_218 : f32 to vector<16x256xf32>
    %387 = arith.select %384, %385, %386 : vector<16x256xi1>, vector<16x256xf32>
    %388 = math.absf %382 : vector<16x256xf32>
    %cst_219 = arith.constant 0.327591091 : f32
    %389 = vector.broadcast %cst_219 : f32 to vector<16x256xf32>
    %390 = arith.mulf %389, %388 : vector<16x256xf32>
    %cst_220 = arith.constant 1.000000e+00 : f32
    %391 = vector.broadcast %cst_220 : f32 to vector<16x256xf32>
    %392 = arith.addf %391, %390 : vector<16x256xf32>
    %393 = tpu.reciprocal %392 {approx = true} : vector<16x256xf32> -> vector<16x256xf32>
    %cst_221 = arith.constant 1.06140542 : f32
    %394 = vector.broadcast %cst_221 : f32 to vector<16x256xf32>
    %395 = arith.mulf %394, %393 : vector<16x256xf32>
    %cst_222 = arith.constant -1.45315206 : f32
    %396 = vector.broadcast %cst_222 : f32 to vector<16x256xf32>
    %397 = arith.addf %395, %396 : vector<16x256xf32>
    %398 = arith.mulf %397, %393 : vector<16x256xf32>
    %cst_223 = arith.constant 1.42141378 : f32
    %399 = vector.broadcast %cst_223 : f32 to vector<16x256xf32>
    %400 = arith.addf %398, %399 : vector<16x256xf32>
    %401 = arith.mulf %400, %393 : vector<16x256xf32>
    %cst_224 = arith.constant -0.284496725 : f32
    %402 = vector.broadcast %cst_224 : f32 to vector<16x256xf32>
    %403 = arith.addf %401, %402 : vector<16x256xf32>
    %404 = arith.mulf %403, %393 : vector<16x256xf32>
    %cst_225 = arith.constant 0.254829586 : f32
    %405 = vector.broadcast %cst_225 : f32 to vector<16x256xf32>
    %406 = arith.addf %404, %405 : vector<16x256xf32>
    %407 = arith.mulf %406, %393 : vector<16x256xf32>
    %cst_226 = arith.constant 0.000000e+00 : f32
    %408 = vector.broadcast %cst_226 : f32 to vector<16x256xf32>
    %409 = arith.subf %408, %388 : vector<16x256xf32>
    %410 = arith.mulf %409, %388 : vector<16x256xf32>
    %411 = math.exp %410 : vector<16x256xf32>
    %412 = arith.mulf %407, %411 : vector<16x256xf32>
    %cst_227 = arith.constant 1.000000e+00 : f32
    %413 = vector.broadcast %cst_227 : f32 to vector<16x256xf32>
    %414 = arith.subf %413, %412 : vector<16x256xf32>
    %415 = arith.mulf %387, %414 : vector<16x256xf32>
    %cst_228 = arith.constant 1.000000e+00 : f32
    %416 = vector.broadcast %cst_228 : f32 to vector<16x256xf32>
    %417 = arith.addf %416, %415 : vector<16x256xf32>
    %418 = arith.mulf %380, %417 : vector<16x256xf32>
    %419 = arith.truncf %418 : vector<16x256xf32> to vector<16x256xbf16>
    %c1_229 = arith.constant 1 : index
    %c0_230 = arith.constant 0 : index
    %c0_231 = arith.constant 0 : index
    %420 = vector.load %arg21[%c1_229, %c0_230, %c0_231] : memref<2x256x128xbf16, #tpu.memory_space<vmem>>, vector<1x256x128xbf16>
    %421 = vector.shape_cast %420 : vector<1x256x128xbf16> to vector<256x128xbf16>
    %cst_232 = arith.constant dense<0.000000e+00> : vector<16x128xf32>
    %422 = tpu.matmul %419, %421, %cst_232 {dimension_numbers = #tpu.dot_dimension_numbers<[1], [0], [0], [1], [0, 0, 1, 1], [], []>} : vector<16x256xbf16>, vector<256x128xbf16>, vector<16x128xf32> -> vector<16x128xf32>
    %c1_233 = arith.constant 1 : index
    %c0_234 = arith.constant 0 : index
    %c0_235 = arith.constant 0 : index
    %423 = vector.load %arg22[%c1_233, %c0_234, %c0_235] : memref<2x1x128xf32, #tpu.memory_space<vmem>>, vector<1x1x128xf32>
    %424 = vector.shape_cast %423 : vector<1x1x128xf32> to vector<1x128xf32>
    %425 = vector.broadcast %424 : vector<1x128xf32> to vector<16x128xf32>
    %426 = arith.addf %422, %425 : vector<16x128xf32>
    %427 = arith.addf %370, %426 : vector<16x128xf32>
    %c1_236 = arith.constant 1 : index
    %c0_237 = arith.constant 0 : index
    %c0_238 = arith.constant 0 : index
    %428 = vector.load %arg23[%c1_236, %c0_237, %c0_238] : memref<2x1x128xf32, #tpu.memory_space<vmem>>, vector<1x1x128xf32>
    %429 = vector.shape_cast %428 : vector<1x1x128xf32> to vector<1x128xf32>
    %c1_239 = arith.constant 1 : index
    %c0_240 = arith.constant 0 : index
    %c0_241 = arith.constant 0 : index
    %430 = vector.load %arg24[%c1_239, %c0_240, %c0_241] : memref<2x1x128xf32, #tpu.memory_space<vmem>>, vector<1x1x128xf32>
    %431 = vector.shape_cast %430 : vector<1x1x128xf32> to vector<1x128xf32>
    %cst_242 = arith.constant dense<0.000000e+00> : vector<16xf32>
    %432 = vector.multi_reduction <add>, %427, %cst_242 [1] : vector<16x128xf32> to vector<16xf32>
    %433 = vector.shape_cast %432 : vector<16xf32> to vector<16x1xf32>
    %cst_243 = arith.constant 1.280000e+02 : f32
    %434 = vector.broadcast %cst_243 : f32 to vector<16x1xf32>
    %435 = arith.divf %433, %434 : vector<16x1xf32>
    %436 = vector.broadcast %435 : vector<16x1xf32> to vector<16x128xf32>
    %437 = arith.subf %427, %436 : vector<16x128xf32>
    %438 = arith.mulf %437, %437 : vector<16x128xf32>
    %cst_244 = arith.constant dense<0.000000e+00> : vector<16xf32>
    %439 = vector.multi_reduction <add>, %438, %cst_244 [1] : vector<16x128xf32> to vector<16xf32>
    %440 = vector.shape_cast %439 : vector<16xf32> to vector<16x1xf32>
    %cst_245 = arith.constant 1.280000e+02 : f32
    %441 = vector.broadcast %cst_245 : f32 to vector<16x1xf32>
    %442 = arith.divf %440, %441 : vector<16x1xf32>
    %443 = vector.broadcast %435 : vector<16x1xf32> to vector<16x128xf32>
    %444 = arith.subf %427, %443 : vector<16x128xf32>
    %cst_246 = arith.constant 9.99999974E-6 : f32
    %445 = vector.broadcast %cst_246 : f32 to vector<16x1xf32>
    %446 = arith.addf %442, %445 : vector<16x1xf32>
    %447 = math.rsqrt %446 : vector<16x1xf32>
    %448 = vector.broadcast %447 : vector<16x1xf32> to vector<16x128xf32>
    %449 = arith.mulf %444, %448 : vector<16x128xf32>
    %450 = vector.broadcast %429 : vector<1x128xf32> to vector<16x128xf32>
    %451 = arith.mulf %449, %450 : vector<16x128xf32>
    %452 = vector.broadcast %431 : vector<1x128xf32> to vector<16x128xf32>
    %453 = arith.addf %451, %452 : vector<16x128xf32>
    %454 = vector.broadcast %0 : vector<16x1xf32> to vector<16x128xf32>
    %455 = arith.mulf %453, %454 : vector<16x128xf32>
    %456 = vector.shape_cast %455 : vector<16x128xf32> to vector<2x8x128xf32>
    %cst_247 = arith.constant dense<0.000000e+00> : vector<2x128xf32>
    %457 = vector.multi_reduction <add>, %456, %cst_247 [1] : vector<2x8x128xf32> to vector<2x128xf32>
    %cst_248 = arith.constant dense<0.000000e+00> : vector<2x1xf32>
    %458 = vector.multi_reduction <add>, %1, %cst_248 [2] : vector<2x1x8xf32> to vector<2x1xf32>
    %cst_249 = arith.constant 9.99999971E-10 : f32
    %459 = vector.broadcast %cst_249 : f32 to vector<2x1xf32>
    %460 = arith.maximumf %458, %459 : vector<2x1xf32>
    %461 = vector.broadcast %460 : vector<2x1xf32> to vector<2x128xf32>
    %462 = arith.divf %457, %461 : vector<2x128xf32>
    %463 = arith.truncf %462 : vector<2x128xf32> to vector<2x128xbf16>
    %c0_250 = arith.constant 0 : index
    %c0_251 = arith.constant 0 : index
    %464 = vector.load %arg25[%c0_250, %c0_251] : memref<128x512xbf16, #tpu.memory_space<vmem>>, vector<128x512xbf16>
    %cst_252 = arith.constant dense<0.000000e+00> : vector<2x512xf32>
    %465 = tpu.matmul %463, %464, %cst_252 {dimension_numbers = #tpu.dot_dimension_numbers<[1], [0], [0], [1], [0, 0, 1, 1], [], []>} : vector<2x128xbf16>, vector<128x512xbf16>, vector<2x512xf32> -> vector<2x512xf32>
    %c0_253 = arith.constant 0 : index
    %c0_254 = arith.constant 0 : index
    %466 = vector.load %arg26[%c0_253, %c0_254] : memref<1x512xf32, #tpu.memory_space<vmem>>, vector<1x512xf32>
    %467 = vector.broadcast %466 : vector<1x512xf32> to vector<2x512xf32>
    %468 = arith.addf %465, %467 : vector<2x512xf32>
    %cst_255 = arith.constant 0.000000e+00 : f32
    %469 = vector.broadcast %cst_255 : f32 to vector<2x512xf32>
    %470 = arith.maximumf %468, %469 : vector<2x512xf32>
    %471 = arith.truncf %470 : vector<2x512xf32> to vector<2x512xbf16>
    %c0_256 = arith.constant 0 : index
    %c0_257 = arith.constant 0 : index
    %472 = vector.load %arg27[%c0_256, %c0_257] : memref<512x128xbf16, #tpu.memory_space<vmem>>, vector<512x128xbf16>
    %cst_258 = arith.constant dense<0.000000e+00> : vector<2x128xf32>
    %473 = tpu.matmul %471, %472, %cst_258 {dimension_numbers = #tpu.dot_dimension_numbers<[1], [0], [0], [1], [0, 0, 1, 1], [], []>} : vector<2x512xbf16>, vector<512x128xbf16>, vector<2x128xf32> -> vector<2x128xf32>
    %c0_259 = arith.constant 0 : index
    %c0_260 = arith.constant 0 : index
    %474 = vector.load %arg28[%c0_259, %c0_260] : memref<1x128xf32, #tpu.memory_space<vmem>>, vector<1x128xf32>
    %475 = vector.broadcast %474 : vector<1x128xf32> to vector<2x128xf32>
    %476 = arith.addf %473, %475 : vector<2x128xf32>
    %477 = arith.mulf %476, %476 : vector<2x128xf32>
    %cst_261 = arith.constant dense<0.000000e+00> : vector<2xf32>
    %478 = vector.multi_reduction <add>, %477, %cst_261 [1] : vector<2x128xf32> to vector<2xf32>
    %479 = vector.shape_cast %478 : vector<2xf32> to vector<2x1xf32>
    %cst_262 = arith.constant 1.000000e-24 : f32
    %480 = vector.broadcast %cst_262 : f32 to vector<2x1xf32>
    %481 = arith.maximumf %479, %480 : vector<2x1xf32>
    %482 = math.rsqrt %481 : vector<2x1xf32>
    %483 = vector.broadcast %482 : vector<2x1xf32> to vector<2x128xf32>
    %484 = arith.mulf %476, %483 : vector<2x128xf32>
    %c0_263 = arith.constant 0 : index
    %c0_264 = arith.constant 0 : index
    %485 = vector.load %arg29[%c0_263, %c0_264] : memref<2x128xf32, #tpu.memory_space<vmem>>, vector<2x128xf32>
    tpu.vector_store %arg29[%c0_263, %c0_264], %484 {strides = array<i32>} : memref<2x128xf32, #tpu.memory_space<vmem>>, vector<2x128xf32>,
    return
  }
}

</mosaic_0001>

<bundles_post_ra>
// kernel: contrastive_code_forward.1
= control target key start
LH: loop header
LB: loop body
LE: loop exit
PB: predicated region body
PF: predicated region fallthrough
CT: control target
= control target key end

     0   :  { %s5610_s6 = smov 1   ;;  %s5611_s10 = smov 2   ;;  %s6266_s0 = inlined_call_operand.smem [shape: u32[30], index: -1, kind: input, shape index: {}] }
   0x1   :  { %s5668_s5 = sld [smem:[%s6266_s0]]   ;;  %s5612_s14 = smov 3  }
   0x2   :  { %s5673_s9 = sld [smem:[%s6266_s0 + %s5610_s6]]   ;;  %s5613_s18 = smov 4  }
   0x3   :  { %s5678_s13 = sld [smem:[%s6266_s0 + %s5611_s10]]   ;;  %s5614_s22 = smov 5  }
   0x4   :  { %s5683_s17 = sld [smem:[%s6266_s0 + %s5612_s14]]   ;;  %s5615_s26 = smov 6  }
   0x5   :  { %s5688_s21 = sld [smem:[%s6266_s0 + %s5613_s18]]   ;;  %s5616_s30 = smov 7  }
   0x6   :  { %s5693_s25 = sld [smem:[%s6266_s0 + %s5614_s22]]   ;;  %s5617_s4 = smov 8  }
   0x7   :  { %s5698_s29 = sld [smem:[%s6266_s0 + %s5615_s26]]   ;;  %s5618_s10 = smov 9  }
   0x8   :  { %s5703_s3 = sld [smem:[%s6266_s0 + %s5616_s30]]   ;;  %s5619_s15 = smov 10  }
   0x9   :  { %6279 = sst [smem:[#allocation27_spill]] %s5678_s13  ;;  %s5620_s20 = smov 11  }
   0xa   :  { %6280 = sst [smem:[#allocation28_spill]] %s5683_s17  ;;  %s5621_s26 = smov 12  }
   0xb   :  { %s5708_s8 = sld [smem:[%s6266_s0 + %s5617_s4]]   ;;  %s5622_s1 = smov 13  }
   0xc   :  { %s5713_s14 = sld [smem:[%s6266_s0 + %s5618_s10]]   ;;  %s5623_s7 = smov 14  }
   0xd   :  { %s5718_s19 = sld [smem:[%s6266_s0 + %s5619_s15]]   ;;  %s5624_s15 = smov 15  }
   0xe   :  { %s5723_s24 = sld [smem:[%s6266_s0 + %s5620_s20]]   ;;  %s5625_s22 = smov 16  }
   0xf   :  { %s5728_s30 = sld [smem:[%s6266_s0 + %s5621_s26]]   ;;  %s5626_s28 = smov 17  }
  0x10   :  { %s5733_s6 = sld [smem:[%s6266_s0 + %s5622_s1]]  }
  0x11   :  { %s5738_s12 = sld [smem:[%s6266_s0 + %s5623_s7]]   ;;  %s5627_s7 = smov 18  }
  0x12   :  { %s5743_s20 = sld [smem:[%s6266_s0 + %s5624_s15]]   ;;  %s5628_s15 = smov 19  }
  0x13   :  { %6281 = sst [smem:[#allocation29_spill]] %s5718_s19 }
  0x14   :  { %s5748_s27 = sld [smem:[%s6266_s0 + %s5625_s22]]   ;;  %s5629_s22 = smov 20  }
  0x15   :  { %6282 = sst [smem:[#allocation30_spill]] %s5728_s30 }
  0x16   :  { %s5753_s4 = sld [smem:[%s6266_s0 + %s5626_s28]]   ;;  %s5630_s28 = smov 21  }
  0x17   :  { %6283 = sst [smem:[#allocation31_spill]] %s5738_s12 }
  0x18   :  { %s5758_s13 = sld [smem:[%s6266_s0 + %s5627_s7]]   ;;  %s5631_s7 = smov 22  }
  0x19   :  { %s5763_s17 = sld [smem:[%s6266_s0 + %s5628_s15]]   ;;  %s5632_s15 = smov 23  }
  0x1a   :  { %6284 = sst [smem:[#allocation32_spill]] %s5748_s27 }
  0x1b   :  { %s5768_s27 = sld [smem:[%s6266_s0 + %s5629_s22]]   ;;  %s5633_s22 = smov 24  }
  0x1c   :  { %6285 = sst [smem:[#allocation33_spill]] %s5753_s4 }
  0x1d   :  { %s5773_s4 = sld [smem:[%s6266_s0 + %s5630_s28]]   ;;  %s5634_s28 = smov 25  }
  0x1e   :  { %6286 = sst [smem:[#allocation34_spill]] %s5758_s13 }
  0x1f   :  { %s5778_s13 = sld [smem:[%s6266_s0 + %s5631_s7]]   ;;  %s5635_s7 = smov 26  }
  0x20   :  { %s5783_s19 = sld [smem:[%s6266_s0 + %s5632_s15]]   ;;  %s5636_s15 = smov 27  }
  0x21   :  { %6287 = sst [smem:[#allocation35_spill]] %s5768_s27 }
  0x22   :  { %s5788_s27 = sld [smem:[%s6266_s0 + %s5633_s22]]   ;;  %s5637_s22 = smov 28  }
  0x23   :  { %s5793_s30 = sld [smem:[%s6266_s0 + %s5634_s28]]   ;;  %s5638_s28 = smov 29  }
  0x24   :  { %s5813_s12 = sld [smem:[%s6266_s0 + %s5638_s28]]  }
  0x25   :  { %6288 = sst [smem:[#allocation36_spill]] %s5778_s13 }
  0x26   :  { %6289 = sst [smem:[#allocation37_spill]] %s5783_s19 }
  0x27   :  { %s5798_s13 = sld [smem:[%s6266_s0 + %s5635_s7]]  }
  0x28   :  { %6290 = sst [smem:[#allocation38_spill]] %s5788_s27 }
  0x29   :  { %s5803_s19 = sld [smem:[%s6266_s0 + %s5636_s15]]  }
  0x2a   :  { %s5808_s27 = sld [smem:[%s6266_s0 + %s5637_s22]]  }
  0x2b   :  { %64 = vsyncpa [#allocation3], 0 }
  0x2c   :  { %65 = vsyncpa [#allocation6], 0 }
  0x2d   :  { %66 = vsyncpa [#allocation9], 0 }
  0x2e   :  { %67 = vsyncpa [#allocation12], 0 }
  0x2f   :  { %68 = vsyncpa [#allocation15], 0 }
  0x30   :  { %69 = vsyncpa [#allocation18], 0 }
  0x31   :  { %70 = vsyncpa [#allocation4], 0  ;;  %s96_s7 = sshll.u32 %s5693_s25, 4  ;;  %s5639_s10 = smov [#allocation5]   ;;  %s97_s7 = int_to_ptr.hbm [resolvable:$true] %s96_s7 }
  0x32   :  { %s98_s11 = sshll.u32 %s5639_s10, 4  ;;  %s5332_s15 = sshra.s32 %s97_s7, 4  ;;  %s99_s11 = int_to_ptr.vmem [resolvable:$true] %s98_s11  ;;  %s5333_s15 = int_to_ptr.hbm [resolvable:$true] %s5332_s15 }
  0x33   :  { %s5334_s16 = scalar_lea.hbm %s5333_s15, 128  ;;  %s5336_s0 = scalar_lea.hbm %s5693_s25, 128 }
  0x34   :  { %p5335_p0 = scmp.ne.s32.totalorder %s5333_s15, %s5334_s16  ;;  %p5337_p1 = scmp.lt.s32.totalorder %s5333_s15, %s5693_s25 }
  0x35   :  { %p5338_p2 = scmp.lt.s32.totalorder %s5336_s0, %s5334_s16 }
  0x37   :  { %p5339_p3 = por %p5338_p2, %p5337_p1 }
  0x39   :  { %p5340_p4 = pnand %p5339_p3, %p5335_p0 }
  0x3b   :  { %5343 = shalt.err (!%p5340_p4)
}
  0x3c   :  { %s5640_s18 = smov 128   ;;  %s5641_s22 = smov 8  }
  0x3d   :  { %104 = dma.hbm_to_vmem [thread:$0]  %s97_s7, 2048, %s99_s11, [#allocation6], %s5640_s18, %s5640_s18, %s5641_s22  }
  0x3e   :  { %s130_s23 = sshll.u32 %s5723_s24, 4  ;;  %s5642_s26 = smov [#allocation8]   ;;  %s131_s23 = int_to_ptr.hbm [resolvable:$true] %s130_s23 }
  0x3f   :  { %s132_s28 = sshll.u32 %s5642_s26, 4  ;;  %s160_s1 = sshll.u32 %s5743_s20, 4  ;;  %s133_s28 = int_to_ptr.vmem [resolvable:$true] %s132_s28  ;;  %s5823_s1 = int_to_ptr.hbm [resolvable:$true] %s160_s1 }
  0x40   :  { %s5356_s25 = sshra.s32 %s131_s23, 4  ;;  %s5360_s10 = scalar_lea.hbm %s5723_s24, 256  ;;  %s5357_s25 = int_to_ptr.hbm [resolvable:$true] %s5356_s25 }
  0x41   :  { %s5358_s2 = scalar_lea.hbm %s5357_s25, 256  ;;  %p5361_p6 = scmp.lt.s32.totalorder %s5357_s25, %s5723_s24 }
  0x42   :  { %p5359_p5 = scmp.ne.s32.totalorder %s5357_s25, %s5358_s2  ;;  %p5362_p7 = scmp.lt.s32.totalorder %s5360_s10, %s5358_s2 }
  0x44   :  { %p5363_p8 = por %p5362_p7, %p5361_p6 }
  0x46   :  { %p5364_p9 = pnand %p5363_p8, %p5359_p5 }
  0x48   :  { %5367 = shalt.err (!%p5364_p9)
}
  0x49   :  { %s5643_s15 = smov 64   ;;  %s5644_s7 = smov 4  }
  0x4a   :  { %138 = dma.hbm_to_vmem [thread:$0]  %s131_s23, 4096, %s133_s28, [#allocation9], %s5643_s15, %s5643_s15, %s5644_s7  }
  0x4b   :  { %s194_s11 = sshll.u32 %s5773_s4, 4  ;;  %s5645_s16 = smov [#allocation11]   ;;  %s5831_s11 = int_to_ptr.hbm [resolvable:$true] %s194_s11 }
  0x4c   :  { %s162_s0 = sshll.u32 %s5645_s16, 4  ;;  %s5380_s24 = sshra.s32 %s5823_s1, 4  ;;  %s163_s0 = int_to_ptr.vmem [resolvable:$true] %s162_s0  ;;  %s5381_s24 = int_to_ptr.hbm [resolvable:$true] %s5380_s24 }
  0x4d   :  { %s5382_s26 = scalar_lea.hbm %s5381_s24, 128  ;;  %s5384_s25 = scalar_lea.hbm %s5743_s20, 128 }
  0x4e   :  { %p5383_p10 = scmp.ne.s32.totalorder %s5381_s24, %s5382_s26  ;;  %p5385_p11 = scmp.lt.s32.totalorder %s5381_s24, %s5743_s20 }
  0x4f   :  { %p5386_p12 = scmp.lt.s32.totalorder %s5384_s25, %s5382_s26 }
  0x51   :  { %p5387_p13 = por %p5386_p12, %p5385_p11 }
  0x53   :  { %p5388_p0 = pnand %p5387_p13, %p5383_p10 }
  0x55   :  { %5391 = shalt.err (!%p5388_p0)
}
  0x56   :  { %168 = dma.hbm_to_vmem [thread:$0]  %s5823_s1, 2048, %s163_s0, [#allocation12], %s5643_s15, %s5643_s15, %s5644_s7  }
  0x57   :  { %s5646_s23 = smov [#allocation14]   ;;  %s83_s2 = sshll.u32 %s5688_s21, 4  ;;  %s5841_s2 = int_to_ptr.hbm [resolvable:$true] %s83_s2 }
  0x58   :  { %s196_s28 = sshll.u32 %s5646_s23, 4  ;;  %s5404_s20 = sshra.s32 %s5831_s11, 4  ;;  %s197_s28 = int_to_ptr.vmem [resolvable:$true] %s196_s28  ;;  %s5405_s20 = int_to_ptr.hbm [resolvable:$true] %s5404_s20 }
  0x59   :  { %s5406_s10 = scalar_lea.hbm %s5405_s20, 256  ;;  %s5408_s16 = scalar_lea.hbm %s5773_s4, 256 }
  0x5a   :  { %p5407_p1 = scmp.ne.s32.totalorder %s5405_s20, %s5406_s10  ;;  %p5409_p2 = scmp.lt.s32.totalorder %s5405_s20, %s5773_s4 }
  0x5b   :  { %p5410_p3 = scmp.lt.s32.totalorder %s5408_s16, %s5406_s10 }
  0x5d   :  { %p5411_p4 = por %p5410_p3, %p5409_p2 }
  0x5f   :  { %p5412_p5 = pnand %p5411_p4, %p5407_p1 }
  0x61   :  { %5415 = shalt.err (!%p5412_p5)
}
  0x62   :  { %202 = dma.hbm_to_vmem [thread:$0]  %s5831_s11, 4096, %s197_s28, [#allocation15], %s5643_s15, %s5643_s15, %s5644_s7  }
  0x63   :  { %s115_s1 = sshll.u32 %s5713_s14, 4  ;;  %s5647_s0 = smov [#allocation2]   ;;  %s5851_s1 = int_to_ptr.hbm [resolvable:$true] %s115_s1 }
  0x64   :  { %s85_s24 = sshll.u32 %s5647_s0, 4  ;;  %s5428_s4 = sshra.s32 %s5841_s2, 4  ;;  %s86_s24 = int_to_ptr.vmem [resolvable:$true] %s85_s24  ;;  %s5429_s4 = int_to_ptr.hbm [resolvable:$true] %s5428_s4 }
  0x65   :  { %s5430_s26 = scalar_lea.hbm %s5429_s4, 128  ;;  %s5432_s25 = scalar_lea.hbm %s5688_s21, 128 }
  0x66   :  { %p5431_p6 = scmp.ne.s32.totalorder %s5429_s4, %s5430_s26  ;;  %p5433_p7 = scmp.lt.s32.totalorder %s5429_s4, %s5688_s21 }
  0x67   :  { %p5434_p8 = scmp.lt.s32.totalorder %s5432_s25, %s5430_s26 }
  0x69   :  { %p5435_p9 = por %p5434_p8, %p5433_p7 }
  0x6b   :  { %p5436_p10 = pnand %p5435_p9, %p5431_p6 }
  0x6d   :  { %5439 = shalt.err (!%p5436_p10)
}
  0x6e   :  { %91 = dma.hbm_to_vmem [thread:$0]  %s5841_s2, 2048, %s86_s24, [#allocation3], %s5640_s18, %s5640_s18, %s5641_s22  }
  0x6f   :  { %s5648_s11 = smov [#allocation7]   ;;  %s145_s28 = sshll.u32 %s5733_s6, 4  ;;  %s5861_s28 = int_to_ptr.hbm [resolvable:$true] %s145_s28 }
  0x70   :  { %s117_s23 = sshll.u32 %s5648_s11, 4  ;;  %s5452_s21 = sshra.s32 %s5851_s1, 4  ;;  %s118_s23 = int_to_ptr.vmem [resolvable:$true] %s117_s23  ;;  %s5453_s21 = int_to_ptr.hbm [resolvable:$true] %s5452_s21 }
  0x71   :  { %s5454_s20 = scalar_lea.hbm %s5453_s21, 256  ;;  %s5456_s10 = scalar_lea.hbm %s5713_s14, 256 }
  0x72   :  { %p5455_p11 = scmp.ne.s32.totalorder %s5453_s21, %s5454_s20  ;;  %p5457_p12 = scmp.lt.s32.totalorder %s5453_s21, %s5713_s14 }
  0x73   :  { %p5458_p13 = scmp.lt.s32.totalorder %s5456_s10, %s5454_s20 }
  0x75   :  { %p5459_p0 = por %p5458_p13, %p5457_p12 }
  0x77   :  { %p5460_p1 = pnand %p5459_p0, %p5455_p11 }
  0x79   :  { %5463 = shalt.err (!%p5460_p1)
}
  0x7a   :  { %123 = dma.hbm_to_vmem [thread:$0]  %s5851_s1, 4096, %s118_s23, [#allocation6], %s5643_s15, %s5643_s15, %s5644_s7  }
  0x7b   :  { %s179_s2 = sshll.u32 %s5763_s17, 4  ;;  %s5649_s16 = smov [#allocation10]   ;;  %s5871_s2 = int_to_ptr.hbm [resolvable:$true] %s179_s2 }
  0x7c   :  { %s147_s0 = sshll.u32 %s5649_s16, 4  ;;  %s5476_s14 = sshra.s32 %s5861_s28, 4  ;;  %s148_s0 = int_to_ptr.vmem [resolvable:$true] %s147_s0  ;;  %s5477_s14 = int_to_ptr.hbm [resolvable:$true] %s5476_s14 }
  0x7d   :  { %s5478_s24 = scalar_lea.hbm %s5477_s14, 256  ;;  %s5480_s4 = scalar_lea.hbm %s5733_s6, 256 }
  0x7e   :  { %p5479_p2 = scmp.ne.s32.totalorder %s5477_s14, %s5478_s24  ;;  %p5481_p3 = scmp.lt.s32.totalorder %s5477_s14, %s5733_s6 }
  0x7f   :  { %p5482_p4 = scmp.lt.s32.totalorder %s5480_s4, %s5478_s24 }
  0x81   :  { %p5483_p5 = por %p5482_p4, %p5481_p3 }
  0x83   :  { %p5484_p6 = pnand %p5483_p5, %p5479_p2 }
  0x85   :  { %5487 = shalt.err (!%p5484_p6)
}
  0x86   :  { %153 = dma.hbm_to_vmem [thread:$0]  %s5861_s28, 4096, %s148_s0, [#allocation9], %s5643_s15, %s5643_s15, %s5644_s7  }
  0x87   :  { %s5650_s1 = smov [#allocation13]   ;;  %s213_s25 = sshll.u32 %s5793_s30, 4  ;;  %s5881_s25 = int_to_ptr.hbm [resolvable:$true] %s213_s25 }
  0x88   :  { %s181_s26 = sshll.u32 %s5650_s1, 4  ;;  %s5500_s6 = sshra.s32 %s5871_s2, 4  ;;  %s182_s26 = int_to_ptr.vmem [resolvable:$true] %s181_s26  ;;  %s5501_s6 = int_to_ptr.hbm [resolvable:$true] %s5500_s6 }
  0x89   :  { %s5502_s11 = scalar_lea.hbm %s5501_s6, 256  ;;  %s5504_s23 = scalar_lea.hbm %s5763_s17, 256 }
  0x8a   :  { %p5503_p7 = scmp.ne.s32.totalorder %s5501_s6, %s5502_s11  ;;  %p5505_p8 = scmp.lt.s32.totalorder %s5501_s6, %s5763_s17 }
  0x8b   :  { %p5506_p9 = scmp.lt.s32.totalorder %s5504_s23, %s5502_s11 }
  0x8d   :  { %p5507_p10 = por %p5506_p9, %p5505_p8 }
  0x8f   :  { %p5508_p11 = pnand %p5507_p10, %p5503_p7 }
  0x91   :  { %5511 = shalt.err (!%p5508_p11)
}
  0x92   :  { %187 = dma.hbm_to_vmem [thread:$0]  %s5871_s2, 4096, %s182_s26, [#allocation12], %s5640_s18, %s5640_s18, %s5641_s22  }
  0x93   :  { %s5651_s28 = smov [#allocation16]   ;;  %s228_s20 = sshll.u32 %s5803_s19, 4  ;;  %s229_s20 = int_to_ptr.hbm [resolvable:$true] %s228_s20 }
  0x94   :  { %s215_s21 = sshll.u32 %s5651_s28, 4  ;;  %s5524_s10 = sshra.s32 %s5881_s25, 4  ;;  %s216_s21 = int_to_ptr.vmem [resolvable:$true] %s215_s21  ;;  %s5525_s10 = int_to_ptr.hbm [resolvable:$true] %s5524_s10 }
  0x95   :  { %s5526_s17 = scalar_lea.hbm %s5525_s10, 256  ;;  %s5528_s16 = scalar_lea.hbm %s5793_s30, 256 }
  0x96   :  { %p5527_p12 = scmp.ne.s32.totalorder %s5525_s10, %s5526_s17  ;;  %p5529_p13 = scmp.lt.s32.totalorder %s5525_s10, %s5793_s30 }
  0x97   :  { %p5530_p0 = scmp.lt.s32.totalorder %s5528_s16, %s5526_s17 }
  0x99   :  { %p5531_p1 = por %p5530_p0, %p5529_p13 }
  0x9b   :  { %p5532_p2 = pnand %p5531_p1, %p5527_p12 }
  0x9d   :  { %5535 = shalt.err (!%p5532_p2)
}
  0x9e   :  { %s5652_s0 = smov 256   ;;  %s5653_s14 = smov 16  }
  0x9f   :  { %221 = dma.hbm_to_vmem [thread:$0]  %s5881_s25, 4096, %s216_s21, [#allocation15], %s5652_s0, %s5652_s0, %s5653_s14  }
  0xa0   :  { %s5654_s18 = smov [#allocation17]   ;;  %s5548_s2 = sshra.s32 %s229_s20, 4  ;;  %s5549_s2 = int_to_ptr.hbm [resolvable:$true] %s5548_s2 }
  0xa1   :  { %s230_s22 = sshll.u32 %s5654_s18, 4  ;;  %s5550_s24 = scalar_lea.hbm %s5549_s2, 256  ;;  %s231_s22 = int_to_ptr.vmem [resolvable:$true] %s230_s22 }
  0xa2   :  { %p5551_p3 = scmp.ne.s32.totalorder %s5549_s2, %s5550_s24  ;;  %s5552_s4 = scalar_lea.hbm %s5803_s19, 256 }
  0xa3   :  { %p5553_p4 = scmp.lt.s32.totalorder %s5549_s2, %s5803_s19  ;;  %p5554_p5 = scmp.lt.s32.totalorder %s5552_s4, %s5550_s24 }
  0xa5   :  { %p5555_p6 = por %p5554_p5, %p5553_p4 }
  0xa7   :  { %p5556_p7 = pnand %p5555_p6, %p5551_p3 }
  0xa9   :  { %5559 = shalt.err (!%p5556_p7)
}
  0xaa   :  { %236 = dma.hbm_to_vmem [thread:$0]  %s229_s20, 4096, %s231_s22, [#allocation18], %s5643_s15, %s5643_s15, %s5644_s7  }
  0xab   :  { %5596 = dma.done.wait [#allocation3], 2048  }
  0xac   :  { %5597 = vsyncadd [#allocation3], 4294965248 }
  0xad   :  { %5598 = dma.done.wait [#allocation6], 6144  }
  0xae   :  { %5599 = vsyncadd [#allocation6], 4294961152 }
  0xaf   :  { %5600 = dma.done.wait [#allocation9], 8192  }
  0xb0   :  { %5601 = vsyncadd [#allocation9], 4294959104 }
  0xb1   :  { %5602 = dma.done.wait [#allocation12], 6144  }
  0xb2   :  { %5603 = vsyncadd [#allocation12], 4294961152 }
  0xb3   :  { %5604 = dma.done.wait [#allocation15], 8192  }
  0xb4   :  { %5605 = vsyncadd [#allocation15], 4294959104 }
  0xb5   :  { %5606 = dma.done.wait [#allocation18], 4096  }
  0xb6   :  { %5607 = vsyncadd [#allocation18], 4294963200  ;;  %v5655_v0 = vmov 0   ;;  %v285_v1 = vld [vmem:[%s5668_s5 + $0x8] sm:$0xff]  ;;  %v284_v2 = vld [vmem:[%s5668_s5] sm:$0xff]  ;;  %v288_v37 = vlaneseq  ;;  %v5656_v40 = vmov 1.0  }
  0xb7   :  { %5208 = vset.pattern.permute.xlu1 %v5655_v0  ;;  %5207 = vset.pattern.permute.xlu0 %v5655_v0  ;;  %v329_v3 = vld [vmem:[#allocation2 + $0x78] sm:$0xff]  ;;  %v328_v4 = vld [vmem:[#allocation2 + $0x70] sm:$0xff]  ;;  %v327_v6 = vld [vmem:[#allocation2 + $0x68] sm:$0xff]  ;;  %v5657_v53 = vmov 128.0   ;;  %s6291_s5 = sld [smem:[#allocation31_spill]]  ;;  %vm714_vm11 = vcmask 523264  }
  0xb8   :  { %5209 = vset.pattern.permute.xlu2 %v5655_v0  ;;  %294 = vperm.xlu1 %5208, %v285_v1   ;;  %v345_v5 = vld [vmem:[#allocation5 + $0x78] sm:$0xff]  ;;  %v344_v7 = vld [vmem:[#allocation5 + $0x70] sm:$0xff]  ;;  %v343_v8 = vld [vmem:[#allocation5 + $0x68] sm:$0xff]  ;;  %v289_v38 = vand.u32 127, %v288_v37  ;;  %5238 = vrcp.f32 %v5657_v53  ;;  %vm767_vm12 = vcmask 64512   ;;  %s6296_s19 = sld [smem:[#allocation33_spill]] }
  0xb9   :  { %291 = vperm.xlu0 %5207, %v284_v2   ;;  %369 = vmatpush.msra.mxu1 %v329_v3  ;;  %v326_v9 = vld [vmem:[#allocation2 + $0x60] sm:$0xff]  ;;  %v287_v10 = vld [vmem:[%s5673_s9 + $0x8] sm:$0xff]  ;;  %v325_v12 = vld [vmem:[#allocation2 + $0x58] sm:$0xff]  ;;  %s6297_s30 = sld [smem:[#allocation34_spill]]  ;;  %s3861_s6 = sshll.u32 %s5813_s12, 4  ;;  %s3862_s6 = int_to_ptr.hbm [resolvable:$true] %s3861_s6 }
  0xba   :  { %346 = vmatpush.msra.mxu0 %v345_v5  ;;  %v286_v11 = vld [vmem:[%s5673_s9] sm:$0xff]  ;;  %v324_v14 = vld [vmem:[#allocation2 + $0x50] sm:$0xff]  ;;  %v323_v15 = vld [vmem:[#allocation2 + $0x48] sm:$0xff]  ;;  %s6292_s9 = sld [smem:[#allocation30_spill]]  ;;  %s5584_s11 = sshra.s32 %s3862_s6, 4  ;;  %s5585_s11 = int_to_ptr.hbm [resolvable:$true] %s5584_s11 }
  0xbb   :  { %370 = vmatpush.msra.mxu1 %v328_v4  ;;  %v342_v13 = vld [vmem:[#allocation5 + $0x60] sm:$0xff]  ;;  %v341_v16 = vld [vmem:[#allocation5 + $0x58] sm:$0xff]  ;;  %v340_v17 = vld [vmem:[#allocation5 + $0x50] sm:$0xff]  ;;  %s6298_s15 = sld [smem:[#allocation35_spill]]  ;;  %s5586_s23 = scalar_lea.hbm %s5585_s11, 2 }
  0xbc   :  { %347 = vmatpush.msra.mxu0 %v344_v7  ;;  %v322_v18 = vld [vmem:[#allocation2 + $0x40] sm:$0xff]  ;;  %v339_v19 = vld [vmem:[#allocation5 + $0x48] sm:$0xff]  ;;  %v321_v20 = vld [vmem:[#allocation2 + $0x38] sm:$0xff]  ;;  %s6299_s7 = sld [smem:[#allocation36_spill]]  ;;  %p5587_p8 = scmp.ne.s32.totalorder %s5585_s11, %s5586_s23 }
  0xbd   :  { %371 = vmatpush.msra.mxu1 %v327_v6  ;;  %v338_v21 = vld [vmem:[#allocation5 + $0x40] sm:$0xff]  ;;  %v320_v22 = vld [vmem:[#allocation2 + $0x30] sm:$0xff]  ;;  %v337_v23 = vld [vmem:[#allocation5 + $0x38] sm:$0xff]  ;;  %s6300_s1 = sld [smem:[#allocation37_spill]]  ;;  %s5588_s28 = scalar_lea.hbm %s5813_s12, 2 }
  0xbe   :  { %348 = vmatpush.msra.mxu0 %v343_v8  ;;  %v319_v24 = vld [vmem:[#allocation2 + $0x28] sm:$0xff]  ;;  %v336_v25 = vld [vmem:[#allocation5 + $0x30] sm:$0xff]  ;;  %v318_v26 = vld [vmem:[#allocation2 + $0x20] sm:$0xff]  ;;  %v5239_v54 = vpop.eup %5238  ;;  %s6301_s26 = sld [smem:[#allocation38_spill]]  ;;  %p5589_p9 = scmp.lt.s32.totalorder %s5585_s11, %s5813_s12 }
  0xbf   :  { %372 = vmatpush.msra.mxu1 %v326_v9  ;;  %v335_v27 = vld [vmem:[#allocation5 + $0x28] sm:$0xff]  ;;  %v317_v28 = vld [vmem:[#allocation2 + $0x18] sm:$0xff]  ;;  %v316_v29 = vld [vmem:[#allocation2 + $0x10] sm:$0xff]  ;;  %v405_v55 = vmul.f32 128.0, %v5239_v54  ;;  %vm409_vm4 = vweird.f32 %v5239_v54  ;;  %s6302_s25 = sld [smem:[#allocation27_spill]]  ;;  %p5590_p10 = scmp.lt.s32.totalorder %s5588_s28, %s5586_s23 }
  0xc0   :  { %306 = vperm.xlu1 %5208, %v287_v10   ;;  %349 = vmatpush.msra.mxu0 %v342_v13  ;;  %v315_v30 = vld [vmem:[#allocation2 + $0x8] sm:$0xff]  ;;  %v334_v31 = vld [vmem:[#allocation5 + $0x20] sm:$0xff]  ;;  %v333_v33 = vld [vmem:[#allocation5 + $0x18] sm:$0xff] }
  0xc1   :  { %303 = vperm.xlu0 %5207, %v286_v11   ;;  %373 = vmatpush.msra.mxu1 %v325_v12  ;;  %v314_v32 = vld [vmem:[#allocation2] sm:$0xff]  ;;  %v332_v34 = vld [vmem:[#allocation5 + $0x10] sm:$0xff]  ;;  %v331_v35 = vld [vmem:[#allocation5 + $0x8] sm:$0xff]  ;;  %v406_v56 = vsub.f32 1.0, %v405_v55  ;;  %p5591_p11 = por %p5590_p10, %p5589_p9 }
  0xc2   :  { %350 = vmatpush.msra.mxu0 %v341_v16  ;;  %v330_v36 = vld [vmem:[#allocation5] sm:$0xff]  ;;  %v4924_v4 = vld [vmem:[#allocation7 + $0x38] sm:$0xff]  ;;  %v4923_v7 = vld [vmem:[#allocation7 + $0x30] sm:$0xff] }
  0xc3   :  { %374 = vmatpush.msra.mxu1 %v324_v14  ;;  %v5210_v45 = vld [vmem:[%s5698_s29] ss:$0 sm:$0xff]  ;;  %v407_v57 = vmul.f32 %v5239_v54, %v406_v56  ;;  %v4932_v5 = vld [vmem:[#allocation8 + $0x38] sm:$0xff]  ;;  %530 = vmatpush.bf16.msra.mxu2 %v4924_v4  ;;  %v4931_v8 = vld [vmem:[#allocation8 + $0x30] sm:$0xff]  ;;  %s6293_s29 = sld [smem:[#allocation29_spill]]  ;;  %p5592_p12 = pnand %p5591_p11, %p5587_p8 }
  0xc4   :  { %351 = vmatpush.msra.mxu0 %v340_v17  ;;  %v4940_v6 = vld [vmem:[#allocation10 + $0x38] sm:$0xff]  ;;  %612 = vmatpush.bf16.msra.mxu3 %v4932_v5  ;;  %v4939_v9 = vld [vmem:[#allocation10 + $0x30] sm:$0xff]  ;;  %v4922_v10 = vld [vmem:[#allocation7 + $0x28] sm:$0xff] }
  0xc5   :  { %375 = vmatpush.msra.mxu1 %v323_v15  ;;  %v408_v58 = vadd.f32 %v5239_v54, %v407_v57  ;;  %v4930_v11 = vld [vmem:[#allocation8 + $0x28] sm:$0xff]  ;;  %v4921_v13 = vld [vmem:[#allocation7 + $0x20] sm:$0xff]  ;;  %v4920_v16 = vld [vmem:[#allocation7 + $0x18] sm:$0xff] }
  0xc6   :  { %352 = vmatpush.msra.mxu0 %v339_v19  ;;  %v4938_v12 = vld [vmem:[#allocation10 + $0x28] sm:$0xff]  ;;  %v4929_v14 = vld [vmem:[#allocation8 + $0x20] sm:$0xff]  ;;  %v4928_v17 = vld [vmem:[#allocation8 + $0x18] sm:$0xff] }
  0xc7   :  { %376 = vmatpush.msra.mxu1 %v322_v18  ;;  %v5905_v59 = vsel %vm409_vm4, %v5239_v54, %v408_v58  ;;  %531 = vmatpush.bf16.msra.mxu2 %v4923_v7  ;;  %v4937_v15 = vld [vmem:[#allocation10 + $0x20] sm:$0xff]  ;;  %v4936_v18 = vld [vmem:[#allocation10 + $0x18] sm:$0xff]  ;;  %v4919_v19 = vld [vmem:[#allocation7 + $0x10] sm:$0xff] }
  0xc8   :  { %353 = vmatpush.msra.mxu0 %v338_v21  ;;  %613 = vmatpush.bf16.msra.mxu3 %v4931_v8  ;;  %v4935_v21 = vld [vmem:[#allocation10 + $0x10] sm:$0xff]  ;;  %v5213_v57 = vld [vmem:[%s6291_s5] ss:$0 sm:$0xff] }
  0xc9   :  { %377 = vmatpush.msra.mxu1 %v321_v20  ;;  %v4927_v20 = vld [vmem:[#allocation8 + $0x10] sm:$0xff] }
  0xca   :  { %354 = vmatpush.msra.mxu0 %v337_v23  ;;  %v4926_v23 = vld [vmem:[#allocation8 + $0x8] sm:$0xff] }
  0xcb   :  { %378 = vmatpush.msra.mxu1 %v320_v22  ;;  %532 = vmatpush.bf16.msra.mxu2 %v4922_v10  ;;  %v4918_v22 = vld [vmem:[#allocation7 + $0x8] sm:$0xff]  ;;  %v4951_v10 = vld [vmem:[#allocation7 + $0x70] sm:$0xff] }
  0xcc   :  { %355 = vmatpush.msra.mxu0 %v336_v25  ;;  %614 = vmatpush.bf16.msra.mxu3 %v4930_v11  ;;  %v4950_v11 = vld [vmem:[#allocation7 + $0x68] sm:$0xff] }
  0xcd   :  { %379 = vmatpush.msra.mxu1 %v319_v24  ;;  %v4934_v24 = vld [vmem:[#allocation10 + $0x8] sm:$0xff] }
  0xce   :  { %356 = vmatpush.msra.mxu0 %v335_v27  ;;  %v4917_v27 = vld [vmem:[#allocation7] sm:$0xff] }
  0xcf   :  { %380 = vmatpush.msra.mxu1 %v318_v26  ;;  %533 = vmatpush.bf16.msra.mxu2 %v4921_v13  ;;  %v4948_v13 = vld [vmem:[#allocation7 + $0x58] sm:$0xff] }
  0xd0   :  { %357 = vmatpush.msra.mxu0 %v334_v31  ;;  %615 = vmatpush.bf16.msra.mxu3 %v4929_v14  ;;  %v4947_v14 = vld [vmem:[#allocation7 + $0x50] sm:$0xff] }
  0xd1   :  { %381 = vmatpush.msra.mxu1 %v317_v28  ;;  %v4925_v28 = vld [vmem:[#allocation8] sm:$0xff] }
  0xd2   :  { %358 = vmatpush.msra.mxu0 %v333_v33 }
  0xd3   :  { %382 = vmatpush.msra.mxu1 %v316_v29  ;;  %534 = vmatpush.bf16.msra.mxu2 %v4920_v16  ;;  %v4933_v29 = vld [vmem:[#allocation10] sm:$0xff] }
  0xd4   :  { %359 = vmatpush.msra.mxu0 %v332_v34  ;;  %616 = vmatpush.bf16.msra.mxu3 %v4928_v17  ;;  %v4945_v16 = vld [vmem:[#allocation7 + $0x40] sm:$0xff] }
  0xd5   :  { %383 = vmatpush.msra.mxu1 %v315_v30 }
  0xd6   :  { %360 = vmatpush.msra.mxu0 %v331_v35 }
  0xd7   :  { %384 = vmatpush.msra.mxu1 %v314_v32  ;;  %535 = vmatpush.bf16.msra.mxu2 %v4919_v19 }
  0xd8   :  { %361 = vmatpush.msra.mxu0 %v330_v36  ;;  %617 = vmatpush.bf16.msra.mxu3 %v4927_v20 }
  0xda   :  { %694 = vmatpush.bf16.msrb.mxu0 %v4940_v6  ;;  %v4952_v6 = vld [vmem:[#allocation7 + $0x78] sm:$0xff] }
  0xdb   :  { %536 = vmatpush.bf16.msra.mxu2 %v4918_v22 }
  0xdc   :  { %618 = vmatpush.bf16.msra.mxu3 %v4926_v23 }
  0xde   :  { %695 = vmatpush.bf16.msrb.mxu0 %v4939_v9 }
  0xdf   :  { %537 = vmatpush.bf16.msra.mxu2 %v4917_v27  ;;  %v4957_v27 = vld [vmem:[#allocation8 + $0x60] sm:$0xff] }
  0xe0   :  { %619 = vmatpush.bf16.msra.mxu3 %v4925_v28 }
  0xe2   :  { %696 = vmatpush.bf16.msrb.mxu0 %v4938_v12  ;;  %v4949_v12 = vld [vmem:[#allocation7 + $0x60] sm:$0xff] }
  0xe6   :  { %697 = vmatpush.bf16.msrb.mxu0 %v4937_v15  ;;  %v4946_v15 = vld [vmem:[#allocation7 + $0x48] sm:$0xff] }
  0xea   :  { %698 = vmatpush.bf16.msrb.mxu0 %v4936_v18 }
  0xee   :  { %699 = vmatpush.bf16.msrb.mxu0 %v4935_v21 }
  0xf2   :  { %700 = vmatpush.bf16.msrb.mxu0 %v4934_v24  ;;  %v4960_v24 = vld [vmem:[#allocation8 + $0x78] sm:$0xff] }
  0xf6   :  { %701 = vmatpush.bf16.msrb.mxu0 %v4933_v29 }
 0x12a   :  { %v295_v41 = vpop.permute.xlu1 %294 }
 0x12b   :  { %v292_v39 = vpop.permute.xlu0 %291  ;;  %vm297_vm1 = vcmp.eq.s32.totalorder %v295_v41, %v289_v38 }
 0x12c   :  { %vm296_vm0 = vcmp.eq.s32.totalorder %v292_v39, %v289_v38 }
 0x12d   :  { %3911 = vmatmul.msk.f32.vlgmr.msra.gmra.mxu1 %vm296_vm0, %v5656_v40 }
 0x132   :  { %v307_v43 = vpop.permute.xlu1 %306 }
 0x133   :  { %v304_v42 = vpop.permute.xlu0 %303  ;;  %vm309_vm3 = vcmp.eq.s32.totalorder %v307_v43, %v289_v38 }
 0x134   :  { %vm308_vm2 = vcmp.eq.s32.totalorder %v304_v42, %v289_v38 }
 0x135   :  { %3909 = vmatmul.msk.f32.vlgmr.msra.gmra.mxu0 %vm308_vm2, %v5656_v40  ;;  %3912 = vmatmul.msk.f32.gmra.mxu1 %vm297_vm1, %v5656_v40 }
 0x13d   :  { %3910 = vmatmul.msk.f32.gmra.mxu0 %vm309_vm3, %v5656_v40 }
 0x1aa   :  { %v386_v44 = vpop.f32.mrf.mxu1 }
 0x1b2   :  { %v363_v46 = vpop.f32.mrf.mxu0  ;;  %v389_v49 = vpop.f32.mrf.mxu1 }
 0x1b3   :  { %v387_v47 = vadd.f32 %v386_v44, %v363_v46  ;;  %v5211_v46 = vld [vmem:[%s5703_s3] ss:$0 sm:$0xff]  ;;  %s6294_s3 = sld [smem:[#allocation28_spill]] }
 0x1b5   :  { %v396_v48 = vadd.f32 %v5210_v45, %v387_v47 }
 0x1b7   :  { %400 = vadd.xlane.f32.xlu2 %v396_v48 }
 0x1b9   :  { %v282_v17 = vld [vmem:[%s6294_s3] sm:$0x1]  ;;  %v283_v29 = vld [vmem:[%s6294_s3 + $0x1] sm:$0x1] }
 0x1ba   :  { %v366_v50 = vpop.f32.mrf.mxu0  ;;  %v457_v18 = vsub.f32 1.0, %v282_v17  ;;  %v4941_v17 = vld [vmem:[#allocation11] sm:$0xff] }
 0x1bb   :  { %v390_v51 = vadd.f32 %v389_v49, %v366_v50  ;;  %v5212_v50 = vld [vmem:[%s5708_s8] ss:$0 sm:$0xff]  ;;  %s6295_s8 = sld [smem:[#allocation32_spill]] }
 0x1bc   :  { %v459_v19 = vmul.f32 -1e+09, %v457_v18 }
 0x1bd   :  { %v397_v52 = vadd.f32 %v5210_v45, %v390_v51 }
 0x1be   :  { %v5943_v20 = vperm.slane %v459_v19, 0 }
 0x1bf   :  { %402 = vadd.xlane.f32.xlu2 %v397_v52 }
 0x22a   :  { %v401_v60 = vpop.xlane.xlu2 %400 }
 0x22b   :  { %v411_v61 = vmul.f32 %v5905_v59, %v401_v60 }
 0x22d   :  { %v5908_v62 = vsub.f32 %v396_v48, %v411_v61  ;;  %v5215_v61 = vld [vmem:[%s6292_s9] ss:$0 sm:$0xff] }
 0x22f   :  { %v415_v63 = vmul.f32 %v5908_v62, %v5908_v62 }
 0x231   :  { %417 = vadd.xlane.f32.xlu0 %v415_v63 }
 0x232   :  { %v403_v0 = vpop.xlane.xlu2 %402 }
 0x233   :  { %v412_v1 = vmul.f32 %v5905_v59, %v403_v0  ;;  %v5214_v0 = vld [vmem:[%s6293_s29] ss:$0 sm:$0xff] }
 0x235   :  { %v5913_v2 = vsub.f32 %v397_v52, %v412_v1 }
 0x237   :  { %v416_v3 = vmul.f32 %v5913_v2, %v5913_v2 }
 0x239   :  { %419 = vadd.xlane.f32.xlu1 %v416_v3 }
 0x2a4   :  { %v418_v25 = vpop.xlane.xlu0 %417 }
 0x2a5   :  { %v421_v26 = vmul.f32 %v418_v25, %v5905_v59  ;;  %v4959_v25 = vld [vmem:[#allocation8 + $0x70] sm:$0xff] }
 0x2a7   :  { %v423_v30 = vadd.f32 1e-05, %v421_v26  ;;  %v4958_v26 = vld [vmem:[#allocation8 + $0x68] sm:$0xff] }
 0x2a9   :  { %5240 = vrsqrt.f32 %v423_v30  ;;  %vm431_vm6 = vweird.f32 %v423_v30 }
 0x2ac   :  { %v420_v31 = vpop.xlane.xlu1 %419 }
 0x2ad   :  { %v422_v32 = vmul.f32 %v420_v31, %v5905_v59 }
 0x2af   :  { %v5241_v33 = vpop.eup %5240  ;;  %v424_v34 = vadd.f32 1e-05, %v422_v32  ;;  %v458_v32 = vsub.f32 1.0, %v283_v29 }
 0x2b0   :  { %v426_v35 = vmul.f32 %v5241_v33, %v423_v30  ;;  %vm432_vm5 = vweird.f32 %v5241_v33 }
 0x2b1   :  { %5242 = vrsqrt.f32 %v424_v34  ;;  %vm433_vm7 = vmor %vm431_vm6, %vm432_vm5  ;;  %vm441_vm9 = vweird.f32 %v424_v34 }
 0x2b2   :  { %v427_v36 = vmul.f32 %v5241_v33, %v426_v35 }
 0x2b4   :  { %v428_v37 = vmul.f32 0.5, %v427_v36 }
 0x2b6   :  { %v429_v38 = vsub.f32 1.5, %v428_v37 }
 0x2b7   :  { %v5243_v39 = vpop.eup %5242 }
 0x2b8   :  { %v430_v40 = vmul.f32 %v5241_v33, %v429_v38  ;;  %v436_v41 = vmul.f32 %v5243_v39, %v424_v34  ;;  %vm442_vm8 = vweird.f32 %v5243_v39 }
 0x2b9   :  { %vm443_vm10 = vmor %vm441_vm9, %vm442_vm8 }
 0x2ba   :  { %v437_v42 = vmul.f32 %v5243_v39, %v436_v41  ;;  %v434_v43 = vsel %vm433_vm7, %v5241_v33, %v430_v40  ;;  %v460_v33 = vmul.f32 -1e+09, %v458_v32  ;;  %v4956_v40 = vld [vmem:[#allocation8 + $0x58] sm:$0xff]  ;;  %v4955_v41 = vld [vmem:[#allocation8 + $0x50] sm:$0xff] }
 0x2bb   :  { %v445_v47 = vmul.f32 %v434_v43, %v5908_v62  ;;  %v4953_v43 = vld [vmem:[#allocation8 + $0x40] sm:$0xff] }
 0x2bc   :  { %v438_v44 = vmul.f32 0.5, %v437_v42  ;;  %v5948_v35 = vperm.slane %v460_v33, 0  ;;  %v4954_v42 = vld [vmem:[#allocation8 + $0x48] sm:$0xff] }
 0x2bd   :  { %v450_v51 = vmul.f32 %v5211_v46, %v445_v47  ;;  %v4965_v47 = vld [vmem:[#allocation10 + $0x60] sm:$0xff] }
 0x2be   :  { %v439_v45 = vsub.f32 1.5, %v438_v44  ;;  %v4968_v44 = vld [vmem:[#allocation10 + $0x78] sm:$0xff] }
 0x2bf   :  { %v5923_v54 = vadd.f32 %v5212_v50, %v450_v51 }
 0x2c0   :  { %v440_v48 = vmul.f32 %v5243_v39, %v439_v45  ;;  %v4967_v45 = vld [vmem:[#allocation10 + $0x70] sm:$0xff] }
 0x2c2   :  { %v444_v49 = vsel %vm443_vm10, %v5243_v39, %v440_v48 }
 0x2c3   :  { %v446_v52 = vmul.f32 %v444_v49, %v5913_v2 }
 0x2c5   :  { %v451_v53 = vmul.f32 %v5211_v46, %v446_v52  ;;  %v4966_v46 = vld [vmem:[#allocation10 + $0x68] sm:$0xff] }
 0x2c7   :  { %v5925_v55 = vadd.f32 %v5212_v50, %v451_v53 }
 0x2c9   :  { %v5929_v56 = vpack.c.bf16 %v5925_v55, %v5923_v54 }
 0x2cb   :  { %538 = vmatmul.bf16.vlgmr.msra.gmra.mxu2 %v5929_v56  ;;  %620 = vmatmul.bf16.vlgmr.msra.gmra.mxu3 %v5929_v56 }
 0x2cc   :  { %702 = vmatmul.bf16.vlgmr.msrb.gmra.mxu0 %v5929_v56 }
 0x349   :  { %v703_v58 = vpop.f32.mrf.mxu0 }
 0x34a   :  { %v704_v60 = vadd.f32 %v5213_v57, %v703_v58 }
 0x34c   :  { %808 = vmatpush.msrb.mxu3 %v704_v60  ;;  %v4964_v60 = vld [vmem:[#allocation10 + $0x58] sm:$0xff] }
 0x34e   :  { %v539_v62 = vpop.f32.mrf.mxu2  ;;  %v621_v63 = vpop.f32.mrf.mxu3  ;;  %999 = vmatpush.bf16.msra.mxu3 %v4960_v24 }
 0x34f   :  { %v622_v1 = vadd.f32 %v5215_v61, %v621_v63  ;;  %v540_v4 = vadd.f32 %v5214_v0, %v539_v62  ;;  %v4962_v62 = vld [vmem:[#allocation10 + $0x48] sm:$0xff]  ;;  %v4961_v63 = vld [vmem:[#allocation10 + $0x40] sm:$0xff] }
 0x351   :  { %v705_v2 = vpop.f32.mrf.mxu0  ;;  %4009 = vmatpush.xpose.msk.msrb.mxu1 %vm714_vm11, %v622_v1 }
 0x352   :  { %v706_v3 = vadd.f32 %v5213_v57, %v705_v2  ;;  %1000 = vmatpush.bf16.msra.mxu3 %v4959_v25 }
 0x354   :  { %4010 = vmatmul.msk.f32.vlgmr.msrb.gmra.mxu1 %vm714_vm11, %v540_v4 }
 0x355   :  { %831 = vmatpush.msra.mxu1 %v706_v3  ;;  %v4944_v3 = vld [vmem:[#allocation11 + $0x18] sm:$0xff] }
 0x356   :  { %v623_v5 = vpop.f32.mrf.mxu3  ;;  %v541_v7 = vpop.f32.mrf.mxu2  ;;  %1001 = vmatpush.bf16.msra.mxu3 %v4958_v26 }
 0x357   :  { %v624_v8 = vadd.f32 %v5215_v61, %v623_v5  ;;  %v542_v9 = vadd.f32 %v5214_v0, %v541_v7  ;;  %1083 = vmatpush.bf16.msrb.mxu1 %v4968_v44  ;;  %v4963_v61 = vld [vmem:[#allocation10 + $0x50] sm:$0xff]  ;;  %v5217_v5 = vld [vmem:[%s6292_s9 + $0x1] ss:$0 sm:$0xff]  ;;  %v4970_v44 = vld [vmem:[#allocation11 + $0x28] sm:$0xff] }
 0x359   :  { %4011 = vmatpush.xpose.msk.msrb.mxu2 %vm714_vm11, %v624_v8  ;;  %v5216_v8 = vld [vmem:[%s6293_s29 + $0x1] ss:$0 sm:$0xff] }
 0x35a   :  { %1002 = vmatpush.bf16.msra.mxu3 %v4957_v27 }
 0x35b   :  { %1084 = vmatpush.bf16.msrb.mxu1 %v4967_v45 }
 0x35c   :  { %4012 = vmatmul.msk.f32.vlgmr.msrb.gmra.mxu2 %vm714_vm11, %v542_v9 }
 0x35d   :  { %915 = vmatpush.bf16.msra.mxu2 %v4952_v6  ;;  %v4943_v6 = vld [vmem:[#allocation11 + $0x10] sm:$0xff] }
 0x35e   :  { %1003 = vmatpush.bf16.msra.mxu3 %v4956_v40 }
 0x35f   :  { %1085 = vmatpush.bf16.msrb.mxu1 %v4966_v46 }
 0x361   :  { %916 = vmatpush.bf16.msra.mxu2 %v4951_v10 }
 0x362   :  { %1004 = vmatpush.bf16.msra.mxu3 %v4955_v41 }
 0x363   :  { %1086 = vmatpush.bf16.msrb.mxu1 %v4965_v47 }
 0x365   :  { %917 = vmatpush.bf16.msra.mxu2 %v4950_v11  ;;  %v4942_v11 = vld [vmem:[#allocation11 + $0x8] sm:$0xff] }
 0x366   :  { %1005 = vmatpush.bf16.msra.mxu3 %v4954_v42  ;;  %v4972_v42 = vld [vmem:[#allocation11 + $0x38] sm:$0xff] }
 0x367   :  { %1087 = vmatpush.bf16.msrb.mxu1 %v4964_v60  ;;  %v5219_v60 = vld [vmem:[%s6295_s8] ss:$0 sm:$0xff] }
 0x369   :  { %918 = vmatpush.bf16.msra.mxu2 %v4949_v12 }
 0x36a   :  { %1006 = vmatpush.bf16.msra.mxu3 %v4953_v43  ;;  %v4971_v43 = vld [vmem:[#allocation11 + $0x30] sm:$0xff] }
 0x36b   :  { %1088 = vmatpush.bf16.msrb.mxu1 %v4963_v61 }
 0x36d   :  { %919 = vmatpush.bf16.msra.mxu2 %v4948_v13 }
 0x36f   :  { %1089 = vmatpush.bf16.msrb.mxu1 %v4962_v62 }
 0x371   :  { %920 = vmatpush.bf16.msra.mxu2 %v4947_v14 }
 0x373   :  { %1090 = vmatpush.bf16.msrb.mxu1 %v4961_v63 }
 0x375   :  { %921 = vmatpush.bf16.msra.mxu2 %v4946_v15 }
 0x379   :  { %922 = vmatpush.bf16.msra.mxu2 %v4945_v16 }
 0x37c   :  { %923 = vmatmul.bf16.vlgmr.msra.gmra.mxu2 %v5929_v56 }
 0x3d1   :  { %v738_v21 = vpop.f32.mrf.mxu1 }
 0x3d2   :  { %v739_v22 = vadd.f32 %v738_v21, %v5943_v20  ;;  %v5218_v21 = vld [vmem:[%s6291_s5 + $0x1] ss:$0 sm:$0xff] }
 0x3d4   :  { %v768_v23 = vsel %vm767_vm12, %v739_v22, -inf }
 0x3d5   :  { %769 = vmax.xlane.f32.xlu2 %v768_v23 }
 0x3df   :  { %v764_v37 = vpop.f32.mrf.mxu2 }
 0x3e0   :  { %v765_v38 = vadd.f32 %v764_v37, %v5948_v35 }
 0x3e2   :  { %v771_v39 = vsel %vm767_vm12, %v765_v38, -inf }
 0x3ff   :  { %v924_v7 = vpop.f32.mrf.mxu2 }
 0x400   :  { %v925_v12 = vadd.f32 %v5216_v8, %v924_v7 }
 0x407   :  { %v926_v14 = vpop.f32.mrf.mxu2 }
 0x408   :  { %v927_v16 = vadd.f32 %v5216_v8, %v926_v14  ;;  %v4987_v14 = vld [vmem:[#allocation13 + $0x74] sm:$0xf] }
 0x448   :  { %v770_v28 = vpop.xlane.xlu2 %769 }
 0x449   :  { %v774_v30 = vsub.f32 %v739_v22, %v770_v28 }
 0x44b   :  { %v776_v31 = vmul.f32 1.442695, %v774_v30 }
 0x44d   :  { %5244 = vpow2.f32 %v776_v31 }
 0x453   :  { %v5245_v34 = vpop.eup %5244 }
 0x454   :  { %v780_v36 = vsel %vm767_vm12, %v5245_v34, 0.0 }
 0x455   :  { %781 = vadd.xlane.f32.xlu2 %v780_v36 }
 0x45d   :  { %772 = vmax.xlane.f32.xlu2 %v771_v39 }
 0x4c8   :  { %v782_v48 = vpop.xlane.xlu2 %781 }
 0x4c9   :  { %5246 = vrcp.f32 %v782_v48 }
 0x4cf   :  { %v5247_v49 = vpop.eup %5246 }
 0x4d0   :  { %v773_v50 = vpop.xlane.xlu2 %772  ;;  %v788_v51 = vmul.f32 %v5247_v49, %v5245_v34 }
 0x4d1   :  { %v775_v52 = vsub.f32 %v765_v38, %v773_v50 }
 0x4d2   :  { %4013 = vmatmul.msk.f32.vlgmr.msrb.gmra.mxu3 %vm767_vm12, %v788_v51  ;;  %v4969_v51 = vld [vmem:[#allocation11 + $0x20] sm:$0xff] }
 0x4d3   :  { %v778_v53 = vmul.f32 1.442695, %v775_v52  ;;  %1258 = vmatpush.bf16.msrb.mxu3 %v4972_v42 }
 0x4d5   :  { %5248 = vpow2.f32 %v778_v53 }
 0x4d7   :  { %1259 = vmatpush.bf16.msrb.mxu3 %v4971_v43  ;;  %v4172_v43 = vld [vmem:[#allocation13 + $0x20] sm:$0xf] }
 0x4da   :  { %1007 = vmatmul.bf16.vlgmr.msra.gmra.mxu3 %v5929_v56 }
 0x4db   :  { %v5249_v57 = vpop.eup %5248  ;;  %1260 = vmatpush.bf16.msrb.mxu3 %v4970_v44  ;;  %v4978_v44 = vld [vmem:[#allocation13 + $0x24] sm:$0xf0] }
 0x4dc   :  { %v783_v58 = vsel %vm767_vm12, %v5249_v57, 0.0 }
 0x4dd   :  { %784 = vadd.xlane.f32.xlu2 %v783_v58 }
 0x4df   :  { %1261 = vmatpush.bf16.msrb.mxu3 %v4969_v51  ;;  %v4975_v51 = vld [vmem:[#allocation13 + $0x14] sm:$0xf] }
 0x550   :  { %v785_v0 = vpop.xlane.xlu2 %784 }
 0x551   :  { %5250 = vrcp.f32 %v785_v0 }
 0x555   :  { %v810_v1 = vpop.f32.mrf.mxu3 }
 0x557   :  { %v5251_v2 = vpop.eup %5250 }
 0x558   :  { %v789_v4 = vmul.f32 %v5251_v2, %v5249_v57 }
 0x55a   :  { %4014 = vmatmul.msk.f32.vlgmr.msra.gmra.mxu1 %vm767_vm12, %v789_v4 }
 0x55b   :  { %1299 = vmatpush.bf16.msra.mxu1 %v4944_v3 }
 0x55d   :  { %v1008_v9 = vpop.f32.mrf.mxu3 }
 0x55e   :  { %v1009_v10 = vadd.f32 %v5217_v5, %v1008_v9 }
 0x55f   :  { %1300 = vmatpush.bf16.msra.mxu1 %v4943_v6 }
 0x560   :  { %4114 = vmatpush.xpose.msk.msra.mxu0 %vm714_vm11, %v1009_v10 }
 0x562   :  { %1091 = vmatmul.bf16.vlgmr.msrb.gmra.mxu1 %v5929_v56 }
 0x563   :  { %4115 = vmatmul.msk.f32.vlgmr.msra.gmra.mxu0 %vm714_vm11, %v925_v12  ;;  %1301 = vmatpush.bf16.msra.mxu1 %v4942_v11 }
 0x565   :  { %v1010_v13 = vpop.f32.mrf.mxu3 }
 0x566   :  { %v1011_v15 = vadd.f32 %v5217_v5, %v1010_v13  ;;  %v4988_v13 = vld [vmem:[#allocation13 + $0x74] sm:$0xf0] }
 0x567   :  { %1302 = vmatpush.bf16.msra.mxu1 %v4941_v17 }
 0x568   :  { %4116 = vmatpush.xpose.msk.msrb.mxu0 %vm714_vm11, %v1011_v15 }
 0x56b   :  { %4117 = vmatmul.msk.f32.vlgmr.msrb.gmra.mxu0 %vm714_vm11, %v927_v16  ;;  %v4214_v16 = vld [vmem:[#allocation13 + $0x78] sm:$0xf0] }
 0x56c   :  { %v4217_v17 = vor.u32 %v4987_v14, %v4214_v16 }
 0x5d7   :  { %v833_v18 = vpop.f32.mrf.mxu1 }
 0x5d8   :  { %v836_v19 = vpack.c.bf16 %v833_v18, %v810_v1  ;;  %v4204_v18 = vld [vmem:[#allocation13 + $0x60] sm:$0xf] }
 0x5da   :  { %4153 = vmatmul.msk.bf16.vlgmr.msra.gmra.mxu1 %vm714_vm11, %v836_v19  ;;  %v4986_v19 = vld [vmem:[#allocation13 + $0x64] sm:$0xf0] }
 0x5df   :  { %v1092_v22 = vpop.f32.mrf.mxu1 }
 0x5e0   :  { %v1093_v56 = vadd.f32 %v5218_v21, %v1092_v22  ;;  %v1120_v23 = vpop.f32.mrf.mxu0  ;;  %v4205_v22 = vor.u32 %v4986_v19, %v4204_v18 }
 0x5e1   :  { %v1121_v29 = vadd.f32 %v1120_v23, %v5943_v20 }
 0x5e2   :  { %1189 = vmatpush.msra.mxu0 %v1093_v56  ;;  %v4206_v56 = vld [vmem:[#allocation13 + $0x68] sm:$0xf0] }
 0x5e3   :  { %v1149_v30 = vsel %vm767_vm12, %v1121_v29, -inf }
 0x5e7   :  { %v1094_v24 = vpop.f32.mrf.mxu1 }
 0x5e8   :  { %v1095_v25 = vadd.f32 %v5218_v21, %v1094_v24  ;;  %v1146_v26 = vpop.f32.mrf.mxu0  ;;  %v4985_v21 = vld [vmem:[#allocation13 + $0x64] sm:$0xf]  ;;  %v4196_v24 = vld [vmem:[#allocation13 + $0x50] sm:$0xf] }
 0x5e9   :  { %v1147_v27 = vadd.f32 %v1146_v26, %v5948_v35  ;;  %v4209_v23 = vor.u32 %v4985_v21, %v4206_v56  ;;  %v4983_v26 = vld [vmem:[#allocation13 + $0x54] sm:$0xf]  ;;  %v5220_v21 = vld [vmem:[%s6296_s19] ss:$0 sm:$0xff] }
 0x5ea   :  { %1212 = vmatpush.msrb.mxu2 %v1095_v25  ;;  %v4984_v25 = vld [vmem:[#allocation13 + $0x54] sm:$0xf0] }
 0x5eb   :  { %v1152_v28 = vsel %vm767_vm12, %v1147_v27, -inf }
 0x5ec   :  { %1153 = vmax.xlane.f32.xlu2 %v1152_v28  ;;  %1486 = vmatpush.bf16.msra.mxu2 %v4217_v17  ;;  %v4198_v28 = vld [vmem:[#allocation13 + $0x58] sm:$0xf0] }
 0x5f0   :  { %1487 = vmatpush.bf16.msra.mxu2 %v4209_v23 }
 0x5f4   :  { %1150 = vmax.xlane.f32.xlu2 %v1149_v30  ;;  %v4188_v30 = vld [vmem:[#allocation13 + $0x40] sm:$0xf] }
 0x657   :  { %v1304_v58 = vpop.f32.mrf.mxu1 }
 0x65f   :  { %v1154_v31 = vpop.xlane.xlu2 %1153  ;;  %v1306_v1 = vpop.f32.mrf.mxu1 }
 0x660   :  { %v1156_v32 = vsub.f32 %v1147_v27, %v1154_v31  ;;  %v4197_v27 = vor.u32 %v4984_v25, %v4196_v24  ;;  %v4982_v31 = vld [vmem:[#allocation13 + $0x44] sm:$0xf0]  ;;  %v5221_v25 = vld [vmem:[%s6297_s30] ss:$0 sm:$0xff] }
 0x662   :  { %v1159_v33 = vmul.f32 1.442695, %v1156_v32  ;;  %v4981_v32 = vld [vmem:[#allocation13 + $0x44] sm:$0xf] }
 0x664   :  { %5252 = vpow2.f32 %v1159_v33  ;;  %v4189_v33 = vor.u32 %v4982_v31, %v4188_v30  ;;  %v1386_v30 = vld [vmem:[%s6298_s15] sm:$0x3]  ;;  %v4995_v31 = vld [vmem:[#allocation14 + $0x30] sm:$0xff] }
 0x667   :  { %v1151_v34 = vpop.xlane.xlu2 %1150 }
 0x668   :  { %v1155_v36 = vsub.f32 %v1121_v29, %v1151_v34  ;;  %v4201_v29 = vor.u32 %v4983_v26, %v4198_v28  ;;  %v4190_v34 = vld [vmem:[#allocation13 + $0x48] sm:$0xf0] }
 0x66a   :  { %v5253_v37 = vpop.eup %5252  ;;  %v1157_v38 = vmul.f32 1.442695, %v1155_v36  ;;  %1488 = vmatpush.bf16.msra.mxu2 %v4201_v29  ;;  %v4193_v36 = vor.u32 %v4981_v32, %v4190_v34  ;;  %v1388_v32 = vperm.slane %v1386_v30, 0  ;;  %v4994_v34 = vld [vmem:[#allocation14 + $0x28] sm:$0xff] }
 0x66b   :  { %v1164_v39 = vsel %vm767_vm12, %v5253_v37, 0.0 }
 0x66c   :  { %5254 = vpow2.f32 %v1157_v38  ;;  %1165 = vadd.xlane.f32.xlu0 %v1164_v39  ;;  %v4980_v38 = vld [vmem:[#allocation13 + $0x34] sm:$0xf0]  ;;  %v4979_v39 = vld [vmem:[#allocation13 + $0x34] sm:$0xf] }
 0x66e   :  { %1489 = vmatpush.bf16.msra.mxu2 %v4193_v36 }
 0x672   :  { %v5255_v40 = vpop.eup %5254 }
 0x673   :  { %v1161_v41 = vsel %vm767_vm12, %v5255_v40, 0.0 }
 0x674   :  { %1162 = vadd.xlane.f32.xlu1 %v1161_v41  ;;  %v4182_v41 = vld [vmem:[#allocation13 + $0x38] sm:$0xf0] }
 0x675   :  { %v4185_v42 = vor.u32 %v4979_v39, %v4182_v41  ;;  %v1389_v39 = vperm.slane %v1386_v30, 1 }
 0x677   :  { %1490 = vmatpush.bf16.msra.mxu2 %v4185_v42 }
 0x6df   :  { %v1166_v45 = vpop.xlane.xlu0 %1165 }
 0x6e0   :  { %5256 = vrcp.f32 %v1166_v45  ;;  %v4977_v45 = vld [vmem:[#allocation13 + $0x24] sm:$0xf] }
 0x6e6   :  { %v5257_v46 = vpop.eup %5256 }
 0x6e7   :  { %v1170_v47 = vmul.f32 %v5257_v46, %v5253_v37  ;;  %v1163_v48 = vpop.xlane.xlu1 %1162  ;;  %v4180_v37 = vld [vmem:[#allocation13 + $0x30] sm:$0xf]  ;;  %v4173_v46 = vor.u32 %v4978_v44, %v4172_v43  ;;  %v5002_v43 = vld [vmem:[#allocation14 + $0x68] sm:$0xff] }
 0x6e8   :  { %5258 = vrcp.f32 %v1163_v48 }
 0x6e9   :  { %4119 = vmatmul.msk.f32.vlgmr.msrb.gmra.mxu2 %vm767_vm12, %v1170_v47  ;;  %v4174_v47 = vld [vmem:[#allocation13 + $0x28] sm:$0xf0] }
 0x6ea   :  { %v4177_v48 = vor.u32 %v4977_v45, %v4174_v47  ;;  %v4992_v47 = vld [vmem:[#allocation14 + $0x18] sm:$0xff] }
 0x6ec   :  { %1491 = vmatpush.bf16.msra.mxu2 %v4177_v48 }
 0x6ee   :  { %v5259_v49 = vpop.eup %5258 }
 0x6ef   :  { %v1169_v50 = vmul.f32 %v5259_v49, %v5255_v40  ;;  %v4181_v40 = vor.u32 %v4980_v38, %v4180_v37  ;;  %v4164_v49 = vld [vmem:[#allocation13 + $0x10] sm:$0xf] }
 0x6f0   :  { %v5003_v37 = vld [vmem:[#allocation14 + $0x70] sm:$0xff] }
 0x6f1   :  { %4118 = vmatmul.msk.f32.vlgmr.msra.gmra.mxu0 %vm767_vm12, %v1169_v50  ;;  %v4976_v50 = vld [vmem:[#allocation13 + $0x14] sm:$0xf0] }
 0x76c   :  { %v1214_v52 = vpop.f32.mrf.mxu2 }
 0x76e   :  { %v1191_v53 = vpop.f32.mrf.mxu0 }
 0x76f   :  { %v1217_v57 = vpack.c.bf16 %v1214_v52, %v1191_v53  ;;  %v4165_v52 = vor.u32 %v4976_v50, %v4164_v49  ;;  %v4166_v53 = vld [vmem:[#allocation13 + $0x18] sm:$0xf0] }
 0x771   :  { %4136 = vmatmul.msk.bf16.vlgmr.msrb.gmra.mxu3 %vm714_vm11, %v1217_v57  ;;  %v4169_v57 = vor.u32 %v4975_v51, %v4166_v53  ;;  %v5001_v51 = vld [vmem:[#allocation14 + $0x60] sm:$0xff] }
 0x773   :  { %1492 = vmatpush.bf16.msra.mxu2 %v4169_v57  ;;  %v4991_v57 = vld [vmem:[#allocation14 + $0x10] sm:$0xff] }
 0x7f4   :  { %v1263_v61 = vpop.f32.mrf.mxu3 }
 0x7f5   :  { %v1305_v62 = vadd.f32 %v1304_v58, %v1263_v61  ;;  %v4156_v58 = vld [vmem:[#allocation13] sm:$0xf]  ;;  %v4973_v61 = vld [vmem:[#allocation13 + $0x4] sm:$0xf] }
 0x7f7   :  { %v1313_v63 = vadd.f32 %v5219_v60, %v1305_v62 }
 0x7f9   :  { %v1315_v0 = vadd.f32 %v1313_v63, %v5923_v54 }
 0x7fb   :  { %1319 = vadd.xlane.f32.xlu2 %v1315_v0 }
 0x7fc   :  { %v1265_v2 = vpop.f32.mrf.mxu3 }
 0x7fd   :  { %v1307_v3 = vadd.f32 %v1306_v1, %v1265_v2 }
 0x7ff   :  { %v1314_v4 = vadd.f32 %v5219_v60, %v1307_v3  ;;  %v4974_v60 = vld [vmem:[#allocation13 + $0x4] sm:$0xf0] }
 0x800   :  { %v4157_v63 = vor.u32 %v4974_v60, %v4156_v58 }
 0x801   :  { %v1316_v5 = vadd.f32 %v1314_v4, %v5925_v55  ;;  %v4212_v55 = vld [vmem:[#allocation13 + $0x70] sm:$0xf] }
 0x802   :  { %v4213_v15 = vor.u32 %v4988_v13, %v4212_v55 }
 0x803   :  { %1321 = vadd.xlane.f32.xlu0 %v1316_v5 }
 0x804   :  { %1472 = vmatpush.bf16.msrb.mxu0 %v4213_v15 }
 0x808   :  { %1473 = vmatpush.bf16.msrb.mxu0 %v4205_v22 }
 0x80c   :  { %1474 = vmatpush.bf16.msrb.mxu0 %v4197_v27 }
 0x810   :  { %1475 = vmatpush.bf16.msrb.mxu0 %v4189_v33  ;;  %v5004_v33 = vld [vmem:[#allocation14 + $0x78] sm:$0xff] }
 0x811   :  { %1752 = vmatpush.bf16.msrb.mxu1 %v5004_v33 }
 0x814   :  { %1476 = vmatpush.bf16.msrb.mxu0 %v4181_v40  ;;  %v4993_v40 = vld [vmem:[#allocation14 + $0x20] sm:$0xff] }
 0x815   :  { %1753 = vmatpush.bf16.msrb.mxu1 %v5003_v37 }
 0x818   :  { %1477 = vmatpush.bf16.msrb.mxu0 %v4173_v46 }
 0x819   :  { %1754 = vmatpush.bf16.msrb.mxu1 %v5002_v43 }
 0x81c   :  { %1478 = vmatpush.bf16.msrb.mxu0 %v4165_v52 }
 0x81d   :  { %1755 = vmatpush.bf16.msrb.mxu1 %v5001_v51 }
 0x820   :  { %1479 = vmatpush.bf16.msrb.mxu0 %v4157_v63 }
 0x86e   :  { %v1320_v6 = vpop.xlane.xlu2 %1319 }
 0x86f   :  { %v1323_v7 = vmul.f32 %v1320_v6, %v5905_v59 }
 0x871   :  { %v5979_v8 = vsub.f32 %v1315_v0, %v1323_v7  ;;  %v4158_v0 = vld [vmem:[#allocation13 + $0x8] sm:$0xf0] }
 0x872   :  { %v4161_v2 = vor.u32 %v4973_v61, %v4158_v0 }
 0x873   :  { %v1327_v9 = vmul.f32 %v5979_v8, %v5979_v8 }
 0x874   :  { %1493 = vmatpush.bf16.msra.mxu2 %v4161_v2  ;;  %v4990_v2 = vld [vmem:[#allocation14 + $0x8] sm:$0xff] }
 0x875   :  { %1329 = vadd.xlane.f32.xlu1 %v1327_v9 }
 0x876   :  { %v1322_v10 = vpop.xlane.xlu0 %1321 }
 0x877   :  { %v1324_v54 = vmul.f32 %v1322_v10, %v5905_v59 }
 0x879   :  { %v5984_v11 = vsub.f32 %v1316_v5, %v1324_v54 }
 0x87b   :  { %v1328_v12 = vmul.f32 %v5984_v11, %v5984_v11 }
 0x87d   :  { %1331 = vadd.xlane.f32.xlu2 %v1328_v12 }
 0x8e8   :  { %v1330_v62 = vpop.xlane.xlu1 %1329 }
 0x8e9   :  { %v1333_v1 = vmul.f32 %v1330_v62, %v5905_v59  ;;  %v5000_v62 = vld [vmem:[#allocation14 + $0x58] sm:$0xff] }
 0x8ea   :  { %1756 = vmatpush.bf16.msrb.mxu1 %v5000_v62 }
 0x8eb   :  { %v1335_v3 = vadd.f32 1e-05, %v1333_v1 }
 0x8ed   :  { %5260 = vrsqrt.f32 %v1335_v3  ;;  %vm1343_vm14 = vweird.f32 %v1335_v3 }
 0x8f0   :  { %v1332_v4 = vpop.xlane.xlu2 %1331 }
 0x8f1   :  { %v1334_v5 = vmul.f32 %v1332_v4, %v5905_v59 }
 0x8f3   :  { %v5261_v6 = vpop.eup %5260  ;;  %v1336_v7 = vadd.f32 1e-05, %v1334_v5 }
 0x8f4   :  { %v1338_v9 = vmul.f32 %v5261_v6, %v1335_v3  ;;  %vm1344_vm13 = vweird.f32 %v5261_v6 }
 0x8f5   :  { %5262 = vrsqrt.f32 %v1336_v7  ;;  %vm1345_vm15 = vmor %vm1343_vm14, %vm1344_vm13  ;;  %vm1353_vm1 = vweird.f32 %v1336_v7 }
 0x8f6   :  { %v1339_v10 = vmul.f32 %v5261_v6, %v1338_v9  ;;  %v4999_v9 = vld [vmem:[#allocation14 + $0x50] sm:$0xff] }
 0x8f7   :  { %1757 = vmatpush.bf16.msrb.mxu1 %v4999_v9 }
 0x8f8   :  { %v1340_v54 = vmul.f32 0.5, %v1339_v10 }
 0x8fa   :  { %v1341_v12 = vsub.f32 1.5, %v1340_v54 }
 0x8fb   :  { %v5263_v55 = vpop.eup %5262 }
 0x8fc   :  { %v1342_v13 = vmul.f32 %v5261_v6, %v1341_v12  ;;  %v1348_v14 = vmul.f32 %v5263_v55, %v1336_v7  ;;  %vm1354_vm0 = vweird.f32 %v5263_v55  ;;  %v4989_v12 = vld [vmem:[#allocation14] sm:$0xff] }
 0x8fd   :  { %vm1355_vm2 = vmor %vm1353_vm1, %vm1354_vm0 }
 0x8fe   :  { %v1349_v15 = vmul.f32 %v5263_v55, %v1348_v14  ;;  %v1346_v16 = vsel %vm1345_vm15, %v5261_v6, %v1342_v13 }
 0x8ff   :  { %v1357_v19 = vmul.f32 %v1346_v16, %v5979_v8  ;;  %v4996_v8 = vld [vmem:[#allocation14 + $0x38] sm:$0xff] }
 0x900   :  { %v1350_v17 = vmul.f32 0.5, %v1349_v15  ;;  %1738 = vmatpush.bf16.msra.mxu3 %v4996_v8  ;;  %v4998_v15 = vld [vmem:[#allocation14 + $0x48] sm:$0xff] }
 0x901   :  { %v1362_v24 = vmul.f32 %v5220_v21, %v1357_v19  ;;  %1758 = vmatpush.bf16.msrb.mxu1 %v4998_v15 }
 0x902   :  { %v1351_v18 = vsub.f32 1.5, %v1350_v17 }
 0x903   :  { %v5994_v27 = vadd.f32 %v5221_v25, %v1362_v24 }
 0x904   :  { %v1352_v22 = vmul.f32 %v5263_v55, %v1351_v18  ;;  %1739 = vmatpush.bf16.msra.mxu3 %v4995_v31 }
 0x906   :  { %v1356_v56 = vsel %vm1355_vm2, %v5263_v55, %v1352_v22 }
 0x907   :  { %v1358_v23 = vmul.f32 %v1356_v56, %v5984_v11 }
 0x908   :  { %1740 = vmatpush.bf16.msra.mxu3 %v4994_v34 }
 0x909   :  { %v1363_v26 = vmul.f32 %v5220_v21, %v1358_v23 }
 0x90b   :  { %v5996_v28 = vadd.f32 %v5221_v25, %v1363_v26  ;;  %v4997_v26 = vld [vmem:[#allocation14 + $0x40] sm:$0xff] }
 0x90c   :  { %1741 = vmatpush.bf16.msra.mxu3 %v4993_v40  ;;  %1759 = vmatpush.bf16.msrb.mxu1 %v4997_v26 }
 0x90d   :  { %v1369_v29 = vpack.c.bf16 %v5996_v28, %v5994_v27 }
 0x90f   :  { %1480 = vmatmul.bf16.vlgmr.msrb.gmra.mxu0 %v1369_v29  ;;  %1494 = vmatmul.bf16.vlgmr.msra.gmra.mxu2 %v1369_v29 }
 0x910   :  { %1742 = vmatpush.bf16.msra.mxu3 %v4992_v47 }
 0x914   :  { %1743 = vmatpush.bf16.msra.mxu3 %v4991_v57 }
 0x918   :  { %1744 = vmatpush.bf16.msra.mxu3 %v4990_v2 }
 0x91c   :  { %1745 = vmatpush.bf16.msra.mxu3 %v4989_v12 }
 0x98c   :  { %v1481_v11 = vpop.f32.mrf.mxu0 }
 0x98d   :  { %v6001_v36 = vadd.f32 %v1481_v11, %v1388_v32 }
 0x98f   :  { %v6004_v38 = vmul.f32 0.70710677, %v6001_v36 }
 0x991   :  { %v1516_v41 = vand.u32 2147483647, %v6004_v38  ;;  %vm1508_vm3 = vcmp.ge.f32.partialorder %v6004_v38, 0.0 }
 0x992   :  { %v1495_v42 = vpop.f32.mrf.mxu2 }
 0x993   :  { %v1520_v44 = vmul.f32 0.3275911, %v1516_v41  ;;  %v6007_v45 = vadd.f32 %v1495_v42, %v1389_v39  ;;  %v1568_v6 = vsub.f32 0.0, %v1516_v41 }
 0x994   :  { %v1483_v46 = vpop.f32.mrf.mxu0 }
 0x995   :  { %v1524_v48 = vadd.f32 1.0, %v1520_v44  ;;  %v6010_v49 = vmul.f32 0.70710677, %v6007_v45  ;;  %v6012_v50 = vadd.f32 %v1483_v46, %v1388_v32  ;;  %v1572_v14 = vmul.f32 %v1568_v6, %v1516_v41 }
 0x997   :  { %5264 = vrcp.f32 %v1524_v48  ;;  %v1517_v52 = vand.u32 2147483647, %v6010_v49  ;;  %v6016_v53 = vmul.f32 0.70710677, %v6012_v50  ;;  %v1576_v23 = vmul.f32 1.442695, %v1572_v14 }
 0x998   :  { %vm1509_vm5 = vcmp.ge.f32.partialorder %v6010_v49, 0.0 }
 0x999   :  { %v1521_v58 = vmul.f32 0.3275911, %v1517_v52  ;;  %v1518_v60 = vand.u32 2147483647, %v6016_v53  ;;  %v1569_v17 = vsub.f32 0.0, %v1517_v52  ;;  %vm1510_vm4 = vcmp.ge.f32.partialorder %v6016_v53, 0.0 }
 0x99a   :  { %v1497_v61 = vpop.f32.mrf.mxu2  ;;  %v1500_v53 = vmul.f32 0.5, %v6001_v36 }
 0x99b   :  { %v1525_v63 = vadd.f32 1.0, %v1521_v58  ;;  %v6019_v0 = vadd.f32 %v1497_v61, %v1389_v39  ;;  %v1522_v1 = vmul.f32 0.3275911, %v1518_v60  ;;  %v1570_v25 = vsub.f32 0.0, %v1518_v60 }
 0x99c   :  { %v1573_v29 = vmul.f32 %v1569_v17, %v1517_v52  ;;  %v5658_v17 = vmov -1.0  }
 0x99d   :  { %v5265_v3 = vpop.eup %5264  ;;  %5266 = vrcp.f32 %v1525_v63  ;;  %v6022_v4 = vmul.f32 0.70710677, %v6019_v0  ;;  %v1526_v7 = vadd.f32 1.0, %v1522_v1  ;;  %v1574_v34 = vmul.f32 %v1570_v25, %v1518_v60 }
 0x99e   :  { %v1532_v5 = vmul.f32 1.0614054, %v5265_v3  ;;  %v1578_v39 = vmul.f32 1.442695, %v1573_v29  ;;  %v1513_v29 = vsel %vm1509_vm5, 1.0, %v5658_v17 }
 0x99f   :  { %v1519_v10 = vand.u32 2147483647, %v6022_v4  ;;  %5268 = vrcp.f32 %v1526_v7  ;;  %v1580_v51 = vmul.f32 1.442695, %v1574_v34  ;;  %vm1511_vm6 = vcmp.ge.f32.partialorder %v6022_v4, 0.0 }
 0x9a0   :  { %v1536_v54 = vadd.f32 -1.4531521, %v1532_v5 }
 0x9a1   :  { %v1523_v55 = vmul.f32 0.3275911, %v1519_v10  ;;  %v1571_v41 = vsub.f32 0.0, %v1519_v10 }
 0x9a2   :  { %v1540_v13 = vmul.f32 %v5265_v3, %v1536_v54 }
 0x9a3   :  { %v5267_v16 = vpop.eup %5266  ;;  %v1527_v18 = vadd.f32 1.0, %v1523_v55  ;;  %v1575_v58 = vmul.f32 %v1571_v41, %v1519_v10 }
 0x9a4   :  { %v1544_v19 = vadd.f32 1.4214138, %v1540_v13  ;;  %v1533_v21 = vmul.f32 1.0614054, %v5267_v16 }
 0x9a5   :  { %5270 = vrcp.f32 %v1527_v18  ;;  %v5269_v22 = vpop.eup %5268  ;;  %v1582_v7 = vmul.f32 1.442695, %v1575_v58  ;;  %v1512_v18 = vsel %vm1508_vm3, 1.0, %v5658_v17 }
 0x9a6   :  { %v1548_v56 = vmul.f32 %v5265_v3, %v1544_v19  ;;  %v1537_v24 = vadd.f32 -1.4531521, %v1533_v21  ;;  %v1534_v8 = vmul.f32 1.0614054, %v5269_v22  ;;  %5272 = vpow2.f32 %v1576_v23 }
 0x9a7   :  { %5274 = vpow2.f32 %v1578_v39 }
 0x9a8   :  { %v1552_v30 = vadd.f32 -0.28449672, %v1548_v56  ;;  %v1541_v31 = vmul.f32 %v5267_v16, %v1537_v24  ;;  %v1538_v32 = vadd.f32 -1.4531521, %v1534_v8  ;;  %5276 = vpow2.f32 %v1580_v51 }
 0x9a9   :  { %5278 = vpow2.f32 %v1582_v7  ;;  %v1514_v24 = vsel %vm1510_vm4, 1.0, %v5658_v17 }
 0x9aa   :  { %v1556_v33 = vmul.f32 %v5265_v3, %v1552_v30  ;;  %v1545_v11 = vadd.f32 1.4214138, %v1541_v31  ;;  %v1542_v40 = vmul.f32 %v5269_v22, %v1538_v32  ;;  %v1502_v32 = vmul.f32 0.5, %v6012_v50  ;;  %v5222_v50 = vld [vmem:[%s6299_s7] ss:$0 sm:$0xff] }
 0x9ab   :  { %v5271_v37 = vpop.eup %5270 }
 0x9ac   :  { %v1560_v42 = vadd.f32 0.2548296, %v1556_v33  ;;  %v1549_v43 = vmul.f32 %v5267_v16, %v1545_v11  ;;  %v1535_v44 = vmul.f32 1.0614054, %v5271_v37  ;;  %v1546_v46 = vadd.f32 1.4214138, %v1542_v40  ;;  %v5273_v61 = vpop.eup %5272 }
 0x9ad   :  { %v5275_v12 = vpop.eup %5274 }
 0x9ae   :  { %v1564_v47 = vmul.f32 %v5265_v3, %v1560_v42  ;;  %v1553_v48 = vadd.f32 -0.28449672, %v1549_v43  ;;  %v1539_v52 = vadd.f32 -1.4531521, %v1535_v44  ;;  %v1550_v57 = vmul.f32 %v5269_v22, %v1546_v46  ;;  %v5277_v15 = vpop.eup %5276 }
 0x9af   :  { %v5279_v26 = vpop.eup %5278  ;;  %v1501_v42 = vmul.f32 0.5, %v6007_v45  ;;  %v1503_v43 = vmul.f32 0.5, %v6019_v0 }
 0x9b0   :  { %v1557_v62 = vmul.f32 %v5267_v16, %v1553_v48  ;;  %v1543_v63 = vmul.f32 %v5271_v37, %v1539_v52  ;;  %v1584_v1 = vmul.f32 %v5273_v61, %v1564_v47  ;;  %v1554_v60 = vadd.f32 -0.28449672, %v1550_v57 }
 0x9b2   :  { %v1561_v2 = vadd.f32 0.2548296, %v1557_v62  ;;  %v1547_v5 = vadd.f32 1.4214138, %v1543_v63  ;;  %v1558_v6 = vmul.f32 %v5269_v22, %v1554_v60  ;;  %v1588_v3 = vsub.f32 1.0, %v1584_v1  ;;  %v5020_v63 = vld [vmem:[#allocation8 + $0xb8] sm:$0xff] }
 0x9b3   :  { %v5028_v1 = vld [vmem:[#allocation10 + $0xb8] sm:$0xff]  ;;  %1975 = vmatpush.bf16.msrb.mxu2 %v5020_v63  ;;  %v5019_v60 = vld [vmem:[#allocation8 + $0xb0] sm:$0xff] }
 0x9b4   :  { %v1565_v9 = vmul.f32 %v5267_v16, %v1561_v2  ;;  %v1551_v54 = vmul.f32 %v5271_v37, %v1547_v5  ;;  %v1562_v55 = vadd.f32 0.2548296, %v1558_v6  ;;  %v1592_v21 = vmul.f32 %v1588_v3, %v1512_v18  ;;  %2059 = vmatpush.bf16.msrb.mxu3 %v5028_v1  ;;  %v5027_v2 = vld [vmem:[#allocation10 + $0xb0] sm:$0xff]  ;;  %v5018_v3 = vld [vmem:[#allocation8 + $0xa8] sm:$0xff]  ;;  %v5024_v18 = vld [vmem:[#allocation10 + $0x98] sm:$0xff] }
 0x9b6   :  { %v1585_v13 = vmul.f32 %v5275_v12, %v1565_v9  ;;  %v1555_v14 = vadd.f32 -0.28449672, %v1551_v54  ;;  %v1566_v10 = vmul.f32 %v5269_v22, %v1562_v55  ;;  %v1596_v22 = vadd.f32 1.0, %v1592_v21  ;;  %v5026_v55 = vld [vmem:[#allocation10 + $0xa8] sm:$0xff]  ;;  %v5015_v21 = vld [vmem:[#allocation8 + $0x90] sm:$0xff] }
 0x9b7   :  { %1976 = vmatpush.bf16.msrb.mxu2 %v5019_v60 }
 0x9b8   :  { %v1559_v19 = vmul.f32 %v5271_v37, %v1555_v14  ;;  %v1586_v56 = vmul.f32 %v5277_v15, %v1566_v10  ;;  %v1589_v16 = vsub.f32 1.0, %v1585_v13  ;;  %v1600_v11 = vmul.f32 %v1596_v22, %v1500_v53  ;;  %2060 = vmatpush.bf16.msrb.mxu3 %v5027_v2  ;;  %v5017_v13 = vld [vmem:[#allocation8 + $0xa0] sm:$0xff]  ;;  %v5012_v10 = vld [vmem:[#allocation7 + $0xb8] sm:$0xff]  ;;  %v5047_v53 = vld [vmem:[#allocation8 + $0xf0] sm:$0xff] }
 0x9b9   :  { %v5025_v14 = vld [vmem:[#allocation10 + $0xa0] sm:$0xff]  ;;  %1891 = vmatpush.bf16.msra.mxu0 %v5012_v10  ;;  %v5016_v15 = vld [vmem:[#allocation8 + $0x98] sm:$0xff] }
 0x9ba   :  { %v1563_v23 = vadd.f32 0.2548296, %v1559_v19  ;;  %v1590_v38 = vsub.f32 1.0, %v1586_v56  ;;  %v1593_v30 = vmul.f32 %v1589_v16, %v1513_v29  ;;  %v5011_v19 = vld [vmem:[#allocation7 + $0xb0] sm:$0xff]  ;;  %v5010_v16 = vld [vmem:[#allocation7 + $0xa8] sm:$0xff]  ;;  %v5008_v22 = vld [vmem:[#allocation7 + $0x98] sm:$0xff] }
 0x9bb   :  { %1977 = vmatpush.bf16.msrb.mxu2 %v5018_v3  ;;  %v5023_v56 = vld [vmem:[#allocation10 + $0x90] sm:$0xff]  ;;  %v5040_v29 = vld [vmem:[#allocation7 + $0xf8] sm:$0xff]  ;;  %v5224_v3 = vld [vmem:[%s6301_s26] ss:$0 sm:$0xff] }
 0x9bc   :  { %v1567_v25 = vmul.f32 %v5271_v37, %v1563_v23  ;;  %v1594_v8 = vmul.f32 %v1590_v38, %v1514_v24  ;;  %v1515_v37 = vsel %vm1511_vm6, 1.0, %v5658_v17  ;;  %v1597_v39 = vadd.f32 1.0, %v1593_v30  ;;  %2061 = vmatpush.bf16.msrb.mxu3 %v5026_v55  ;;  %v5014_v23 = vld [vmem:[#allocation8 + $0x88] sm:$0xff]  ;;  %v5009_v24 = vld [vmem:[#allocation7 + $0xa0] sm:$0xff]  ;;  %v5007_v30 = vld [vmem:[#allocation7 + $0x90] sm:$0xff] }
 0x9bd   :  { %1892 = vmatpush.bf16.msra.mxu0 %v5011_v19  ;;  %v5022_v38 = vld [vmem:[#allocation10 + $0x88] sm:$0xff]  ;;  %v5225_v19 = vld [vmem:[%s6293_s29 + $0x2] ss:$0 sm:$0xff] }
 0x9be   :  { %v1587_v31 = vmul.f32 %v5279_v26, %v1567_v25  ;;  %v1598_v49 = vadd.f32 1.0, %v1594_v8  ;;  %v1601_v44 = vmul.f32 %v1597_v39, %v1501_v42  ;;  %v5013_v25 = vld [vmem:[#allocation8 + $0x80] sm:$0xff]  ;;  %v5048_v8 = vld [vmem:[#allocation8 + $0xf8] sm:$0xff] }
 0x9bf   :  { %1978 = vmatpush.bf16.msrb.mxu2 %v5017_v13  ;;  %v5021_v26 = vld [vmem:[#allocation10 + $0x80] sm:$0xff]  ;;  %v5036_v42 = vld [vmem:[#allocation7 + $0xd8] sm:$0xff] }
 0x9c0   :  { %v1591_v33 = vsub.f32 1.0, %v1587_v31  ;;  %v1602_v34 = vmul.f32 %v1598_v49, %v1502_v32  ;;  %2062 = vmatpush.bf16.msrb.mxu3 %v5025_v14  ;;  %v5039_v31 = vld [vmem:[#allocation7 + $0xf0] sm:$0xff]  ;;  %v5006_v32 = vld [vmem:[#allocation7 + $0x88] sm:$0xff]  ;;  %v5037_v39 = vld [vmem:[#allocation7 + $0xe0] sm:$0xff] }
 0x9c1   :  { %1893 = vmatpush.bf16.msra.mxu0 %v5010_v16  ;;  %v5038_v49 = vld [vmem:[#allocation7 + $0xe8] sm:$0xff] }
 0x9c2   :  { %v1595_v40 = vmul.f32 %v1591_v33, %v1515_v37  ;;  %v1604_v41 = vpack.c.bf16 %v1602_v34, %v1600_v11  ;;  %v5046_v33 = vld [vmem:[#allocation8 + $0xe8] sm:$0xff]  ;;  %v5005_v37 = vld [vmem:[#allocation7 + $0x80] sm:$0xff] }
 0x9c3   :  { %1979 = vmatpush.bf16.msrb.mxu2 %v5016_v15 }
 0x9c4   :  { %v1599_v4 = vadd.f32 1.0, %v1595_v40  ;;  %1746 = vmatmul.bf16.vlgmr.msra.gmra.mxu3 %v1604_v41  ;;  %v5045_v40 = vld [vmem:[#allocation8 + $0xe0] sm:$0xff] }
 0x9c5   :  { %2063 = vmatpush.bf16.msrb.mxu3 %v5024_v18  ;;  %1894 = vmatpush.bf16.msra.mxu0 %v5009_v24 }
 0x9c6   :  { %v1603_v36 = vmul.f32 %v1599_v4, %v1503_v43  ;;  %v5044_v43 = vld [vmem:[#allocation8 + $0xd8] sm:$0xff] }
 0x9c7   :  { %1980 = vmatpush.bf16.msrb.mxu2 %v5015_v21 }
 0x9c8   :  { %v1605_v46 = vpack.c.bf16 %v1603_v36, %v1601_v44  ;;  %v5035_v36 = vld [vmem:[#allocation7 + $0xd0] sm:$0xff] }
 0x9c9   :  { %2064 = vmatpush.bf16.msrb.mxu3 %v5023_v56  ;;  %1895 = vmatpush.bf16.msra.mxu0 %v5008_v22 }
 0x9ca   :  { %1760 = vmatmul.bf16.vlgmr.msrb.gmra.mxu1 %v1605_v46  ;;  %v5043_v46 = vld [vmem:[#allocation8 + $0xd0] sm:$0xff] }
 0x9cb   :  { %1981 = vmatpush.bf16.msrb.mxu2 %v5014_v23 }
 0x9cd   :  { %2065 = vmatpush.bf16.msrb.mxu3 %v5022_v38  ;;  %1896 = vmatpush.bf16.msra.mxu0 %v5007_v30  ;;  %v5227_v38 = vld [vmem:[%s6291_s5 + $0x2] ss:$0 sm:$0xff] }
 0x9cf   :  { %1982 = vmatpush.bf16.msrb.mxu2 %v5013_v25 }
 0x9d1   :  { %2066 = vmatpush.bf16.msrb.mxu3 %v5021_v26  ;;  %1897 = vmatpush.bf16.msra.mxu0 %v5006_v32 }
 0x9d3   :  { %2273 = vmatpush.bf16.msra.mxu2 %v5040_v29 }
 0x9d5   :  { %2357 = vmatpush.bf16.msra.mxu3 %v5048_v8  ;;  %1898 = vmatpush.bf16.msra.mxu0 %v5005_v37 }
 0x9d7   :  { %2274 = vmatpush.bf16.msra.mxu2 %v5039_v31  ;;  %v5229_v31 = vld [vmem:[%s6292_s9 + $0x3] ss:$0 sm:$0xff] }
 0x9d9   :  { %2358 = vmatpush.bf16.msra.mxu3 %v5047_v53 }
 0x9db   :  { %2275 = vmatpush.bf16.msra.mxu2 %v5038_v49 }
 0x9dd   :  { %2359 = vmatpush.bf16.msra.mxu3 %v5046_v33 }
 0x9df   :  { %2276 = vmatpush.bf16.msra.mxu2 %v5037_v39 }
 0x9e1   :  { %2360 = vmatpush.bf16.msra.mxu3 %v5045_v40  ;;  %v5056_v40 = vld [vmem:[#allocation10 + $0xf8] sm:$0xff] }
 0x9e3   :  { %2277 = vmatpush.bf16.msra.mxu2 %v5036_v42  ;;  %v5054_v42 = vld [vmem:[#allocation10 + $0xe8] sm:$0xff] }
 0x9e5   :  { %2361 = vmatpush.bf16.msra.mxu3 %v5044_v43  ;;  %v5053_v43 = vld [vmem:[#allocation10 + $0xe0] sm:$0xff] }
 0x9e7   :  { %2278 = vmatpush.bf16.msra.mxu2 %v5035_v36 }
 0x9e9   :  { %2362 = vmatpush.bf16.msra.mxu3 %v5043_v46 }
 0xa47   :  { %v1747_v47 = vpop.f32.mrf.mxu3  ;;  %v1761_v48 = vpop.f32.mrf.mxu1 }
 0xa48   :  { %v1748_v51 = vadd.f32 %v5222_v50, %v1747_v47 }
 0xa4a   :  { %v1762_v52 = vadd.f32 %v1761_v48, %v1748_v51  ;;  %v5034_v51 = vld [vmem:[#allocation7 + $0xc8] sm:$0xff] }
 0xa4b   :  { %2279 = vmatpush.bf16.msra.mxu2 %v5034_v51 }
 0xa4c   :  { %v1766_v57 = vadd.f32 %v1762_v52, %v5994_v27  ;;  %v5042_v52 = vld [vmem:[#allocation8 + $0xc8] sm:$0xff] }
 0xa4d   :  { %2363 = vmatpush.bf16.msra.mxu3 %v5042_v52 }
 0xa4e   :  { %1770 = vadd.xlane.f32.xlu0 %v1766_v57 }
 0xa4f   :  { %v1749_v58 = vpop.f32.mrf.mxu3  ;;  %v1763_v62 = vpop.f32.mrf.mxu1 }
 0xa50   :  { %v1750_v61 = vadd.f32 %v5222_v50, %v1749_v58 }
 0xa52   :  { %v1764_v45 = vadd.f32 %v1763_v62, %v1750_v61  ;;  %v5033_v61 = vld [vmem:[#allocation7 + $0xc0] sm:$0xff] }
 0xa53   :  { %v5041_v62 = vld [vmem:[#allocation8 + $0xc0] sm:$0xff]  ;;  %2280 = vmatpush.bf16.msra.mxu2 %v5033_v61  ;;  %v5051_v61 = vld [vmem:[#allocation10 + $0xd0] sm:$0xff] }
 0xa54   :  { %v1767_v0 = vadd.f32 %v1764_v45, %v5996_v28  ;;  %2364 = vmatpush.bf16.msra.mxu3 %v5041_v62  ;;  %v5050_v62 = vld [vmem:[#allocation10 + $0xc8] sm:$0xff] }
 0xa56   :  { %1772 = vadd.xlane.f32.xlu1 %v1767_v0 }
 0xac1   :  { %v1771_v5 = vpop.xlane.xlu0 %1770 }
 0xac2   :  { %v1774_v6 = vmul.f32 %v1771_v5, %v5905_v59 }
 0xac4   :  { %v6041_v27 = vsub.f32 %v1766_v57, %v1774_v6 }
 0xac6   :  { %v1778_v7 = vmul.f32 %v6041_v27, %v6041_v27 }
 0xac8   :  { %1780 = vadd.xlane.f32.xlu2 %v1778_v7  ;;  %v5223_v7 = vld [vmem:[%s6300_s1] ss:$0 sm:$0xff] }
 0xac9   :  { %v1773_v9 = vpop.xlane.xlu1 %1772 }
 0xaca   :  { %v1775_v28 = vmul.f32 %v1773_v9, %v5905_v59 }
 0xacc   :  { %v6046_v54 = vsub.f32 %v1767_v0, %v1775_v28 }
 0xace   :  { %v1779_v12 = vmul.f32 %v6046_v54, %v6046_v54 }
 0xad0   :  { %1782 = vadd.xlane.f32.xlu0 %v1779_v12 }
 0xb3b   :  { %v1781_v11 = vpop.xlane.xlu2 %1780 }
 0xb3c   :  { %v1784_v34 = vmul.f32 %v1781_v11, %v5905_v59 }
 0xb3e   :  { %v1786_v41 = vadd.f32 1e-05, %v1784_v34 }
 0xb40   :  { %5280 = vrsqrt.f32 %v1786_v41  ;;  %vm1794_vm8 = vweird.f32 %v1786_v41 }
 0xb43   :  { %v1783_v4 = vpop.xlane.xlu0 %1782 }
 0xb44   :  { %v1785_v44 = vmul.f32 %v1783_v4, %v5905_v59 }
 0xb46   :  { %v5281_v50 = vpop.eup %5280  ;;  %v1787_v47 = vadd.f32 1e-05, %v1785_v44 }
 0xb47   :  { %v1789_v48 = vmul.f32 %v5281_v50, %v1786_v41  ;;  %vm1795_vm7 = vweird.f32 %v5281_v50  ;;  %v5055_v41 = vld [vmem:[#allocation10 + $0xf0] sm:$0xff] }
 0xb48   :  { %5282 = vrsqrt.f32 %v1787_v47  ;;  %vm1796_vm9 = vmor %vm1794_vm8, %vm1795_vm7  ;;  %vm1804_vm13 = vweird.f32 %v1787_v47  ;;  %vm3211_vm7 = vcmask 57344  }
 0xb49   :  { %v1790_v57 = vmul.f32 %v5281_v50, %v1789_v48 }
 0xb4b   :  { %v1791_v58 = vmul.f32 0.5, %v1790_v57 }
 0xb4d   :  { %v1792_v45 = vsub.f32 1.5, %v1791_v58  ;;  %v5052_v58 = vld [vmem:[#allocation10 + $0xd8] sm:$0xff] }
 0xb4e   :  { %v5283_v0 = vpop.eup %5282 }
 0xb4f   :  { %v1793_v63 = vmul.f32 %v5281_v50, %v1792_v45  ;;  %v1799_v1 = vmul.f32 %v5283_v0, %v1787_v47  ;;  %vm1805_vm10 = vweird.f32 %v5283_v0  ;;  %v5049_v45 = vld [vmem:[#allocation10 + $0xc0] sm:$0xff] }
 0xb50   :  { %vm1806_vm14 = vmor %vm1804_vm13, %vm1805_vm10 }
 0xb51   :  { %v1800_v60 = vmul.f32 %v5283_v0, %v1799_v1  ;;  %v1797_v2 = vsel %vm1796_vm9, %v5281_v50, %v1793_v63  ;;  %v5032_v63 = vld [vmem:[#allocation11 + $0x58] sm:$0xff] }
 0xb52   :  { %v1808_v9 = vmul.f32 %v1797_v2, %v6041_v27  ;;  %v5226_v27 = vld [vmem:[%s6292_s9 + $0x2] ss:$0 sm:$0xff] }
 0xb53   :  { %v1801_v5 = vmul.f32 0.5, %v1800_v60 }
 0xb54   :  { %v1813_v55 = vmul.f32 %v5223_v7, %v1808_v9 }
 0xb55   :  { %v1802_v6 = vsub.f32 1.5, %v1801_v5 }
 0xb56   :  { %v6056_v10 = vadd.f32 %v5224_v3, %v1813_v55 }
 0xb57   :  { %v1803_v28 = vmul.f32 %v5283_v0, %v1802_v6 }
 0xb59   :  { %v1807_v12 = vsel %vm1806_vm14, %v5283_v0, %v1803_v28 }
 0xb5a   :  { %v1809_v13 = vmul.f32 %v1807_v12, %v6046_v54  ;;  %v5228_v12 = vld [vmem:[%s6293_s29 + $0x3] ss:$0 sm:$0xff] }
 0xb5c   :  { %v1814_v14 = vmul.f32 %v5223_v7, %v1809_v13 }
 0xb5e   :  { %v6058_v15 = vadd.f32 %v5224_v3, %v1814_v14  ;;  %v5031_v14 = vld [vmem:[#allocation11 + $0x50] sm:$0xff] }
 0xb60   :  { %v6062_v18 = vpack.c.bf16 %v6058_v15, %v6056_v10 }
 0xb62   :  { %1899 = vmatmul.bf16.vlgmr.msra.gmra.mxu0 %v6062_v18  ;;  %1983 = vmatmul.bf16.vlgmr.msrb.gmra.mxu2 %v6062_v18 }
 0xb63   :  { %2067 = vmatmul.bf16.vlgmr.msrb.gmra.mxu3 %v6062_v18 }
 0xb64   :  { %2657 = vmatpush.bf16.msrb.mxu3 %v5032_v63 }
 0xb68   :  { %2658 = vmatpush.bf16.msrb.mxu3 %v5031_v14 }
 0xb72   :  { %2281 = vmatmul.bf16.vlgmr.msra.gmra.mxu2 %v6062_v18 }
 0xb73   :  { %2365 = vmatmul.bf16.vlgmr.msra.gmra.mxu3 %v6062_v18 }
 0xbdf   :  { %v1900_v54 = vpop.f32.mrf.mxu0 }
 0xbe0   :  { %v1901_v23 = vadd.f32 %v5225_v19, %v1900_v54  ;;  %v5029_v54 = vld [vmem:[#allocation11 + $0x40] sm:$0xff] }
 0xbe5   :  { %v1984_v21 = vpop.f32.mrf.mxu2 }
 0xbe6   :  { %v1985_v56 = vadd.f32 %v5226_v27, %v1984_v21  ;;  %v2068_v16 = vpop.f32.mrf.mxu3 }
 0xbe7   :  { %v1902_v25 = vpop.f32.mrf.mxu0  ;;  %v2069_v29 = vadd.f32 %v5227_v38, %v2068_v16 }
 0xbe8   :  { %4381 = vmatpush.xpose.msk.msra.mxu1 %vm714_vm11, %v1985_v56  ;;  %v1903_v30 = vadd.f32 %v5225_v19, %v1902_v25 }
 0xbeb   :  { %4382 = vmatmul.msk.f32.vlgmr.msra.gmra.mxu1 %vm714_vm11, %v1901_v23 }
 0xbed   :  { %v1986_v24 = vpop.f32.mrf.mxu2 }
 0xbee   :  { %v1987_v26 = vadd.f32 %v5226_v27, %v1986_v24  ;;  %v2070_v22 = vpop.f32.mrf.mxu3  ;;  %v5030_v27 = vld [vmem:[#allocation11 + $0x48] sm:$0xff] }
 0xbef   :  { %v2071_v8 = vadd.f32 %v5227_v38, %v2070_v22  ;;  %2659 = vmatpush.bf16.msrb.mxu3 %v5030_v27  ;;  %v4590_v27 = vld [vmem:[#allocation13 + $0xf8] sm:$0xf0] }
 0xbf0   :  { %4383 = vmatpush.xpose.msk.msrb.mxu1 %vm714_vm11, %v1987_v26 }
 0xbf1   :  { %2188 = vmatpush.msrb.mxu0 %v2071_v8 }
 0xbf3   :  { %4384 = vmatmul.msk.f32.vlgmr.msrb.gmra.mxu1 %vm714_vm11, %v1903_v30  ;;  %2660 = vmatpush.bf16.msrb.mxu3 %v5029_v54 }
 0xbf4   :  { %2165 = vmatpush.msra.mxu1 %v2069_v29 }
 0xbf5   :  { %v2282_v28 = vpop.f32.mrf.mxu2 }
 0xbf6   :  { %v2366_v53 = vpop.f32.mrf.mxu3  ;;  %2441 = vmatpush.bf16.msrb.mxu1 %v5056_v40  ;;  %v2283_v3 = vadd.f32 %v5228_v12, %v2282_v28 }
 0xbf7   :  { %v2367_v32 = vadd.f32 %v5229_v31, %v2366_v53 }
 0xbf9   :  { %4486 = vmatpush.xpose.msk.msra.mxu0 %vm714_vm11, %v2367_v32 }
 0xbfa   :  { %2442 = vmatpush.bf16.msrb.mxu1 %v5055_v41 }
 0xbfd   :  { %v2284_v55 = vpop.f32.mrf.mxu2 }
 0xbfe   :  { %2443 = vmatpush.bf16.msrb.mxu1 %v5054_v42  ;;  %v2368_v5 = vpop.f32.mrf.mxu3  ;;  %v2285_v13 = vadd.f32 %v5228_v12, %v2284_v55  ;;  %v5076_v55 = vld [vmem:[#allocation13 + $0xf4] sm:$0xf0] }
 0xbff   :  { %v2369_v9 = vadd.f32 %v5229_v31, %v2368_v5 }
 0xc02   :  { %2444 = vmatpush.bf16.msrb.mxu1 %v5053_v43 }
 0xc06   :  { %2445 = vmatpush.bf16.msrb.mxu1 %v5052_v58 }
 0xc0a   :  { %2446 = vmatpush.bf16.msrb.mxu1 %v5051_v61 }
 0xc0e   :  { %2447 = vmatpush.bf16.msrb.mxu1 %v5050_v62 }
 0xc12   :  { %2448 = vmatpush.bf16.msrb.mxu1 %v5049_v45 }
 0xc68   :  { %v2096_v49 = vpop.f32.mrf.mxu1 }
 0xc69   :  { %v2097_v33 = vadd.f32 %v2096_v49, %v5943_v20 }
 0xc6b   :  { %v2125_v11 = vsel %vm767_vm12, %v2097_v33, -inf }
 0xc6c   :  { %2126 = vmax.xlane.f32.xlu0 %v2125_v11 }
 0xc70   :  { %v2122_v34 = vpop.f32.mrf.mxu1 }
 0xc71   :  { %v2123_v37 = vadd.f32 %v2122_v34, %v5948_v35 }
 0xc73   :  { %v2128_v39 = vsel %vm767_vm12, %v2123_v37, -inf }
 0xc74   :  { %2129 = vmax.xlane.f32.xlu1 %v2128_v39 }
 0xcdf   :  { %v2127_v4 = vpop.xlane.xlu0 %2126 }
 0xce0   :  { %v2131_v44 = vsub.f32 %v2097_v33, %v2127_v4 }
 0xce2   :  { %v2133_v36 = vmul.f32 1.442695, %v2131_v44 }
 0xce4   :  { %5284 = vpow2.f32 %v2133_v36  ;;  %v5059_v36 = vld [vmem:[#allocation11 + $0x70] sm:$0xff] }
 0xce7   :  { %v2130_v46 = vpop.xlane.xlu1 %2129 }
 0xce8   :  { %v2132_v50 = vsub.f32 %v2123_v37, %v2130_v46  ;;  %v5058_v46 = vld [vmem:[#allocation11 + $0x68] sm:$0xff] }
 0xcea   :  { %v5285_v47 = vpop.eup %5284  ;;  %v2135_v48 = vmul.f32 1.442695, %v2132_v50  ;;  %v5057_v50 = vld [vmem:[#allocation11 + $0x60] sm:$0xff] }
 0xceb   :  { %v2137_v51 = vsel %vm767_vm12, %v5285_v47, 0.0 }
 0xcec   :  { %5286 = vpow2.f32 %v2135_v48  ;;  %2138 = vadd.xlane.f32.xlu1 %v2137_v51 }
 0xcf2   :  { %v5287_v52 = vpop.eup %5286 }
 0xcf3   :  { %v2140_v57 = vsel %vm767_vm12, %v5287_v52, 0.0 }
 0xcf4   :  { %2141 = vadd.xlane.f32.xlu2 %v2140_v57  ;;  %v5231_v57 = vld [vmem:[%s6295_s8 + $0x1] ss:$0 sm:$0xff] }
 0xd5f   :  { %v2139_v0 = vpop.xlane.xlu1 %2138 }
 0xd60   :  { %5288 = vrcp.f32 %v2139_v0 }
 0xd66   :  { %v5289_v1 = vpop.eup %5288 }
 0xd67   :  { %v2145_v60 = vmul.f32 %v5289_v1, %v5285_v47  ;;  %v2142_v2 = vpop.xlane.xlu2 %2141 }
 0xd68   :  { %5290 = vrcp.f32 %v2142_v2 }
 0xd69   :  { %4385 = vmatmul.msk.f32.vlgmr.msra.gmra.mxu1 %vm767_vm12, %v2145_v60 }
 0xd6e   :  { %v5291_v6 = vpop.eup %5290 }
 0xd6f   :  { %v2146_v7 = vmul.f32 %v5291_v6, %v5287_v52 }
 0xd71   :  { %4386 = vmatmul.msk.f32.vlgmr.msrb.gmra.mxu0 %vm767_vm12, %v2146_v7  ;;  %2449 = vmatmul.bf16.vlgmr.msrb.gmra.mxu1 %v6062_v18  ;;  %v5230_v18 = vld [vmem:[%s6291_s5 + $0x3] ss:$0 sm:$0xff] }
 0xd72   :  { %4488 = vmatpush.xpose.msk.msrb.mxu0 %vm714_vm11, %v2369_v9 }
 0xd79   :  { %4487 = vmatmul.msk.f32.vlgmr.msra.gmra.mxu0 %vm714_vm11, %v2283_v3 }
 0xd81   :  { %4489 = vmatmul.msk.f32.vlgmr.msrb.gmra.mxu0 %vm714_vm11, %v2285_v13  ;;  %v5075_v13 = vld [vmem:[#allocation13 + $0xf4] sm:$0xf] }
 0xd82   :  { %v4593_v54 = vor.u32 %v5075_v13, %v4590_v27 }
 0xde6   :  { %v2167_v19 = vpop.f32.mrf.mxu1 }
 0xdee   :  { %v2190_v21 = vpop.f32.mrf.mxu0  ;;  %v2450_v56 = vpop.f32.mrf.mxu1 }
 0xdef   :  { %v2193_v16 = vpack.c.bf16 %v2190_v21, %v2167_v19  ;;  %v2451_v23 = vadd.f32 %v5230_v18, %v2450_v56  ;;  %v4580_v19 = vld [vmem:[#allocation13 + $0xe0] sm:$0xf]  ;;  %v5073_v21 = vld [vmem:[#allocation13 + $0xe4] sm:$0xf] }
 0xdf1   :  { %2547 = vmatpush.msra.mxu0 %v2451_v23  ;;  %4525 = vmatmul.msk.bf16.vlgmr.msrb.gmra.mxu3 %vm714_vm11, %v2193_v16  ;;  %v4582_v16 = vld [vmem:[#allocation13 + $0xe8] sm:$0xf0] }
 0xdf2   :  { %v4585_v23 = vor.u32 %v5073_v21, %v4582_v16 }
 0xdf6   :  { %v2452_v38 = vpop.f32.mrf.mxu1  ;;  %v2478_v24 = vpop.f32.mrf.mxu0 }
 0xdf7   :  { %v2453_v25 = vadd.f32 %v5230_v18, %v2452_v38  ;;  %v2479_v26 = vadd.f32 %v2478_v24, %v5943_v20  ;;  %v5074_v18 = vld [vmem:[#allocation13 + $0xe4] sm:$0xf0]  ;;  %v4572_v38 = vld [vmem:[#allocation13 + $0xd0] sm:$0xf]  ;;  %v5072_v24 = vld [vmem:[#allocation13 + $0xd4] sm:$0xf0] }
 0xdf8   :  { %v4581_v56 = vor.u32 %v5074_v18, %v4580_v19  ;;  %v5232_v18 = vld [vmem:[%s6296_s19 + $0x1] ss:$0 sm:$0xff] }
 0xdf9   :  { %2570 = vmatpush.msrb.mxu0 %v2453_v25  ;;  %v2507_v22 = vsel %vm767_vm12, %v2479_v26, -inf  ;;  %v5071_v25 = vld [vmem:[#allocation13 + $0xd4] sm:$0xf] }
 0xdfa   :  { %2508 = vmax.xlane.f32.xlu2 %v2507_v22  ;;  %v4574_v22 = vld [vmem:[#allocation13 + $0xd8] sm:$0xf0] }
 0xdfe   :  { %v2504_v29 = vpop.f32.mrf.mxu0 }
 0xdff   :  { %v2505_v8 = vadd.f32 %v2504_v29, %v5948_v35  ;;  %v5060_v35 = vld [vmem:[#allocation11 + $0x78] sm:$0xff]  ;;  %v4577_v29 = vor.u32 %v5071_v25, %v4574_v22 }
 0xe00   :  { %2616 = vmatpush.bf16.msrb.mxu2 %v5060_v35  ;;  %v4548_v35 = vld [vmem:[#allocation13 + $0xa0] sm:$0xf] }
 0xe01   :  { %v2510_v30 = vsel %vm767_vm12, %v2505_v8, -inf }
 0xe02   :  { %2511 = vmax.xlane.f32.xlu0 %v2510_v30  ;;  %v5070_v30 = vld [vmem:[#allocation13 + $0xc4] sm:$0xf0] }
 0xe04   :  { %2617 = vmatpush.bf16.msrb.mxu2 %v5059_v36  ;;  %v5064_v36 = vld [vmem:[#allocation13 + $0x94] sm:$0xf0] }
 0xe08   :  { %2618 = vmatpush.bf16.msrb.mxu2 %v5058_v46  ;;  %v5063_v46 = vld [vmem:[#allocation13 + $0x94] sm:$0xf] }
 0xe0c   :  { %2619 = vmatpush.bf16.msrb.mxu2 %v5057_v50 }
 0xe6d   :  { %v2509_v31 = vpop.xlane.xlu2 %2508 }
 0xe6e   :  { %v2513_v53 = vsub.f32 %v2479_v26, %v2509_v31  ;;  %v4573_v26 = vor.u32 %v5072_v24, %v4572_v38  ;;  %v5069_v31 = vld [vmem:[#allocation13 + $0xc4] sm:$0xf]  ;;  %v5233_v38 = vld [vmem:[%s6297_s30 + $0x1] ss:$0 sm:$0xff] }
 0xe70   :  { %v2515_v32 = vmul.f32 1.442695, %v2513_v53 }
 0xe72   :  { %5292 = vpow2.f32 %v2515_v32  ;;  %v4566_v32 = vld [vmem:[#allocation13 + $0xc8] sm:$0xf0] }
 0xe74   :  { %v2662_v52 = vpop.f32.mrf.mxu3 }
 0xe75   :  { %v2512_v49 = vpop.xlane.xlu0 %2511 }
 0xe76   :  { %v2514_v33 = vsub.f32 %v2505_v8, %v2512_v49  ;;  %v4564_v8 = vld [vmem:[#allocation13 + $0xc0] sm:$0xf]  ;;  %v4569_v49 = vor.u32 %v5069_v31, %v4566_v32 }
 0xe77   :  { %v4565_v53 = vor.u32 %v5070_v30, %v4564_v8  ;;  %v4529_v8 = vld [vmem:[%s6298_s15 + $0x2] sm:$0x3] }
 0xe78   :  { %v5293_v11 = vpop.eup %5292  ;;  %v2517_v34 = vmul.f32 1.442695, %v2514_v33  ;;  %v4556_v33 = vld [vmem:[#allocation13 + $0xb0] sm:$0xf]  ;;  %v2751_v30 = vperm.slane %v4529_v8, 0  ;;  %v2752_v31 = vperm.slane %v4529_v8, 1 }
 0xe79   :  { %v2519_v20 = vsel %vm767_vm12, %v5293_v11, 0.0 }
 0xe7a   :  { %5294 = vpow2.f32 %v2517_v34  ;;  %2520 = vadd.xlane.f32.xlu1 %v2519_v20  ;;  %v5067_v34 = vld [vmem:[#allocation13 + $0xb4] sm:$0xf] }
 0xe7c   :  { %v2664_v0 = vpop.f32.mrf.mxu3 }
 0xe80   :  { %v5295_v37 = vpop.eup %5294 }
 0xe81   :  { %v2522_v39 = vsel %vm767_vm12, %v5295_v37, 0.0 }
 0xe82   :  { %2523 = vadd.xlane.f32.xlu2 %v2522_v39 }
 0xeed   :  { %v2521_v40 = vpop.xlane.xlu1 %2520 }
 0xeee   :  { %5296 = vrcp.f32 %v2521_v40  ;;  %v5066_v40 = vld [vmem:[#allocation13 + $0xa4] sm:$0xf0] }
 0xef4   :  { %v5297_v41 = vpop.eup %5296 }
 0xef5   :  { %v2527_v42 = vmul.f32 %v5297_v41, %v5293_v11  ;;  %v2524_v43 = vpop.xlane.xlu2 %2523  ;;  %v5068_v11 = vld [vmem:[#allocation13 + $0xb4] sm:$0xf0]  ;;  %v5065_v41 = vld [vmem:[#allocation13 + $0xa4] sm:$0xf] }
 0xef6   :  { %5298 = vrcp.f32 %v2524_v43  ;;  %v4557_v20 = vor.u32 %v5068_v11, %v4556_v33  ;;  %v4550_v43 = vld [vmem:[#allocation13 + $0xa8] sm:$0xf0] }
 0xef7   :  { %4490 = vmatmul.msk.f32.vlgmr.msra.gmra.mxu0 %vm767_vm12, %v2527_v42  ;;  %v4549_v42 = vor.u32 %v5066_v40, %v4548_v35 }
 0xef8   :  { %2849 = vmatpush.bf16.msra.mxu0 %v4593_v54 }
 0xefc   :  { %v5299_v4 = vpop.eup %5298  ;;  %2850 = vmatpush.bf16.msra.mxu0 %v4585_v23 }
 0xefd   :  { %v2528_v44 = vmul.f32 %v5299_v4, %v5295_v37  ;;  %v4558_v37 = vld [vmem:[#allocation13 + $0xb8] sm:$0xf0]  ;;  %v4553_v4 = vor.u32 %v5065_v41, %v4550_v43  ;;  %v5081_v41 = vld [vmem:[#allocation14 + $0xa0] sm:$0xff] }
 0xefe   :  { %v4561_v39 = vor.u32 %v5067_v34, %v4558_v37  ;;  %v5082_v34 = vld [vmem:[#allocation14 + $0xa8] sm:$0xff] }
 0xeff   :  { %4491 = vmatmul.msk.f32.vlgmr.msrb.gmra.mxu0 %vm767_vm12, %v2528_v44  ;;  %v4540_v44 = vld [vmem:[#allocation13 + $0x90] sm:$0xf] }
 0xf00   :  { %2851 = vmatpush.bf16.msra.mxu0 %v4577_v29  ;;  %v4541_v50 = vor.u32 %v5064_v36, %v4540_v44  ;;  %v5092_v29 = vld [vmem:[#allocation14 + $0xf8] sm:$0xff] }
 0xf01   :  { %3117 = vmatpush.bf16.msra.mxu3 %v5092_v29 }
 0xf04   :  { %2852 = vmatpush.bf16.msra.mxu0 %v4569_v49 }
 0xf08   :  { %2853 = vmatpush.bf16.msra.mxu0 %v4561_v39 }
 0xf0c   :  { %2854 = vmatpush.bf16.msra.mxu0 %v4553_v4 }
 0xf74   :  { %v2549_v47 = vpop.f32.mrf.mxu0 }
 0xf7c   :  { %v2572_v48 = vpop.f32.mrf.mxu0 }
 0xf7d   :  { %v2575_v51 = vpack.c.bf16 %v2572_v48, %v2549_v47  ;;  %v4542_v47 = vld [vmem:[#allocation13 + $0x98] sm:$0xf0]  ;;  %v4532_v48 = vld [vmem:[#allocation13 + $0x80] sm:$0xf] }
 0xf7f   :  { %4508 = vmatmul.msk.bf16.vlgmr.msrb.gmra.mxu2 %vm714_vm11, %v2575_v51  ;;  %v5062_v51 = vld [vmem:[#allocation13 + $0x84] sm:$0xf0] }
0x1002   :  { %v2621_v58 = vpop.f32.mrf.mxu2 }
0x1003   :  { %v2663_v61 = vadd.f32 %v2662_v52, %v2621_v58  ;;  %v5061_v58 = vld [vmem:[#allocation13 + $0x84] sm:$0xf] }
0x1005   :  { %v2672_v62 = vadd.f32 %v5231_v57, %v2663_v61  ;;  %v4534_v61 = vld [vmem:[#allocation13 + $0x88] sm:$0xf0] }
0x1007   :  { %v2674_v45 = vadd.f32 %v2672_v62, %v6056_v10 }
0x1009   :  { %2680 = vadd.xlane.f32.xlu0 %v2674_v45 }
0x100a   :  { %v2623_v63 = vpop.f32.mrf.mxu2 }
0x100b   :  { %v2665_v1 = vadd.f32 %v2664_v0, %v2623_v63  ;;  %v4537_v0 = vor.u32 %v5061_v58, %v4534_v61  ;;  %v5079_v61 = vld [vmem:[#allocation14 + $0x90] sm:$0xff] }
0x100d   :  { %v2673_v60 = vadd.f32 %v5231_v57, %v2665_v1  ;;  %v4545_v57 = vor.u32 %v5063_v46, %v4542_v47  ;;  %v5080_v47 = vld [vmem:[#allocation14 + $0x98] sm:$0xff] }
0x100f   :  { %v2675_v2 = vadd.f32 %v2673_v60, %v6058_v15  ;;  %v4588_v15 = vld [vmem:[#allocation13 + $0xf0] sm:$0xf]  ;;  %2855 = vmatpush.bf16.msra.mxu0 %v4545_v57 }
0x1010   :  { %v4589_v14 = vor.u32 %v5076_v55, %v4588_v15 }
0x1011   :  { %2682 = vadd.xlane.f32.xlu1 %v2675_v2 }
0x1012   :  { %2835 = vmatpush.bf16.msra.mxu1 %v4589_v14 }
0x1013   :  { %2856 = vmatpush.bf16.msra.mxu0 %v4537_v0 }
0x1016   :  { %2836 = vmatpush.bf16.msra.mxu1 %v4581_v56 }
0x101a   :  { %2837 = vmatpush.bf16.msra.mxu1 %v4573_v26 }
0x101e   :  { %2838 = vmatpush.bf16.msra.mxu1 %v4565_v53  ;;  %v5091_v53 = vld [vmem:[#allocation14 + $0xf0] sm:$0xff] }
0x101f   :  { %3118 = vmatpush.bf16.msra.mxu3 %v5091_v53 }
0x1022   :  { %2839 = vmatpush.bf16.msra.mxu1 %v4557_v20  ;;  %v5090_v20 = vld [vmem:[#allocation14 + $0xe8] sm:$0xff] }
0x1023   :  { %3119 = vmatpush.bf16.msra.mxu3 %v5090_v20 }
0x1026   :  { %2840 = vmatpush.bf16.msra.mxu1 %v4549_v42  ;;  %v5089_v42 = vld [vmem:[#allocation14 + $0xe0] sm:$0xff] }
0x1027   :  { %3120 = vmatpush.bf16.msra.mxu3 %v5089_v42 }
0x102a   :  { %2841 = vmatpush.bf16.msra.mxu1 %v4541_v50 }
0x107c   :  { %v2681_v5 = vpop.xlane.xlu0 %2680 }
0x107d   :  { %v2684_v6 = vmul.f32 %v2681_v5, %v5905_v59 }
0x107f   :  { %v6106_v7 = vsub.f32 %v2674_v45, %v2684_v6  ;;  %v4533_v45 = vor.u32 %v5062_v51, %v4532_v48  ;;  %v5088_v48 = vld [vmem:[#allocation14 + $0xd8] sm:$0xff] }
0x1080   :  { %3121 = vmatpush.bf16.msra.mxu3 %v5088_v48 }
0x1081   :  { %v2688_v9 = vmul.f32 %v6106_v7, %v6106_v7  ;;  %2842 = vmatpush.bf16.msra.mxu1 %v4533_v45 }
0x1083   :  { %2690 = vadd.xlane.f32.xlu2 %v2688_v9 }
0x1084   :  { %v2683_v28 = vpop.xlane.xlu1 %2682 }
0x1085   :  { %v2685_v10 = vmul.f32 %v2683_v28, %v5905_v59 }
0x1087   :  { %v6111_v12 = vsub.f32 %v2675_v2, %v2685_v10 }
0x1089   :  { %v2689_v3 = vmul.f32 %v6111_v12, %v6111_v12 }
0x108b   :  { %2692 = vadd.xlane.f32.xlu0 %v2689_v3 }
0x10f6   :  { %v2691_v52 = vpop.xlane.xlu2 %2690 }
0x10f7   :  { %v2694_v62 = vmul.f32 %v2691_v52, %v5905_v59 }
0x10f9   :  { %v2696_v63 = vadd.f32 1e-05, %v2694_v62  ;;  %v5087_v62 = vld [vmem:[#allocation14 + $0xd0] sm:$0xff] }
0x10fa   :  { %3122 = vmatpush.bf16.msra.mxu3 %v5087_v62 }
0x10fb   :  { %5300 = vrsqrt.f32 %v2696_v63  ;;  %vm2704_vm12 = vweird.f32 %v2696_v63 }
0x10fe   :  { %v2693_v1 = vpop.xlane.xlu0 %2692 }
0x10ff   :  { %v2695_v60 = vmul.f32 %v2693_v1, %v5905_v59 }
0x1101   :  { %v5301_v2 = vpop.eup %5300  ;;  %v2697_v5 = vadd.f32 1e-05, %v2695_v60 }
0x1102   :  { %v2699_v6 = vmul.f32 %v5301_v2, %v2696_v63  ;;  %vm2705_vm11 = vweird.f32 %v5301_v2 }
0x1103   :  { %5302 = vrsqrt.f32 %v2697_v5  ;;  %vm2706_vm15 = vmor %vm2704_vm12, %vm2705_vm11  ;;  %vm2714_vm1 = vweird.f32 %v2697_v5 }
0x1104   :  { %v2700_v9 = vmul.f32 %v5301_v2, %v2699_v6 }
0x1106   :  { %v2701_v28 = vmul.f32 0.5, %v2700_v9 }
0x1108   :  { %v2702_v10 = vsub.f32 1.5, %v2701_v28 }
0x1109   :  { %v5303_v3 = vpop.eup %5302 }
0x110a   :  { %v2703_v15 = vmul.f32 %v5301_v2, %v2702_v10  ;;  %v2709_v55 = vmul.f32 %v5303_v3, %v2697_v5  ;;  %vm2715_vm0 = vweird.f32 %v5303_v3  ;;  %v5086_v5 = vld [vmem:[#allocation14 + $0xc8] sm:$0xff] }
0x110b   :  { %vm2716_vm2 = vmor %vm2714_vm1, %vm2715_vm0  ;;  %3123 = vmatpush.bf16.msra.mxu3 %v5086_v5 }
0x110c   :  { %v2710_v13 = vmul.f32 %v5303_v3, %v2709_v55  ;;  %v2707_v14 = vsel %vm2706_vm15, %v5301_v2, %v2703_v15  ;;  %v5078_v2 = vld [vmem:[#allocation14 + $0x88] sm:$0xff] }
0x110d   :  { %v2718_v19 = vmul.f32 %v2707_v14, %v6106_v7  ;;  %v5084_v7 = vld [vmem:[#allocation14 + $0xb8] sm:$0xff] }
0x110e   :  { %v2711_v27 = vmul.f32 0.5, %v2710_v13  ;;  %3103 = vmatpush.bf16.msra.mxu2 %v5084_v7 }
0x110f   :  { %v2723_v23 = vmul.f32 %v5232_v18, %v2718_v19 }
0x1110   :  { %v2712_v54 = vsub.f32 1.5, %v2711_v27  ;;  %v5077_v27 = vld [vmem:[#allocation14 + $0x80] sm:$0xff] }
0x1111   :  { %v6121_v25 = vadd.f32 %v5233_v38, %v2723_v23 }
0x1112   :  { %v2713_v21 = vmul.f32 %v5303_v3, %v2712_v54  ;;  %v5085_v54 = vld [vmem:[#allocation14 + $0xc0] sm:$0xff] }
0x1113   :  { %3124 = vmatpush.bf16.msra.mxu3 %v5085_v54 }
0x1114   :  { %v2717_v56 = vsel %vm2716_vm2, %v5303_v3, %v2713_v21 }
0x1115   :  { %v2719_v16 = vmul.f32 %v2717_v56, %v6111_v12  ;;  %v5083_v12 = vld [vmem:[#allocation14 + $0xb0] sm:$0xff] }
0x1116   :  { %3104 = vmatpush.bf16.msra.mxu2 %v5083_v12 }
0x1117   :  { %v2724_v24 = vmul.f32 %v5232_v18, %v2719_v16 }
0x1119   :  { %v6123_v26 = vadd.f32 %v5233_v38, %v2724_v24 }
0x111a   :  { %3105 = vmatpush.bf16.msra.mxu2 %v5082_v34 }
0x111b   :  { %v2730_v22 = vpack.c.bf16 %v6123_v26, %v6121_v25 }
0x111d   :  { %2843 = vmatmul.bf16.vlgmr.msra.gmra.mxu1 %v2730_v22  ;;  %2857 = vmatmul.bf16.vlgmr.msra.gmra.mxu0 %v2730_v22 }
0x111e   :  { %3106 = vmatpush.bf16.msra.mxu2 %v5081_v41 }
0x1122   :  { %3107 = vmatpush.bf16.msra.mxu2 %v5080_v47 }
0x1126   :  { %3108 = vmatpush.bf16.msra.mxu2 %v5079_v61 }
0x112a   :  { %3109 = vmatpush.bf16.msra.mxu2 %v5078_v2 }
0x112e   :  { %3110 = vmatpush.bf16.msra.mxu2 %v5077_v27 }
0x119a   :  { %v2844_v32 = vpop.f32.mrf.mxu1  ;;  %v2858_v49 = vpop.f32.mrf.mxu0 }
0x119b   :  { %v6128_v33 = vadd.f32 %v2844_v32, %v2751_v30  ;;  %v6130_v11 = vadd.f32 %v2858_v49, %v2752_v31 }
0x119d   :  { %v6133_v37 = vmul.f32 0.70710677, %v6128_v33  ;;  %v6136_v39 = vmul.f32 0.70710677, %v6130_v11 }
0x119f   :  { %v2879_v35 = vand.u32 2147483647, %v6133_v37  ;;  %v2880_v40 = vand.u32 2147483647, %v6136_v39  ;;  %vm2871_vm3 = vcmp.ge.f32.partialorder %v6133_v37, 0.0  ;;  %vm2872_vm4 = vcmp.ge.f32.partialorder %v6136_v39, 0.0 }
0x11a0   :  { %v2875_v27 = vsel %vm2871_vm3, 1.0, %v5658_v17 }
0x11a1   :  { %v2883_v43 = vmul.f32 0.3275911, %v2879_v35  ;;  %v2884_v4 = vmul.f32 0.3275911, %v2880_v40  ;;  %v2931_v28 = vsub.f32 0.0, %v2879_v35  ;;  %v2932_v15 = vsub.f32 0.0, %v2880_v40 }
0x11a2   :  { %v2846_v44 = vpop.f32.mrf.mxu1  ;;  %v2860_v36 = vpop.f32.mrf.mxu0 }
0x11a3   :  { %v2887_v46 = vadd.f32 1.0, %v2883_v43  ;;  %v2888_v50 = vadd.f32 1.0, %v2884_v4  ;;  %v6140_v51 = vadd.f32 %v2846_v44, %v2751_v30  ;;  %v6142_v52 = vadd.f32 %v2860_v36, %v2752_v31 }
0x11a4   :  { %v2935_v18 = vmul.f32 %v2931_v28, %v2879_v35  ;;  %v2936_v56 = vmul.f32 %v2932_v15, %v2880_v40 }
0x11a5   :  { %5304 = vrcp.f32 %v2887_v46  ;;  %v6145_v57 = vmul.f32 0.70710677, %v6140_v51  ;;  %v6148_v58 = vmul.f32 0.70710677, %v6142_v52 }
0x11a6   :  { %5306 = vrcp.f32 %v2888_v50  ;;  %v2939_v22 = vmul.f32 1.442695, %v2935_v18  ;;  %v2941_v30 = vmul.f32 1.442695, %v2936_v56 }
0x11a7   :  { %v2881_v45 = vand.u32 2147483647, %v6145_v57  ;;  %v2882_v0 = vand.u32 2147483647, %v6148_v58  ;;  %vm2873_vm5 = vcmp.ge.f32.partialorder %v6145_v57, 0.0  ;;  %vm2874_vm6 = vcmp.ge.f32.partialorder %v6148_v58, 0.0 }
0x11a8   :  { %v2877_v39 = vsel %vm2873_vm5, 1.0, %v5658_v17  ;;  %v2865_v57 = vmul.f32 0.5, %v6140_v51  ;;  %v2866_v58 = vmul.f32 0.5, %v6142_v52 }
0x11a9   :  { %v2885_v63 = vmul.f32 0.3275911, %v2881_v45  ;;  %v2886_v60 = vmul.f32 0.3275911, %v2882_v0  ;;  %v2933_v7 = vsub.f32 0.0, %v2881_v45  ;;  %v2934_v12 = vsub.f32 0.0, %v2882_v0 }
0x11ab   :  { %v5305_v1 = vpop.eup %5304  ;;  %v2889_v10 = vadd.f32 1.0, %v2885_v63  ;;  %v2890_v55 = vadd.f32 1.0, %v2886_v60  ;;  %v2937_v35 = vmul.f32 %v2933_v7, %v2881_v45  ;;  %v2938_v43 = vmul.f32 %v2934_v12, %v2882_v0 }
0x11ac   :  { %v5307_v6 = vpop.eup %5306  ;;  %v2895_v9 = vmul.f32 1.0614054, %v5305_v1  ;;  %v2878_v7 = vsel %vm2874_vm6, 1.0, %v5658_v17  ;;  %v2864_v12 = vmul.f32 0.5, %v6130_v11  ;;  %vm3300_vm6 = vcmask 1041409  }
0x11ad   :  { %v2896_v3 = vmul.f32 1.0614054, %v5307_v6  ;;  %5308 = vrcp.f32 %v2889_v10  ;;  %v2943_v47 = vmul.f32 1.442695, %v2937_v35  ;;  %v2945_v63 = vmul.f32 1.442695, %v2938_v43 }
0x11ae   :  { %v2899_v13 = vadd.f32 -1.4531521, %v2895_v9  ;;  %5310 = vrcp.f32 %v2890_v55 }
0x11af   :  { %v2900_v14 = vadd.f32 -1.4531521, %v2896_v3  ;;  %5312 = vpow2.f32 %v2939_v22 }
0x11b0   :  { %v2903_v19 = vmul.f32 %v5305_v1, %v2899_v13  ;;  %5314 = vpow2.f32 %v2941_v30  ;;  %v2863_v30 = vmul.f32 0.5, %v6128_v33 }
0x11b1   :  { %v2904_v21 = vmul.f32 %v5307_v6, %v2900_v14  ;;  %5316 = vpow2.f32 %v2943_v47 }
0x11b2   :  { %v2907_v16 = vadd.f32 1.4214138, %v2903_v19  ;;  %5318 = vpow2.f32 %v2945_v63  ;;  %v281_v63 = vld [vmem:[%s6302_s25 + $0x8] sm:$0xff] }
0x11b3   :  { %v2908_v23 = vadd.f32 1.4214138, %v2904_v21  ;;  %v5309_v38 = vpop.eup %5308  ;;  %v2876_v21 = vsel %vm2872_vm4, 1.0, %v5658_v17  ;;  %v5234_v17 = vld [vmem:[%s6299_s7 + $0x1] ss:$0 sm:$0xff] }
0x11b4   :  { %v2911_v24 = vmul.f32 %v5305_v1, %v2907_v16  ;;  %v5311_v29 = vpop.eup %5310  ;;  %v2897_v31 = vmul.f32 1.0614054, %v5309_v38 }
0x11b5   :  { %v2912_v8 = vmul.f32 %v5307_v6, %v2908_v23  ;;  %v2898_v32 = vmul.f32 1.0614054, %v5311_v29  ;;  %v5313_v60 = vpop.eup %5312 }
0x11b6   :  { %v2915_v53 = vadd.f32 -0.28449672, %v2911_v24  ;;  %v2901_v34 = vadd.f32 -1.4531521, %v2897_v31  ;;  %v5315_v5 = vpop.eup %5314 }
0x11b7   :  { %v2916_v49 = vadd.f32 -0.28449672, %v2912_v8  ;;  %v2902_v40 = vadd.f32 -1.4531521, %v2898_v32  ;;  %v5317_v14 = vpop.eup %5316 }
0x11b8   :  { %v2919_v20 = vmul.f32 %v5305_v1, %v2915_v53  ;;  %v2905_v42 = vmul.f32 %v5309_v38, %v2901_v34  ;;  %v5319_v19 = vpop.eup %5318 }
0x11b9   :  { %v2920_v41 = vmul.f32 %v5307_v6, %v2916_v49  ;;  %v2906_v44 = vmul.f32 %v5311_v29, %v2902_v40 }
0x11ba   :  { %v2923_v4 = vadd.f32 0.2548296, %v2919_v20  ;;  %v2909_v46 = vadd.f32 1.4214138, %v2905_v42 }
0x11bb   :  { %v2924_v36 = vadd.f32 0.2548296, %v2920_v41  ;;  %v2910_v48 = vadd.f32 1.4214138, %v2906_v44 }
0x11bc   :  { %v2927_v50 = vmul.f32 %v5305_v1, %v2923_v4  ;;  %v2913_v62 = vmul.f32 %v5309_v38, %v2909_v46  ;;  %v5330_v46 = vld [vmem:[%s6294_s3] sm:$0x1] }
0x11bd   :  { %v2928_v61 = vmul.f32 %v5307_v6, %v2924_v36  ;;  %v2914_v2 = vmul.f32 %v5311_v29, %v2910_v48 }
0x11be   :  { %v2947_v9 = vmul.f32 %v5313_v60, %v2927_v50  ;;  %v2917_v45 = vadd.f32 -0.28449672, %v2913_v62  ;;  %v3212_v50 = vsel %vm3211_vm7, %v5330_v46, 0.0 }
0x11bf   :  { %v2948_v28 = vmul.f32 %v5315_v5, %v2928_v61  ;;  %v2918_v10 = vadd.f32 -0.28449672, %v2914_v2  ;;  %v5331_v2 = vld [vmem:[%s6294_s3 + $0x1] sm:$0x1] }
0x11c0   :  { %v2921_v3 = vmul.f32 %v5309_v38, %v2917_v45  ;;  %v2951_v15 = vsub.f32 1.0, %v2947_v9  ;;  %v3215_v5 = vsel %vm3211_vm7, %v5331_v2, 0.0  ;;  %v280_v45 = vld [vmem:[%s6302_s25] sm:$0xff]  ;;  %vm3837_vm7 = vcmask 1041408  }
0x11c1   :  { %v2922_v0 = vmul.f32 %v5311_v29, %v2918_v10  ;;  %v2952_v6 = vsub.f32 1.0, %v2948_v28  ;;  %v4775_v28 = vld [vmem:[#allocation16 + $0xe0] sm:$0xf]  ;;  %v5123_v10 = vld [vmem:[#allocation16 + $0xec] sm:$0xf0] }
0x11c2   :  { %v2925_v1 = vadd.f32 0.2548296, %v2921_v3  ;;  %v2955_v18 = vmul.f32 %v2951_v15, %v2875_v27  ;;  %v5121_v3 = vld [vmem:[#allocation16 + $0xe4] sm:$0xf]  ;;  %v4777_v15 = vld [vmem:[#allocation16 + $0xf0] sm:$0xf0] }
0x11c3   :  { %v2926_v55 = vadd.f32 0.2548296, %v2922_v0  ;;  %v2956_v16 = vmul.f32 %v2952_v6, %v2876_v21  ;;  %v4776_v0 = vor.u32 %v5123_v10, %v4775_v28  ;;  %v4780_v6 = vor.u32 %v5121_v3, %v4777_v15  ;;  %v4713_v28 = vld [vmem:[#allocation16 + $0x70] sm:$0xf0]  ;;  %v4719_v3 = vld [vmem:[#allocation16 + $0x68] sm:$0xf] }
0x11c4   :  { %v2929_v13 = vmul.f32 %v5309_v38, %v2925_v1  ;;  %v2959_v38 = vadd.f32 1.0, %v2955_v18  ;;  %v4783_v1 = vld [vmem:[#allocation16 + $0xe8] sm:$0xf]  ;;  %v5119_v18 = vld [vmem:[#allocation16 + $0xcc] sm:$0xf0] }
0x11c5   :  { %v2930_v54 = vmul.f32 %v5311_v29, %v2926_v55  ;;  %v2960_v29 = vadd.f32 1.0, %v2956_v16  ;;  %v5124_v55 = vld [vmem:[#allocation16 + $0xf4] sm:$0xf0]  ;;  %3464 = vmatpush.bf16.msrb.mxu1 %v4776_v0  ;;  %3477 = vmatpush.bf16.msrb.mxu0 %v4780_v6  ;;  %v5117_v16 = vld [vmem:[#allocation16 + $0xc4] sm:$0xf] }
0x11c6   :  { %v2949_v56 = vmul.f32 %v5317_v14, %v2929_v13  ;;  %v2963_v32 = vmul.f32 %v2959_v38, %v2863_v30  ;;  %v5122_v13 = vld [vmem:[#allocation16 + $0xec] sm:$0xf]  ;;  %v4785_v14 = vld [vmem:[#allocation16 + $0xf8] sm:$0xf0]  ;;  %v4784_v27 = vor.u32 %v5124_v55, %v4783_v1  ;;  %v5120_v38 = vld [vmem:[#allocation16 + $0xd4] sm:$0xf0] }
0x11c7   :  { %v2950_v37 = vmul.f32 %v5319_v19, %v2930_v54  ;;  %v2964_v34 = vmul.f32 %v2960_v29, %v2864_v12  ;;  %v4788_v54 = vor.u32 %v5122_v13, %v4785_v14  ;;  %v4759_v19 = vld [vmem:[#allocation16 + $0xc0] sm:$0xf]  ;;  %v4769_v29 = vld [vmem:[#allocation16 + $0xd8] sm:$0xf0]  ;;  %v5108_v0 = vld [vmem:[#allocation16 + $0x74] sm:$0xf0] }
0x11c8   :  { %v2953_v23 = vsub.f32 1.0, %v2949_v56  ;;  %3490 = vmatpush.bf16.msrb.mxu2 %v4784_v27  ;;  %v4760_v56 = vor.u32 %v5119_v18, %v4759_v19  ;;  %v5106_v55 = vld [vmem:[#allocation16 + $0x6c] sm:$0xf]  ;;  %v4721_v13 = vld [vmem:[#allocation16 + $0x78] sm:$0xf0]  ;;  %v4720_v27 = vor.u32 %v5108_v0, %v4719_v3 }
0x11c9   :  { %v2954_v24 = vsub.f32 1.0, %v2950_v37  ;;  %3503 = vmatpush.bf16.msrb.mxu3 %v4788_v54  ;;  %v4761_v37 = vld [vmem:[#allocation16 + $0xd0] sm:$0xf0]  ;;  %v4724_v54 = vor.u32 %v5106_v55, %v4721_v13  ;;  %v4695_v19 = vld [vmem:[#allocation16 + $0x40] sm:$0xf] }
0x11ca   :  { %v2957_v22 = vmul.f32 %v2953_v23, %v2877_v39  ;;  %v4764_v39 = vor.u32 %v5117_v16, %v4761_v37  ;;  %3465 = vmatpush.bf16.msrb.mxu1 %v4760_v56  ;;  %v5103_v18 = vld [vmem:[#allocation16 + $0x4c] sm:$0xf0]  ;;  %v5101_v16 = vld [vmem:[#allocation16 + $0x44] sm:$0xf]  ;;  %v4697_v37 = vld [vmem:[#allocation16 + $0x50] sm:$0xf0] }
0x11cb   :  { %v2958_v8 = vmul.f32 %v2954_v24, %v2878_v7  ;;  %v4767_v24 = vld [vmem:[#allocation16 + $0xc8] sm:$0xf]  ;;  %v4696_v56 = vor.u32 %v5103_v18, %v4695_v19 }
0x11cc   :  { %v2961_v31 = vadd.f32 1.0, %v2957_v22  ;;  %v5118_v22 = vld [vmem:[#allocation16 + $0xcc] sm:$0xf]  ;;  %v4768_v7 = vor.u32 %v5120_v38, %v4767_v24  ;;  %3478 = vmatpush.bf16.msrb.mxu0 %v4764_v39  ;;  %v4703_v39 = vld [vmem:[#allocation16 + $0x48] sm:$0xf] }
0x11cd   :  { %v2962_v53 = vadd.f32 1.0, %v2958_v8  ;;  %v4772_v30 = vor.u32 %v5118_v22, %v4769_v29  ;;  %v5104_v24 = vld [vmem:[#allocation16 + $0x54] sm:$0xf0]  ;;  %v5102_v38 = vld [vmem:[#allocation16 + $0x4c] sm:$0xf] }
0x11ce   :  { %v2965_v49 = vmul.f32 %v2961_v31, %v2865_v57  ;;  %v4743_v57 = vld [vmem:[#allocation16 + $0xa0] sm:$0xf]  ;;  %v5115_v31 = vld [vmem:[#allocation16 + $0xac] sm:$0xf0]  ;;  %3491 = vmatpush.bf16.msrb.mxu2 %v4768_v7  ;;  %v4704_v29 = vor.u32 %v5104_v24, %v4703_v39 }
0x11cf   :  { %v2966_v20 = vmul.f32 %v2962_v53, %v2866_v58  ;;  %v4744_v12 = vor.u32 %v5115_v31, %v4743_v57  ;;  %v5113_v58 = vld [vmem:[#allocation16 + $0xa4] sm:$0xf]  ;;  %v4745_v53 = vld [vmem:[#allocation16 + $0xb0] sm:$0xf0]  ;;  %3504 = vmatpush.bf16.msrb.mxu3 %v4772_v30  ;;  %v4705_v30 = vld [vmem:[#allocation16 + $0x58] sm:$0xf0] }
0x11d0   :  { %v2967_v35 = vpack.c.bf16 %v2965_v49, %v2963_v32  ;;  %v4751_v32 = vld [vmem:[#allocation16 + $0xa8] sm:$0xf]  ;;  %v4748_v49 = vor.u32 %v5113_v58, %v4745_v53  ;;  %v4708_v31 = vor.u32 %v5102_v38, %v4705_v30  ;;  %v5099_v58 = vld [vmem:[#allocation16 + $0x2c] sm:$0xf0]  ;;  %v5097_v53 = vld [vmem:[#allocation16 + $0x24] sm:$0xf] }
0x11d1   :  { %v2968_v40 = vpack.c.bf16 %v2966_v20, %v2964_v34  ;;  %v5116_v34 = vld [vmem:[#allocation16 + $0xb4] sm:$0xf0]  ;;  %v5114_v20 = vld [vmem:[#allocation16 + $0xac] sm:$0xf]  ;;  %3466 = vmatpush.bf16.msrb.mxu1 %v4744_v12  ;;  %v4679_v12 = vld [vmem:[#allocation16 + $0x20] sm:$0xf] }
0x11d2   :  { %3111 = vmatmul.bf16.vlgmr.msra.gmra.mxu2 %v2967_v35  ;;  %v4753_v35 = vld [vmem:[#allocation16 + $0xb8] sm:$0xf0]  ;;  %3479 = vmatpush.bf16.msrb.mxu0 %v4748_v49 }
0x11d3   :  { %3125 = vmatmul.bf16.vlgmr.msra.gmra.mxu3 %v2968_v40 }
0x1255   :  { %v3112_v41 = vpop.f32.mrf.mxu2 }
0x1256   :  { %v3113_v33 = vadd.f32 %v5234_v17, %v3112_v41  ;;  %v3126_v42 = vpop.f32.mrf.mxu3  ;;  %v4756_v41 = vor.u32 %v5114_v20, %v4753_v35  ;;  %v4681_v20 = vld [vmem:[#allocation16 + $0x30] sm:$0xf0]  ;;  %v4687_v35 = vld [vmem:[#allocation16 + $0x28] sm:$0xf] }
0x1258   :  { %v3127_v51 = vadd.f32 %v3126_v42, %v3113_v33  ;;  %v4727_v33 = vld [vmem:[#allocation16 + $0x80] sm:$0xf]  ;;  %v5111_v42 = vld [vmem:[#allocation16 + $0x8c] sm:$0xf0]  ;;  %3505 = vmatpush.bf16.msrb.mxu3 %v4756_v41 }
0x125a   :  { %v3131_v43 = vadd.f32 %v3127_v51, %v6121_v25  ;;  %v5109_v51 = vld [vmem:[#allocation16 + $0x84] sm:$0xf] }
0x125c   :  { %3137 = vadd.xlane.f32.xlu1 %v3131_v43 }
0x125d   :  { %v3114_v11 = vpop.f32.mrf.mxu2 }
0x125e   :  { %v3115_v52 = vadd.f32 %v5234_v17, %v3114_v11  ;;  %v3128_v4 = vpop.f32.mrf.mxu3  ;;  %v4752_v17 = vor.u32 %v5116_v34, %v4751_v32  ;;  %v4728_v11 = vor.u32 %v5111_v42, %v4727_v33  ;;  %v4680_v34 = vor.u32 %v5099_v58, %v4679_v12  ;;  %v5098_v33 = vld [vmem:[#allocation16 + $0x2c] sm:$0xf]  ;;  %v4689_v42 = vld [vmem:[#allocation16 + $0x38] sm:$0xf0] }
0x125f   :  { %v5154_v12 = vld [vmem:[#allocation17 + $0xe8] sm:$0xff] }
0x1260   :  { %v3129_v44 = vadd.f32 %v3128_v4, %v3115_v52  ;;  %3492 = vmatpush.bf16.msrb.mxu2 %v4752_v17  ;;  %v4729_v52 = vld [vmem:[#allocation16 + $0x90] sm:$0xf0]  ;;  %v4735_v4 = vld [vmem:[#allocation16 + $0x88] sm:$0xf]  ;;  %3467 = vmatpush.bf16.msrb.mxu1 %v4728_v11  ;;  %v4684_v17 = vor.u32 %v5097_v53, %v4681_v20 }
0x1262   :  { %v3132_v36 = vadd.f32 %v3129_v44, %v6123_v26  ;;  %v5112_v44 = vld [vmem:[#allocation16 + $0x94] sm:$0xf0] }
0x1264   :  { %3139 = vadd.xlane.f32.xlu2 %v3132_v36 }
0x126c   :  { %3213 = vadd.xlane.f32.xlu2 %v3212_v50  ;;  %v4732_v50 = vor.u32 %v5109_v51, %v4729_v52 }
0x126e   :  { %3480 = vmatpush.bf16.msrb.mxu0 %v4732_v50 }
0x1284   :  { %3194 = vperm.xlu2 %5209, %v281_v63  }
0x12cf   :  { %v3138_v47 = vpop.xlane.xlu1 %3137 }
0x12d0   :  { %v3141_v48 = vmul.f32 %v3138_v47, %v5905_v59  ;;  %v4736_v47 = vor.u32 %v5112_v44, %v4735_v4  ;;  %v5235_v4 = vld [vmem:[%s6300_s1 + $0x1] ss:$0 sm:$0xff] }
0x12d1   :  { %v4663_v44 = vld [vmem:[#allocation16] sm:$0xf] }
0x12d2   :  { %v6169_v61 = vsub.f32 %v3131_v43, %v3141_v48  ;;  %v5110_v48 = vld [vmem:[#allocation16 + $0x8c] sm:$0xf]  ;;  %3493 = vmatpush.bf16.msrb.mxu2 %v4736_v47  ;;  %v5093_v47 = vld [vmem:[#allocation16 + $0x4] sm:$0xf] }
0x12d4   :  { %v3145_v25 = vmul.f32 %v6169_v61, %v6169_v61 }
0x12d6   :  { %3147 = vadd.xlane.f32.xlu0 %v3145_v25  ;;  %v4737_v25 = vld [vmem:[#allocation16 + $0x98] sm:$0xf0]  ;;  %3494 = vmatpush.bf16.msrb.mxu2 %v4720_v27 }
0x12d7   :  { %v3140_v62 = vpop.xlane.xlu2 %3139  ;;  %v5156_v27 = vld [vmem:[#allocation17 + $0xf8] sm:$0xff] }
0x12d8   :  { %v3142_v26 = vmul.f32 %v3140_v62, %v5905_v59  ;;  %v4740_v62 = vor.u32 %v5110_v48, %v4737_v25  ;;  %v4665_v48 = vld [vmem:[#allocation16 + $0x10] sm:$0xf0] }
0x12d9   :  { %v4668_v25 = vor.u32 %v5093_v47, %v4665_v48  ;;  %v5128_v48 = vld [vmem:[#allocation17 + $0x18] sm:$0xff] }
0x12da   :  { %v6175_v60 = vsub.f32 %v3132_v36, %v3142_v26  ;;  %3506 = vmatpush.bf16.msrb.mxu3 %v4740_v62  ;;  %3495 = vmatpush.bf16.msrb.mxu2 %v4704_v29  ;;  %v4671_v62 = vld [vmem:[#allocation16 + $0x8] sm:$0xf] }
0x12dc   :  { %v3146_v9 = vmul.f32 %v6175_v60, %v6175_v60 }
0x12de   :  { %3149 = vadd.xlane.f32.xlu1 %v3146_v9  ;;  %3216 = vadd.xlane.f32.xlu0 %v3215_v5  ;;  %v4711_v5 = vld [vmem:[#allocation16 + $0x60] sm:$0xf] }
0x12df   :  { %v3214_v40 = vpop.xlane.xlu2 %3213  ;;  %3507 = vmatpush.bf16.msrb.mxu3 %v4724_v54 }
0x12e0   :  { %v3218_v46 = vmax.f32 %v3214_v40, 1e-09  ;;  %v5100_v40 = vld [vmem:[#allocation16 + $0x34] sm:$0xf0] }
0x12e1   :  { %v4688_v41 = vor.u32 %v5100_v40, %v4687_v35 }
0x12e2   :  { %v6193_v10 = vperm.slane %v3218_v46, 0 }
0x12e3   :  { %3508 = vmatpush.bf16.msrb.mxu3 %v4708_v31  ;;  %3496 = vmatpush.bf16.msrb.mxu2 %v4688_v41  ;;  %v5146_v31 = vld [vmem:[#allocation17 + $0xa8] sm:$0xff]  ;;  %v5129_v41 = vld [vmem:[#allocation17 + $0x20] sm:$0xff] }
0x12e4   :  { %vm3227_vm12 = vweird.f32 %v6193_v10 }
0x12e7   :  { %v3195_v38 = vpop.permute.xlu2 %3194 }
0x12f7   :  { %3189 = vperm.xlu1 %5208, %v280_v45   ;;  %v5105_v45 = vld [vmem:[#allocation16 + $0x64] sm:$0xf] }
0x12f8   :  { %v4716_v14 = vor.u32 %v5105_v45, %v4713_v28  ;;  %v5236_v28 = vld [vmem:[%s6301_s26 + $0x1] ss:$0 sm:$0xff] }
0x12fa   :  { %3481 = vmatpush.bf16.msrb.mxu0 %v4716_v14  ;;  %v5148_v14 = vld [vmem:[#allocation17 + $0xb8] sm:$0xff] }
0x1349   :  { %v3148_v21 = vpop.xlane.xlu0 %3147 }
0x134a   :  { %v3151_v23 = vmul.f32 %v3148_v21, %v5905_v59 }
0x134c   :  { %v6182_v8 = vadd.f32 1e-05, %v3151_v23  ;;  %v4700_v23 = vor.u32 %v5101_v16, %v4697_v37  ;;  %v5147_v16 = vld [vmem:[#allocation17 + $0xb0] sm:$0xff] }
0x134d   :  { %v5155_v37 = vld [vmem:[#allocation17 + $0xf0] sm:$0xff] }
0x134e   :  { %5320 = vrsqrt.f32 %v6182_v8  ;;  %vm3161_vm9 = vweird.f32 %v6182_v8  ;;  %3482 = vmatpush.bf16.msrb.mxu0 %v4700_v23 }
0x1351   :  { %v3150_v43 = vpop.xlane.xlu1 %3149  ;;  %v3217_v2 = vpop.xlane.xlu0 %3216 }
0x1352   :  { %v3152_v36 = vmul.f32 %v3150_v43, %v5905_v59  ;;  %v5107_v59 = vld [vmem:[#allocation16 + $0x6c] sm:$0xf0]  ;;  %v3219_v1 = vmax.f32 %v3217_v2, 1e-09  ;;  %v4692_v43 = vor.u32 %v5098_v33, %v4689_v42  ;;  %3483 = vmatpush.bf16.msrb.mxu0 %v4684_v17  ;;  %v5094_v2 = vld [vmem:[#allocation16 + $0xc] sm:$0xf] }
0x1353   :  { %v4712_v6 = vor.u32 %v5107_v59, %v4711_v5  ;;  %v4673_v59 = vld [vmem:[#allocation16 + $0x18] sm:$0xf0]  ;;  %v5137_v33 = vld [vmem:[#allocation17 + $0x60] sm:$0xff] }
0x1354   :  { %v6186_v63 = vpop.eup %5320  ;;  %v6188_v26 = vadd.f32 1e-05, %v3152_v36  ;;  %v6198_v7 = vperm.slane %v3219_v1, 0  ;;  %v5095_v36 = vld [vmem:[#allocation16 + $0xc] sm:$0xf0]  ;;  %3509 = vmatpush.bf16.msrb.mxu3 %v4692_v43  ;;  %v4676_v3 = vor.u32 %v5094_v2, %v4673_v59  ;;  %v5132_v1 = vld [vmem:[#allocation17 + $0x38] sm:$0xff] }
0x1355   :  { %v3156_v9 = vmul.f32 %v6186_v63, %v6182_v8  ;;  %3468 = vmatpush.bf16.msrb.mxu1 %v4712_v6  ;;  %vm3162_vm8 = vweird.f32 %v6186_v63  ;;  %v4664_v50 = vor.u32 %v5095_v36, %v4663_v44  ;;  %v5140_v6 = vld [vmem:[#allocation17 + $0x78] sm:$0xff]  ;;  %v5145_v42 = vld [vmem:[#allocation17 + $0xa0] sm:$0xff] }
0x1356   :  { %5322 = vrsqrt.f32 %v6188_v26  ;;  %vm3163_vm10 = vmor %vm3161_vm9, %vm3162_vm8  ;;  %vm3171_vm14 = vweird.f32 %v6188_v26  ;;  %3484 = vmatpush.bf16.msrb.mxu0 %v4668_v25  ;;  %vm3242_vm1 = vweird.f32 %v6198_v7  ;;  %v3248_v43 = vand.u32 2147483648, %v6198_v7  ;;  %v5136_v25 = vld [vmem:[#allocation17 + $0x58] sm:$0xff] }
0x1357   :  { %v3157_v15 = vmul.f32 %v6186_v63, %v3156_v9  ;;  %5324 = vrcp.f32 %v6193_v10 }
0x1358   :  { %5326 = vrcp.f32 %v6198_v7  ;;  %3510 = vmatpush.bf16.msrb.mxu3 %v4676_v3  ;;  %v5135_v3 = vld [vmem:[#allocation17 + $0x50] sm:$0xff] }
0x1359   :  { %v3158_v21 = vmul.f32 0.5, %v3157_v15  ;;  %3469 = vmatpush.bf16.msrb.mxu1 %v4696_v56 }
0x135a   :  { %3797 = vmatpush.bf16.msra.mxu0 %v5140_v6 }
0x135b   :  { %v3159_v22 = vsub.f32 1.5, %v3158_v21  ;;  %v5139_v21 = vld [vmem:[#allocation17 + $0x70] sm:$0xff] }
0x135c   :  { %v6200_v57 = vpop.eup %5322  ;;  %3823 = vmatpush.bf16.msra.mxu3 %v5156_v27 }
0x135d   :  { %v3160_v32 = vmul.f32 %v6186_v63, %v3159_v22  ;;  %v3166_v49 = vmul.f32 %v6200_v57, %v6188_v26  ;;  %v6211_v11 = vpop.eup %5324  ;;  %3470 = vmatpush.bf16.msrb.mxu1 %v4680_v34  ;;  %vm3172_vm13 = vweird.f32 %v6200_v57  ;;  %v5131_v26 = vld [vmem:[#allocation17 + $0x30] sm:$0xff]  ;;  %v3231_v34 = vand.u32 2147483647, %v6193_v10 }
0x135e   :  { %v6219_v0 = vpop.eup %5326  ;;  %vm3173_vm11 = vmor %vm3171_vm14, %vm3172_vm13  ;;  %3798 = vmatpush.bf16.msra.mxu0 %v5139_v21  ;;  %vm3228_vm15 = vweird.f32 %v6211_v11  ;;  %v5151_v21 = vld [vmem:[#allocation17 + $0xd0] sm:$0xff] }
0x135f   :  { %v3167_v8 = vmul.f32 %v6200_v57, %v3166_v49  ;;  %v3164_v51 = vsel %vm3163_vm10, %v6186_v63, %v3160_v32  ;;  %v5096_v63 = vld [vmem:[#allocation16 + $0x14] sm:$0xf0]  ;;  %v3238_v54 = vmul.f32 %v6219_v0, %v6198_v7  ;;  %v3233_v32 = vand.u32 2147483648, %v6193_v10  ;;  %vm6234_vm0 = vmor %vm3227_vm12, %vm3228_vm15 }
0x1360   :  { %v3175_v52 = vmul.f32 %v3164_v51, %v6169_v61  ;;  %v3223_v61 = vmul.f32 %v6211_v11, %v6193_v10  ;;  %v4672_v9 = vor.u32 %v5096_v63, %v4671_v62  ;;  %3824 = vmatpush.bf16.msra.mxu3 %v5155_v37  ;;  %vm3243_vm2 = vweird.f32 %v6219_v0  ;;  %v5152_v63 = vld [vmem:[#allocation17 + $0xd8] sm:$0xff]  ;;  %v5142_v37 = vld [vmem:[#allocation17 + $0x88] sm:$0xff] }
0x1361   :  { %v3168_v46 = vmul.f32 0.5, %v3167_v8  ;;  %3471 = vmatpush.bf16.msrb.mxu1 %v4664_v50  ;;  %v3239_v22 = vsub.f32 1.0, %v3238_v54  ;;  %v5153_v8 = vld [vmem:[#allocation17 + $0xe0] sm:$0xff]  ;;  %vm6244_vm3 = vcmp.eq.f32.partialorder %v3231_v34, 8.507059e+37  ;;  %v3234_v44 = vor.u32 1.1754944e-38, %v3233_v32  ;;  %vm6252_vm4 = vmor %vm3242_vm1, %vm3243_vm2 }
0x1362   :  { %v3180_v45 = vmul.f32 %v5235_v4, %v3175_v52  ;;  %3497 = vmatpush.bf16.msrb.mxu2 %v4672_v9  ;;  %v3224_v55 = vsub.f32 1.0, %v3223_v61  ;;  %v3246_v50 = vand.u32 2147483647, %v6198_v7  ;;  %v3249_v9 = vor.u32 1.1754944e-38, %v3248_v43 }
0x1363   :  { %v3169_v5 = vsub.f32 1.5, %v3168_v46  ;;  %v3240_v20 = vmul.f32 %v6219_v0, %v3239_v22 }
0x1364   :  { %v3185_v19 = vadd.f32 %v5236_v28, %v3180_v45  ;;  %v3225_v24 = vmul.f32 %v6211_v11, %v3224_v55  ;;  %3825 = vmatpush.bf16.msra.mxu3 %v5154_v12  ;;  %vm3247_vm5 = vcmp.eq.f32.partialorder %v3246_v50, 8.507059e+37 }
0x1365   :  { %v3170_v15 = vmul.f32 %v6200_v57, %v3169_v5  ;;  %3784 = vmatpush.bf16.msra.mxu1 %v5132_v1  ;;  %v3241_v46 = vadd.f32 %v6219_v0, %v3240_v20 }
0x1366   :  { %3810 = vmatpush.bf16.msra.mxu2 %v5148_v14  ;;  %v3226_v49 = vadd.f32 %v6211_v11, %v3225_v24  ;;  %v5149_v24 = vld [vmem:[#allocation17 + $0xc0] sm:$0xff] }
0x1367   :  { %v3174_v13 = vsel %vm3173_vm11, %v6200_v57, %v3170_v15  ;;  %v5138_v57 = vld [vmem:[#allocation17 + $0x68] sm:$0xff]  ;;  %v3245_v45 = vsel %vm6252_vm4, %v6219_v0, %v3241_v46 }
0x1368   :  { %v3176_v18 = vmul.f32 %v3174_v13, %v6175_v60  ;;  %v5130_v60 = vld [vmem:[#allocation17 + $0x28] sm:$0xff]  ;;  %3799 = vmatpush.bf16.msra.mxu0 %v5138_v57  ;;  %v3230_v52 = vsel %vm6234_vm0, %v6211_v11, %v3226_v49  ;;  %3826 = vmatpush.bf16.msra.mxu3 %v5153_v8  ;;  %v5144_v11 = vld [vmem:[#allocation17 + $0x98] sm:$0xff]  ;;  %v3250_v1 = vsel %vm3247_vm5, %v3249_v9, %v3245_v45 }
0x1369   :  { %v3190_v56 = vpop.permute.xlu1 %3189  ;;  %3785 = vmatpush.bf16.msra.mxu1 %v5131_v26  ;;  %v3235_v61 = vsel %vm6244_vm3, %v3234_v44, %v3230_v52  ;;  %v5143_v26 = vld [vmem:[#allocation17 + $0x90] sm:$0xff] }
0x136a   :  { %v3197_v23 = vmul.f32 %v3190_v56, %v3185_v19  ;;  %v3181_v39 = vmul.f32 %v5235_v4, %v3176_v18  ;;  %3811 = vmatpush.bf16.msra.mxu2 %v5147_v16  ;;  %v5126_v19 = vld [vmem:[#allocation17 + $0x8] sm:$0xff]  ;;  %v5125_v56 = vld [vmem:[#allocation17] sm:$0xff] }
0x136b   :  { %v5134_v18 = vld [vmem:[#allocation17 + $0x48] sm:$0xff]  ;;  %v5133_v16 = vld [vmem:[#allocation17 + $0x40] sm:$0xff] }
0x136c   :  { %v3199_v29 = vrot.slane %v3197_v23, 4  ;;  %v3186_v30 = vadd.f32 %v5236_v28, %v3181_v39  ;;  %3800 = vmatpush.bf16.msra.mxu0 %v5137_v33  ;;  %v5127_v28 = vld [vmem:[#allocation17 + $0x10] sm:$0xff]  ;;  %3827 = vmatpush.bf16.msra.mxu3 %v5152_v63  ;;  %v5141_v39 = vld [vmem:[#allocation17 + $0x80] sm:$0xff] }
0x136d   :  { %3786 = vmatpush.bf16.msra.mxu1 %v5130_v60 }
0x136e   :  { %v3200_v58 = vadd.f32 %v3199_v29, %v3197_v23  ;;  %v3198_v53 = vmul.f32 %v3195_v38, %v3186_v30  ;;  %3812 = vmatpush.bf16.msra.mxu2 %v5146_v31  ;;  %v5150_v23 = vld [vmem:[#allocation17 + $0xc8] sm:$0xff]  ;;  %v3286_v38 = vld [vmem:[%s5798_s13] sm:$0xf]  ;;  %s5659_s13 = smov [#allocation19]  }
0x136f   :  { %v3288_v22 = vperm.slane %v3286_v38, 0  ;;  %v3289_v29 = vperm.slane %v3286_v38, 1  ;;  %v3291_v32 = vperm.slane %v3286_v38, 3 }
0x1370   :  { %v3201_v40 = vrot.slane %v3200_v58, 2  ;;  %v3205_v17 = vrot.slane %v3198_v53, 4  ;;  %3801 = vmatpush.bf16.msra.mxu0 %v5136_v25  ;;  %3828 = vmatpush.bf16.msra.mxu3 %v5151_v21 }
0x1371   :  { %3787 = vmatpush.bf16.msra.mxu1 %v5129_v41 }
0x1372   :  { %v3202_v51 = vadd.f32 %v3201_v40, %v3200_v58  ;;  %v3206_v10 = vadd.f32 %v3205_v17, %v3198_v53  ;;  %3813 = vmatpush.bf16.msra.mxu2 %v5145_v42  ;;  %v3290_v53 = vperm.slane %v3286_v38, 2 }
0x1374   :  { %v3203_v36 = vrot.slane %v3202_v51, 1  ;;  %v3207_v47 = vrot.slane %v3206_v10, 2  ;;  %3802 = vmatpush.bf16.msra.mxu0 %v5135_v3  ;;  %3829 = vmatpush.bf16.msra.mxu3 %v5150_v23 }
0x1375   :  { %3788 = vmatpush.bf16.msra.mxu1 %v5128_v48 }
0x1376   :  { %v3204_v2 = vadd.f32 %v3203_v36, %v3202_v51  ;;  %v3208_v5 = vadd.f32 %v3207_v47, %v3206_v10  ;;  %3814 = vmatpush.bf16.msra.mxu2 %v5144_v11  ;;  %v5237_v36 = vld [vmem:[%s5808_s27] ss:$0 sm:$0xff]  ;;  %s3859_s27 = sshll.u32 %s5659_s13, 4  ;;  %s3860_s27 = int_to_ptr.vmem [resolvable:$true] %s3859_s27 }
0x1378   :  { %v3236_v59 = vmul.f32 %v3235_v61, %v3204_v2  ;;  %v3209_v7 = vrot.slane %v3208_v5, 1  ;;  %3803 = vmatpush.bf16.msra.mxu0 %v5134_v18  ;;  %3830 = vmatpush.bf16.msra.mxu3 %v5149_v24 }
0x1379   :  { %3789 = vmatpush.bf16.msra.mxu1 %v5127_v28 }
0x137a   :  { %v3210_v15 = vadd.f32 %v3209_v7, %v3208_v5  ;;  %v3252_v6 = vpack.c.bf16 %v3236_v59, %v3236_v59  ;;  %3815 = vmatpush.bf16.msra.mxu2 %v5143_v26 }
0x137c   :  { %v3251_v55 = vmul.f32 %v3250_v1, %v3210_v15  ;;  %v3298_v14 = vunpack.c.l.b16 %v3252_v6  ;;  %3804 = vmatpush.bf16.msra.mxu0 %v5133_v16 }
0x137d   :  { %3790 = vmatpush.bf16.msra.mxu1 %v5126_v19 }
0x137e   :  { %v3253_v13 = vpack.c.bf16 %v3251_v55, %v3251_v55  ;;  %3816 = vmatpush.bf16.msra.mxu2 %v5142_v37 }
0x1380   :  { %v3299_v27 = vunpack.c.l.b16 %v3253_v13 }
0x1381   :  { %3791 = vmatpush.bf16.msra.mxu1 %v5125_v56 }
0x1382   :  { %v3301_v54 = vsel %vm3300_vm6, %v3299_v27, %v3298_v14  ;;  %3817 = vmatpush.bf16.msra.mxu2 %v5141_v39 }
0x1383   :  { %v3302_v0 = vpack.c.b16 %v3301_v54, %v3301_v54 }
0x1385   :  { %3472 = vmatmul.bf16.vlgmr.msrb.gmra.mxu1 %v3302_v0  ;;  %3485 = vmatmul.bf16.vlgmr.msrb.gmra.mxu0 %v3302_v0 }
0x1386   :  { %3498 = vmatmul.bf16.vlgmr.msrb.gmra.mxu2 %v3302_v0  ;;  %3511 = vmatmul.bf16.vlgmr.msrb.gmra.mxu3 %v3302_v0 }
0x1402   :  { %v3473_v30 = vpop.f32.mrf.mxu1  ;;  %v3486_v60 = vpop.f32.mrf.mxu0 }
0x1403   :  { %v3474_v57 = vadd.f32 %v3473_v30, %v3288_v22  ;;  %v3487_v31 = vadd.f32 %v3486_v60, %v3289_v29 }
0x1405   :  { %v3516_v12 = vmax.f32 %v3474_v57, 0.0  ;;  %v3517_v58 = vmax.f32 %v3487_v31, 0.0 }
0x1407   :  { %v3520_v49 = vpack.c.bf16 %v3516_v12, %v3516_v12  ;;  %v3521_v34 = vpack.c.bf16 %v3517_v58, %v3517_v58 }
0x1409   :  { %v3499_v20 = vpop.f32.mrf.mxu2  ;;  %v3512_v35 = vpop.f32.mrf.mxu3  ;;  %3792 = vmatmul.bf16.vlgmr.msra.gmra.mxu1 %v3520_v49  ;;  %3805 = vmatmul.bf16.vlgmr.msra.gmra.mxu0 %v3521_v34 }
0x140a   :  { %v3500_v40 = vadd.f32 %v3499_v20, %v3290_v53  ;;  %v3513_v17 = vadd.f32 %v3512_v35, %v3291_v32  ;;  %v3475_v41 = vpop.f32.mrf.mxu1  ;;  %v3488_v33 = vpop.f32.mrf.mxu0 }
0x140c   :  { %v3518_v42 = vmax.f32 %v3500_v40, 0.0  ;;  %v3519_v8 = vmax.f32 %v3513_v17, 0.0 }
0x140e   :  { %v3522_v51 = vpack.c.bf16 %v3518_v42, %v3518_v42  ;;  %v3523_v10 = vpack.c.bf16 %v3519_v8, %v3519_v8 }
0x1410   :  { %3818 = vmatmul.bf16.vlgmr.msra.gmra.mxu2 %v3522_v51  ;;  %3831 = vmatmul.bf16.vlgmr.msra.gmra.mxu3 %v3523_v10 }
0x1411   :  { %v3501_v43 = vpop.f32.mrf.mxu2  ;;  %v3514_v52 = vpop.f32.mrf.mxu3 }
0x1486   :  { %v3793_v4 = vpop.f32.mrf.mxu1  ;;  %v3806_v44 = vpop.f32.mrf.mxu0 }
0x1487   :  { %v3794_v46 = vadd.f32 %v5237_v36, %v3793_v4 }
0x1489   :  { %v3807_v48 = vadd.f32 %v3806_v44, %v3794_v46 }
0x148e   :  { %v3795_v50 = vpop.f32.mrf.mxu1  ;;  %v3808_v47 = vpop.f32.mrf.mxu0 }
0x1493   :  { %v3819_v25 = vpop.f32.mrf.mxu2  ;;  %v3832_v62 = vpop.f32.mrf.mxu3 }
0x1494   :  { %v3820_v11 = vadd.f32 %v3819_v25, %v3807_v48 }
0x1496   :  { %v3833_v63 = vadd.f32 %v3832_v62, %v3820_v11 }
0x1498   :  { %v3836_v2 = vmul.f32 %v3833_v63, %v3833_v63 }
0x149a   :  { %v3838_v5 = vsel %vm3837_vm7, %v3836_v2, 0.0 }
0x149b   :  { %v3821_v61 = vpop.f32.mrf.mxu2  ;;  %v3834_v9 = vpop.f32.mrf.mxu3  ;;  %3839 = vadd.xlane.f32.xlu0 %v3838_v5 }
0x150e   :  { %v3840_v59 = vpop.xlane.xlu0 %3839 }
0x150f   :  { %v3841_v45 = vmax.f32 %v3840_v59, 1e-24 }
0x1511   :  { %5328 = vrsqrt.f32 %v3841_v45  ;;  %vm3848_vm9 = vweird.f32 %v3841_v45 }
0x1517   :  { %v5329_v7 = vpop.eup %5328 }
0x1518   :  { %v3843_v28 = vmul.f32 %v5329_v7, %v3841_v45  ;;  %vm3849_vm8 = vweird.f32 %v5329_v7 }
0x1519   :  { %vm3850_vm10 = vmor %vm3848_vm9, %vm3849_vm8 }
0x151a   :  { %v3844_v3 = vmul.f32 %v5329_v7, %v3843_v28 }
0x151c   :  { %v3845_v15 = vmul.f32 0.5, %v3844_v3 }
0x151e   :  { %v3846_v1 = vsub.f32 1.5, %v3845_v15 }
0x1520   :  { %v3847_v6 = vmul.f32 %v5329_v7, %v3846_v1 }
0x1522   :  { %v3851_v55 = vsel %vm3850_vm10, %v5329_v7, %v3847_v6 }
0x1523   :  { %v3852_v13 = vmul.f32 %v3851_v55, %v3833_v63 }
0x1525   :  { %3853 = vst [vmem:[#allocation19] sm:$0x3] %v3852_v13 }
0x1526   :  { %5595 = shalt.err (!%p5592_p12)
}
0x1527   :  { %3864 = dma.vmem_to_hbm [thread:$0]  %s3860_s27, 32, %s3862_s6, [#allocation4]  }
0x1528   :  { %5608 = dma.done.wait [#allocation4], 32  }
0x1529   :  { %5609 = vsyncadd [#allocation4], 4294967264 }
0x152a   :  { %3869 = vsyncpa [#allocation3], 1 }
0x152b   :  { %3870 = vsyncpa [#allocation6], 1 }
0x152c   :  { %3871 = vsyncpa [#allocation9], 1 }
0x152d   :  { %3872 = vsyncpa [#allocation12], 1 }
0x152e   :  { %3873 = vsyncpa [#allocation15], 1 }
0x152f   :  { %3874 = vsyncpa [#allocation18], 1 }
0x1530   :  { %3875 = vsyncpa [#allocation4], 1 }

</bundles_post_ra>
